<compile_context>
chip_gen: v6e
topology: v6e:2x2x1
jax: 0.10.0
libtpu: 0.0.40
codegen_flags: <defaults>
</compile_context>

<pallas_src>
import functools

import jax
import jax.numpy as jnp
from jax.experimental import pallas as pl
from jax.experimental.pallas import tpu as pltpu

BN_EPS = 1e-5
_INV_SQRT2 = 0.7071067811865476
_SQRT_2_OVER_PI = 0.7978845608028654


def _num_tensorcores():
    """Best-effort TensorCores-per-chip (2 on megacore parts: v4/v5p/v7x)."""
    try:
        kind = jax.devices()[0].device_kind.lower()
    except Exception:
        return 1
    return 2 if any(t in kind for t in ("v7", "7x", "v4", "v5p")) else 1


def _gelu(y, approx):
    if approx:
        # tanh approximation: transcendental lands on the (otherwise idle) EUP.
        return 0.5 * y * (1.0 + jnp.tanh(
            _SQRT_2_OVER_PI * (y + 0.044715 * (y * y * y))))
    return 0.5 * y * (1.0 + jax.lax.erf(y * _INV_SQRT2))


# ----------------------------- Pallas kernel -------------------------------

def _conv3x3s2_bn_gelu_kernel(x_ref, w_ref, b_ref, o_ref, *,
                              th, wo, ho_total, approx_gelu):
    """Fused 3x3 / stride-2 / pad-1 conv + BN bias + GELU for one row strip.

    x_ref : (Hp, Wp2, 2*Cin)  padded, W-pair-merged image of one batch (bf16).
    w_ref : (6, 2*Cin, Cout)  [kh]   = stacked taps (kh, kw=0) and (kh, kw=1)
                              [3+kh] = tap (kh, kw=2), zero-padded to 2*Cin.
    b_ref : (1, Cout)         folded BN bias (f32).
    o_ref : (th, Wo, Cout)    output strip.
    """
    wall = w_ref[...]            # resident folded weights (hoisted load)
    bias = b_ref[...]
    ho0 = pl.program_id(1) * th
    for i in range(th):                                # static unroll
        ho = jnp.minimum(ho0 + i, ho_total - 1)        # clamp ragged last strip
        slab = x_ref[pl.ds(2 * ho, 3), :, :]           # (3, Wp2, 2*Cin)
        acc = None
        for kh in range(3):
            a = slab[kh, :wo, :]                       # merged col wo   -> kw=0,1
            b = slab[kh, 1:wo + 1, :]                  # merged col wo+1 -> kw=2
            pa = jnp.dot(a, wall[kh], preferred_element_type=jnp.float32)
            pb = jnp.dot(b, wall[3 + kh], preferred_element_type=jnp.float32)
            acc = pa + pb if acc is None else acc + pa + pb
        y = _gelu(acc + bias, approx_gelu)
        o_ref[i, :, :] = y.astype(o_ref.dtype)


def _pick_strip(ho, n_batch, max_rows=16):
    """Rows per output strip and number of strips (near-equal, balanced)."""
    th = max(1, min(ho, max_rows))
    r = pl.cdiv(ho, th)
    # Megacore parts need >=2 near-equal parallel steps when the batch axis
    # alone cannot feed both TensorCores; single-core parts keep one strip.
    if _num_tensorcores() >= 2 and n_batch * r < 2 and ho >= 2:
        r = 2
    th = pl.cdiv(ho, r)
    return th, pl.cdiv(ho, th)


def conv3x3s2_bn_gelu(x_nhwc, w_all, bias, *, approx_gelu=True,
                      out_dtype=jnp.bfloat16):
    """One fused ConvBNLayer stage: 3x3/s2/p1 conv + folded BN bias + GELU."""
    N, H, W, cin = x_nhwc.shape
    cin2, cout = w_all.shape[1], w_all.shape[2]
    assert cin2 == 2 * cin
    ho = (H - 1) // 2 + 1
    wo = (W - 1) // 2 + 1
    hp = H + 2
    wp = 2 * (wo + 1)                     # even padded width, >= W + 2
    wp2 = wp // 2

    xq = x_nhwc if x_nhwc.dtype == jnp.bfloat16 else x_nhwc.astype(jnp.bfloat16)
    xp = jnp.pad(xq, ((0, 0), (1, 1), (1, wp - W - 1), (0, 0)))
    x2 = xp.reshape(N, hp, wp2, cin2)     # free, contiguous W-pair merge

    th, r = _pick_strip(ho, N)
    grid = (N, r)

    out_itemsize = 2 if out_dtype == jnp.bfloat16 else 4
    in_block = hp * wp2 * cin2 * 2
    out_block = th * wo * cout * out_itemsize
    w_bytes = w_all.size * 2 + bias.size * 4
    vmem_limit = int(min(max(2 * (in_block + out_block) + w_bytes + (4 << 20),
                             16 << 20), 60 << 20))

    kernel = functools.partial(_conv3x3s2_bn_gelu_kernel, th=th, wo=wo,
                               ho_total=ho, approx_gelu=approx_gelu)
    return pl.pallas_call(
        kernel,
        out_shape=jax.ShapeDtypeStruct((N, ho, wo, cout), out_dtype),
        grid=grid,
        in_specs=[
            # Whole padded image of one batch, resident across its row strips.
            pl.BlockSpec((None, hp, wp2, cin2), lambda n, s: (n, 0, 0, 0)),
            pl.BlockSpec((6, cin2, cout), lambda n, s: (0, 0, 0)),   # resident
            pl.BlockSpec((1, cout), lambda n, s: (0, 0)),            # resident
        ],
        out_specs=pl.BlockSpec((None, th, wo, cout), lambda n, s: (n, s, 0, 0)),
        compiler_params=pltpu.CompilerParams(
            dimension_semantics=("parallel", "parallel"),
            vmem_limit_bytes=vmem_limit),
    )(x2, w_all, bias)


# ------------------------------- glue (JAX) --------------------------------

def fold_conv_bn_params(p):
    """Fold eval-mode BN into the conv weights once (hoisted out of forward)."""
    scale = p["gamma"] / jnp.sqrt(p["var"] + BN_EPS)
    bias = p["beta"] - p["mean"] * scale
    w = p["w_hwio"] * scale                                    # (3,3,Cin,Cout)
    w01 = jnp.concatenate([w[:, 0], w[:, 1]], axis=1)          # (3,2Cin,Cout)
    w2 = jnp.concatenate([w[:, 2], jnp.zeros_like(w[:, 2])], axis=1)
    w_all = jnp.concatenate([w01, w2], axis=0)                 # (6,2Cin,Cout)
    return dict(w_all=w_all.astype(jnp.bfloat16),
                bias=bias.reshape(1, -1).astype(jnp.float32))


@functools.partial(jax.jit,
                   static_argnames=("use_pos_embed", "flatten", "approx_gelu"))
def _po_patch_embed_impl(x_nchw, folded, pos_embed, *, use_pos_embed,
                         flatten, approx_gelu):
    x = jnp.transpose(x_nchw, (0, 2, 3, 1))                    # NCHW -> NHWC
    n_stages = len(folded)
    for si, f in enumerate(folded):
        last = si == n_stages - 1
        x = conv3x3s2_bn_gelu(
            x, f["w_all"], f["bias"], approx_gelu=approx_gelu,
            out_dtype=jnp.float32 if last else jnp.bfloat16)
    h, w = x.shape[1], x.shape[2]
    if use_pos_embed:
        pe = jnp.transpose(pos_embed[:, :, :h, :w], (0, 2, 3, 1))
        x = x + pe
    if flatten:
        return x.reshape(x.shape[0], h * w, x.shape[3])        # (N, HW, C)
    return jnp.transpose(x, (0, 3, 1, 2))                      # back to NCHW


def po_patch_embed(x_nchw, folded_params, *, use_pos_embed=False,
                   pos_embed=None, flatten=False, approx_gelu=True):
    """Matches POPatchEmbed.forward: returns (x, sz)."""
    down2 = lambda v: (v - 1) // 2 + 1
    sz = (down2(down2(x_nchw.shape[2])), down2(down2(x_nchw.shape[3])))
    out = _po_patch_embed_impl(x_nchw, tuple(folded_params), pos_embed,
                               use_pos_embed=use_pos_embed, flatten=flatten,
                               approx_gelu=approx_gelu)
    return out, sz


def init_conv_bn(key, cin, cout):
    kw, kg, kb, km, kv = jax.random.split(key, 5)
    fan_in = 9 * cin
    w = jax.random.normal(kw, (3, 3, cin, cout), jnp.float32) * (2.0 / fan_in) ** 0.5
    return dict(
        w_hwio=w,
        gamma=1.0 + 0.1 * jax.random.normal(kg, (cout,), jnp.float32),
        beta=0.1 * jax.random.normal(kb, (cout,), jnp.float32),
        mean=0.1 * jax.random.normal(km, (cout,), jnp.float32),
        var=1.0 + 0.1 * jnp.abs(jax.random.normal(kv, (cout,), jnp.float32)),
    )


# --------------------------- pure-JAX reference -----------------------------

def _reference_forward(x_nchw, params, pos_embed):
    x = jnp.transpose(x_nchw, (0, 2, 3, 1))
    for p in params:
        y = jax.lax.conv_general_dilated(
            x, p["w_hwio"], window_strides=(2, 2), padding=((1, 1), (1, 1)),
            dimension_numbers=("NHWC", "HWIO", "NHWC"),
            precision=jax.lax.Precision.HIGHEST)
        scale = p["gamma"] / jnp.sqrt(p["var"] + BN_EPS)
        bias = p["beta"] - p["mean"] * scale
        y = y * scale + bias
        x = 0.5 * y * (1.0 + jax.lax.erf(y * _INV_SQRT2))
    sz = (x.shape[1], x.shape[2])
    x = jnp.transpose(x, (0, 3, 1, 2))
    x = x + pos_embed[:, :, :sz[0], :sz[1]]
    x = jnp.transpose(x.reshape(x.shape[0], x.shape[1], -1), (0, 2, 1))
    return x, sz


# --------------------------------- driver ----------------------------------

if __name__ == "__main__":
    B, Cin, H, W = 2, 3, 16, 16
    embed_dim = 32
    feat_max_size = [H // 4, W // 4]

    root = jax.random.PRNGKey(0)
    kx, kp, kpos = jax.random.split(root, 3)
    x = jax.random.normal(kx, (B, Cin, H, W), jnp.float32)

    k1, k2 = jax.random.split(kp)
    params = [
        init_conv_bn(k1, Cin, embed_dim // 2),
        init_conv_bn(k2, embed_dim // 2, embed_dim),
    ]
    folded = [fold_conv_bn_params(p) for p in params]   # hoisted weight prep

    # trunc_normal_(std=0.02), already in (1, C, Hmax, Wmax) layout.
    pos_embed = 0.02 * jax.random.truncated_normal(
        kpos, -2.0, 2.0, (1, embed_dim, feat_max_size[0], feat_max_size[1]),
        jnp.float32)

    out, sz = po_patch_embed(x, folded, use_pos_embed=True,
                             pos_embed=pos_embed, flatten=True)
    out = jax.block_until_ready(out)

    assert sz == (H // 4, W // 4)
    assert out.shape == (B, sz[0] * sz[1], embed_dim)

    ref, _ = _reference_forward(x, params, pos_embed)
    max_err = float(jnp.max(jnp.abs(out - ref)))
    assert jnp.allclose(out, ref, atol=5e-2, rtol=5e-2), f"max abs err {max_err}"

    print("KERNEL_OK")
</pallas_src>

<mosaic_0001>
module attributes {stable_mosaic.version = 11 : i64} {
  func.func @_conv3x3s2_bn_gelu_kernel(%arg0: i32, %arg1: i32, %arg2: memref<1x10x5x32xbf16, #tpu.memory_space<vmem>>, %arg3: memref<6x32x32xbf16, #tpu.memory_space<vmem>>, %arg4: memref<1x32xf32, #tpu.memory_space<vmem>>, %arg5: memref<1x4x4x32xf32, #tpu.memory_space<vmem>>) attributes {dimension_semantics = [#tpu.dimension_semantics<parallel>, #tpu.dimension_semantics<parallel>], iteration_bounds = array<i64: 2, 1>, scalar_prefetch = 0 : i64, scratch_operands = 0 : i64, tpu.core_type = #tpu.core_type<tc>, window_params = [{transform_indices = @transform_0, window_bounds = array<i64: 1, 10, 5, 32>}, {pipeline_mode = #tpu.pipeline_mode<synchronous>, transform_indices = @transform_1, window_bounds = array<i64: 6, 32, 32>}, {pipeline_mode = #tpu.pipeline_mode<synchronous>, transform_indices = @transform_2, window_bounds = array<i64: 1, 32>}, {transform_indices = @transform_3, window_bounds = array<i64: 1, 4, 4, 32>}]} {
    %c0 = arith.constant 0 : index
    %c0_0 = arith.constant 0 : index
    %c0_1 = arith.constant 0 : index
    %0 = vector.load %arg3[%c0, %c0_0, %c0_1] : memref<6x32x32xbf16, #tpu.memory_space<vmem>>, vector<6x32x32xbf16>
    %c0_2 = arith.constant 0 : index
    %c0_3 = arith.constant 0 : index
    %1 = vector.load %arg4[%c0_2, %c0_3] : memref<1x32xf32, #tpu.memory_space<vmem>>, vector<1x32xf32>
    %c4_i32 = arith.constant 4 : i32
    %2 = arith.muli %arg1, %c4_i32 : i32
    %c0_i32 = arith.constant 0 : i32
    %3 = arith.addi %2, %c0_i32 : i32
    %c3_i32 = arith.constant 3 : i32
    %4 = arith.minsi %3, %c3_i32 : i32
    %c2_i32 = arith.constant 2 : i32
    %5 = arith.muli %c2_i32, %4 : i32
    %c0_4 = arith.constant 0 : index
    %6 = arith.index_cast %5 : i32 to index
    %c0_5 = arith.constant 0 : index
    %c0_6 = arith.constant 0 : index
    %7 = vector.load %arg2[%c0_4, %6, %c0_5, %c0_6] : memref<1x10x5x32xbf16, #tpu.memory_space<vmem>>, vector<1x3x5x32xbf16>
    %8 = vector.shape_cast %7 : vector<1x3x5x32xbf16> to vector<3x5x32xbf16>
    %9 = vector.extract_strided_slice %8 {offsets = [0, 0, 0], sizes = [1, 4, 32], strides = [1, 1, 1]} : vector<3x5x32xbf16> to vector<1x4x32xbf16>
    %10 = vector.shape_cast %9 : vector<1x4x32xbf16> to vector<4x32xbf16>
    %11 = vector.extract_strided_slice %8 {offsets = [0, 1, 0], sizes = [1, 4, 32], strides = [1, 1, 1]} : vector<3x5x32xbf16> to vector<1x4x32xbf16>
    %12 = vector.shape_cast %11 : vector<1x4x32xbf16> to vector<4x32xbf16>
    %13 = vector.extract_strided_slice %0 {offsets = [0, 0, 0], sizes = [1, 32, 32], strides = [1, 1, 1]} : vector<6x32x32xbf16> to vector<1x32x32xbf16>
    %14 = vector.shape_cast %13 : vector<1x32x32xbf16> to vector<32x32xbf16>
    %cst = arith.constant dense<0.000000e+00> : vector<4x32xf32>
    %15 = tpu.matmul %10, %14, %cst {dimension_numbers = #tpu.dot_dimension_numbers<[1], [0], [0], [1], [0, 0, 1, 1], [], []>} : vector<4x32xbf16>, vector<32x32xbf16>, vector<4x32xf32> -> vector<4x32xf32>
    %16 = vector.extract_strided_slice %0 {offsets = [3, 0, 0], sizes = [1, 32, 32], strides = [1, 1, 1]} : vector<6x32x32xbf16> to vector<1x32x32xbf16>
    %17 = vector.shape_cast %16 : vector<1x32x32xbf16> to vector<32x32xbf16>
    %cst_7 = arith.constant dense<0.000000e+00> : vector<4x32xf32>
    %18 = tpu.matmul %12, %17, %cst_7 {dimension_numbers = #tpu.dot_dimension_numbers<[1], [0], [0], [1], [0, 0, 1, 1], [], []>} : vector<4x32xbf16>, vector<32x32xbf16>, vector<4x32xf32> -> vector<4x32xf32>
    %19 = arith.addf %15, %18 : vector<4x32xf32>
    %20 = vector.extract_strided_slice %8 {offsets = [1, 0, 0], sizes = [1, 4, 32], strides = [1, 1, 1]} : vector<3x5x32xbf16> to vector<1x4x32xbf16>
    %21 = vector.shape_cast %20 : vector<1x4x32xbf16> to vector<4x32xbf16>
    %22 = vector.extract_strided_slice %8 {offsets = [1, 1, 0], sizes = [1, 4, 32], strides = [1, 1, 1]} : vector<3x5x32xbf16> to vector<1x4x32xbf16>
    %23 = vector.shape_cast %22 : vector<1x4x32xbf16> to vector<4x32xbf16>
    %24 = vector.extract_strided_slice %0 {offsets = [1, 0, 0], sizes = [1, 32, 32], strides = [1, 1, 1]} : vector<6x32x32xbf16> to vector<1x32x32xbf16>
    %25 = vector.shape_cast %24 : vector<1x32x32xbf16> to vector<32x32xbf16>
    %cst_8 = arith.constant dense<0.000000e+00> : vector<4x32xf32>
    %26 = tpu.matmul %21, %25, %cst_8 {dimension_numbers = #tpu.dot_dimension_numbers<[1], [0], [0], [1], [0, 0, 1, 1], [], []>} : vector<4x32xbf16>, vector<32x32xbf16>, vector<4x32xf32> -> vector<4x32xf32>
    %27 = vector.extract_strided_slice %0 {offsets = [4, 0, 0], sizes = [1, 32, 32], strides = [1, 1, 1]} : vector<6x32x32xbf16> to vector<1x32x32xbf16>
    %28 = vector.shape_cast %27 : vector<1x32x32xbf16> to vector<32x32xbf16>
    %cst_9 = arith.constant dense<0.000000e+00> : vector<4x32xf32>
    %29 = tpu.matmul %23, %28, %cst_9 {dimension_numbers = #tpu.dot_dimension_numbers<[1], [0], [0], [1], [0, 0, 1, 1], [], []>} : vector<4x32xbf16>, vector<32x32xbf16>, vector<4x32xf32> -> vector<4x32xf32>
    %30 = arith.addf %19, %26 : vector<4x32xf32>
    %31 = arith.addf %30, %29 : vector<4x32xf32>
    %32 = vector.extract_strided_slice %8 {offsets = [2, 0, 0], sizes = [1, 4, 32], strides = [1, 1, 1]} : vector<3x5x32xbf16> to vector<1x4x32xbf16>
    %33 = vector.shape_cast %32 : vector<1x4x32xbf16> to vector<4x32xbf16>
    %34 = vector.extract_strided_slice %8 {offsets = [2, 1, 0], sizes = [1, 4, 32], strides = [1, 1, 1]} : vector<3x5x32xbf16> to vector<1x4x32xbf16>
    %35 = vector.shape_cast %34 : vector<1x4x32xbf16> to vector<4x32xbf16>
    %36 = vector.extract_strided_slice %0 {offsets = [2, 0, 0], sizes = [1, 32, 32], strides = [1, 1, 1]} : vector<6x32x32xbf16> to vector<1x32x32xbf16>
    %37 = vector.shape_cast %36 : vector<1x32x32xbf16> to vector<32x32xbf16>
    %cst_10 = arith.constant dense<0.000000e+00> : vector<4x32xf32>
    %38 = tpu.matmul %33, %37, %cst_10 {dimension_numbers = #tpu.dot_dimension_numbers<[1], [0], [0], [1], [0, 0, 1, 1], [], []>} : vector<4x32xbf16>, vector<32x32xbf16>, vector<4x32xf32> -> vector<4x32xf32>
    %39 = vector.extract_strided_slice %0 {offsets = [5, 0, 0], sizes = [1, 32, 32], strides = [1, 1, 1]} : vector<6x32x32xbf16> to vector<1x32x32xbf16>
    %40 = vector.shape_cast %39 : vector<1x32x32xbf16> to vector<32x32xbf16>
    %cst_11 = arith.constant dense<0.000000e+00> : vector<4x32xf32>
    %41 = tpu.matmul %35, %40, %cst_11 {dimension_numbers = #tpu.dot_dimension_numbers<[1], [0], [0], [1], [0, 0, 1, 1], [], []>} : vector<4x32xbf16>, vector<32x32xbf16>, vector<4x32xf32> -> vector<4x32xf32>
    %42 = arith.addf %31, %38 : vector<4x32xf32>
    %43 = arith.addf %42, %41 : vector<4x32xf32>
    %44 = vector.broadcast %1 : vector<1x32xf32> to vector<4x32xf32>
    %45 = arith.addf %43, %44 : vector<4x32xf32>
    %cst_12 = arith.constant 5.000000e-01 : f32
    %46 = vector.broadcast %cst_12 : f32 to vector<4x32xf32>
    %47 = arith.mulf %46, %45 : vector<4x32xf32>
    %48 = arith.mulf %45, %45 : vector<4x32xf32>
    %49 = arith.mulf %48, %45 : vector<4x32xf32>
    %cst_13 = arith.constant 4.471500e-02 : f32
    %50 = vector.broadcast %cst_13 : f32 to vector<4x32xf32>
    %51 = arith.mulf %50, %49 : vector<4x32xf32>
    %52 = arith.addf %45, %51 : vector<4x32xf32>
    %cst_14 = arith.constant 0.797884583 : f32
    %53 = vector.broadcast %cst_14 : f32 to vector<4x32xf32>
    %54 = arith.mulf %53, %52 : vector<4x32xf32>
    %55 = math.tanh %54 : vector<4x32xf32>
    %cst_15 = arith.constant 1.000000e+00 : f32
    %56 = vector.broadcast %cst_15 : f32 to vector<4x32xf32>
    %57 = arith.addf %56, %55 : vector<4x32xf32>
    %58 = arith.mulf %47, %57 : vector<4x32xf32>
    %c0_16 = arith.constant 0 : index
    %c0_17 = arith.constant 0 : index
    %c0_18 = arith.constant 0 : index
    %c0_19 = arith.constant 0 : index
    %59 = vector.load %arg5[%c0_16, %c0_17, %c0_18, %c0_19] : memref<1x4x4x32xf32, #tpu.memory_space<vmem>>, vector<1x1x4x32xf32>
    %60 = vector.shape_cast %59 : vector<1x1x4x32xf32> to vector<4x32xf32>
    %61 = vector.shape_cast %58 : vector<4x32xf32> to vector<1x1x4x32xf32>
    tpu.vector_store %arg5[%c0_16, %c0_17, %c0_18, %c0_19], %61 {strides = array<i32>} : memref<1x4x4x32xf32, #tpu.memory_space<vmem>>, vector<1x1x4x32xf32>,
    %c1_i32 = arith.constant 1 : i32
    %62 = arith.addi %2, %c1_i32 : i32
    %c3_i32_20 = arith.constant 3 : i32
    %63 = arith.minsi %62, %c3_i32_20 : i32
    %c2_i32_21 = arith.constant 2 : i32
    %64 = arith.muli %c2_i32_21, %63 : i32
    %c0_22 = arith.constant 0 : index
    %65 = arith.index_cast %64 : i32 to index
    %c0_23 = arith.constant 0 : index
    %c0_24 = arith.constant 0 : index
    %66 = vector.load %arg2[%c0_22, %65, %c0_23, %c0_24] : memref<1x10x5x32xbf16, #tpu.memory_space<vmem>>, vector<1x3x5x32xbf16>
    %67 = vector.shape_cast %66 : vector<1x3x5x32xbf16> to vector<3x5x32xbf16>
    %68 = vector.extract_strided_slice %67 {offsets = [0, 0, 0], sizes = [1, 4, 32], strides = [1, 1, 1]} : vector<3x5x32xbf16> to vector<1x4x32xbf16>
    %69 = vector.shape_cast %68 : vector<1x4x32xbf16> to vector<4x32xbf16>
    %70 = vector.extract_strided_slice %67 {offsets = [0, 1, 0], sizes = [1, 4, 32], strides = [1, 1, 1]} : vector<3x5x32xbf16> to vector<1x4x32xbf16>
    %71 = vector.shape_cast %70 : vector<1x4x32xbf16> to vector<4x32xbf16>
    %72 = vector.extract_strided_slice %0 {offsets = [0, 0, 0], sizes = [1, 32, 32], strides = [1, 1, 1]} : vector<6x32x32xbf16> to vector<1x32x32xbf16>
    %73 = vector.shape_cast %72 : vector<1x32x32xbf16> to vector<32x32xbf16>
    %cst_25 = arith.constant dense<0.000000e+00> : vector<4x32xf32>
    %74 = tpu.matmul %69, %73, %cst_25 {dimension_numbers = #tpu.dot_dimension_numbers<[1], [0], [0], [1], [0, 0, 1, 1], [], []>} : vector<4x32xbf16>, vector<32x32xbf16>, vector<4x32xf32> -> vector<4x32xf32>
    %75 = vector.extract_strided_slice %0 {offsets = [3, 0, 0], sizes = [1, 32, 32], strides = [1, 1, 1]} : vector<6x32x32xbf16> to vector<1x32x32xbf16>
    %76 = vector.shape_cast %75 : vector<1x32x32xbf16> to vector<32x32xbf16>
    %cst_26 = arith.constant dense<0.000000e+00> : vector<4x32xf32>
    %77 = tpu.matmul %71, %76, %cst_26 {dimension_numbers = #tpu.dot_dimension_numbers<[1], [0], [0], [1], [0, 0, 1, 1], [], []>} : vector<4x32xbf16>, vector<32x32xbf16>, vector<4x32xf32> -> vector<4x32xf32>
    %78 = arith.addf %74, %77 : vector<4x32xf32>
    %79 = vector.extract_strided_slice %67 {offsets = [1, 0, 0], sizes = [1, 4, 32], strides = [1, 1, 1]} : vector<3x5x32xbf16> to vector<1x4x32xbf16>
    %80 = vector.shape_cast %79 : vector<1x4x32xbf16> to vector<4x32xbf16>
    %81 = vector.extract_strided_slice %67 {offsets = [1, 1, 0], sizes = [1, 4, 32], strides = [1, 1, 1]} : vector<3x5x32xbf16> to vector<1x4x32xbf16>
    %82 = vector.shape_cast %81 : vector<1x4x32xbf16> to vector<4x32xbf16>
    %83 = vector.extract_strided_slice %0 {offsets = [1, 0, 0], sizes = [1, 32, 32], strides = [1, 1, 1]} : vector<6x32x32xbf16> to vector<1x32x32xbf16>
    %84 = vector.shape_cast %83 : vector<1x32x32xbf16> to vector<32x32xbf16>
    %cst_27 = arith.constant dense<0.000000e+00> : vector<4x32xf32>
    %85 = tpu.matmul %80, %84, %cst_27 {dimension_numbers = #tpu.dot_dimension_numbers<[1], [0], [0], [1], [0, 0, 1, 1], [], []>} : vector<4x32xbf16>, vector<32x32xbf16>, vector<4x32xf32> -> vector<4x32xf32>
    %86 = vector.extract_strided_slice %0 {offsets = [4, 0, 0], sizes = [1, 32, 32], strides = [1, 1, 1]} : vector<6x32x32xbf16> to vector<1x32x32xbf16>
    %87 = vector.shape_cast %86 : vector<1x32x32xbf16> to vector<32x32xbf16>
    %cst_28 = arith.constant dense<0.000000e+00> : vector<4x32xf32>
    %88 = tpu.matmul %82, %87, %cst_28 {dimension_numbers = #tpu.dot_dimension_numbers<[1], [0], [0], [1], [0, 0, 1, 1], [], []>} : vector<4x32xbf16>, vector<32x32xbf16>, vector<4x32xf32> -> vector<4x32xf32>
    %89 = arith.addf %78, %85 : vector<4x32xf32>
    %90 = arith.addf %89, %88 : vector<4x32xf32>
    %91 = vector.extract_strided_slice %67 {offsets = [2, 0, 0], sizes = [1, 4, 32], strides = [1, 1, 1]} : vector<3x5x32xbf16> to vector<1x4x32xbf16>
    %92 = vector.shape_cast %91 : vector<1x4x32xbf16> to vector<4x32xbf16>
    %93 = vector.extract_strided_slice %67 {offsets = [2, 1, 0], sizes = [1, 4, 32], strides = [1, 1, 1]} : vector<3x5x32xbf16> to vector<1x4x32xbf16>
    %94 = vector.shape_cast %93 : vector<1x4x32xbf16> to vector<4x32xbf16>
    %95 = vector.extract_strided_slice %0 {offsets = [2, 0, 0], sizes = [1, 32, 32], strides = [1, 1, 1]} : vector<6x32x32xbf16> to vector<1x32x32xbf16>
    %96 = vector.shape_cast %95 : vector<1x32x32xbf16> to vector<32x32xbf16>
    %cst_29 = arith.constant dense<0.000000e+00> : vector<4x32xf32>
    %97 = tpu.matmul %92, %96, %cst_29 {dimension_numbers = #tpu.dot_dimension_numbers<[1], [0], [0], [1], [0, 0, 1, 1], [], []>} : vector<4x32xbf16>, vector<32x32xbf16>, vector<4x32xf32> -> vector<4x32xf32>
    %98 = vector.extract_strided_slice %0 {offsets = [5, 0, 0], sizes = [1, 32, 32], strides = [1, 1, 1]} : vector<6x32x32xbf16> to vector<1x32x32xbf16>
    %99 = vector.shape_cast %98 : vector<1x32x32xbf16> to vector<32x32xbf16>
    %cst_30 = arith.constant dense<0.000000e+00> : vector<4x32xf32>
    %100 = tpu.matmul %94, %99, %cst_30 {dimension_numbers = #tpu.dot_dimension_numbers<[1], [0], [0], [1], [0, 0, 1, 1], [], []>} : vector<4x32xbf16>, vector<32x32xbf16>, vector<4x32xf32> -> vector<4x32xf32>
    %101 = arith.addf %90, %97 : vector<4x32xf32>
    %102 = arith.addf %101, %100 : vector<4x32xf32>
    %103 = vector.broadcast %1 : vector<1x32xf32> to vector<4x32xf32>
    %104 = arith.addf %102, %103 : vector<4x32xf32>
    %cst_31 = arith.constant 5.000000e-01 : f32
    %105 = vector.broadcast %cst_31 : f32 to vector<4x32xf32>
    %106 = arith.mulf %105, %104 : vector<4x32xf32>
    %107 = arith.mulf %104, %104 : vector<4x32xf32>
    %108 = arith.mulf %107, %104 : vector<4x32xf32>
    %cst_32 = arith.constant 4.471500e-02 : f32
    %109 = vector.broadcast %cst_32 : f32 to vector<4x32xf32>
    %110 = arith.mulf %109, %108 : vector<4x32xf32>
    %111 = arith.addf %104, %110 : vector<4x32xf32>
    %cst_33 = arith.constant 0.797884583 : f32
    %112 = vector.broadcast %cst_33 : f32 to vector<4x32xf32>
    %113 = arith.mulf %112, %111 : vector<4x32xf32>
    %114 = math.tanh %113 : vector<4x32xf32>
    %cst_34 = arith.constant 1.000000e+00 : f32
    %115 = vector.broadcast %cst_34 : f32 to vector<4x32xf32>
    %116 = arith.addf %115, %114 : vector<4x32xf32>
    %117 = arith.mulf %106, %116 : vector<4x32xf32>
    %c0_35 = arith.constant 0 : index
    %c1 = arith.constant 1 : index
    %c0_36 = arith.constant 0 : index
    %c0_37 = arith.constant 0 : index
    %118 = vector.load %arg5[%c0_35, %c1, %c0_36, %c0_37] : memref<1x4x4x32xf32, #tpu.memory_space<vmem>>, vector<1x1x4x32xf32>
    %119 = vector.shape_cast %118 : vector<1x1x4x32xf32> to vector<4x32xf32>
    %120 = vector.shape_cast %117 : vector<4x32xf32> to vector<1x1x4x32xf32>
    tpu.vector_store %arg5[%c0_35, %c1, %c0_36, %c0_37], %120 {strides = array<i32>} : memref<1x4x4x32xf32, #tpu.memory_space<vmem>>, vector<1x1x4x32xf32>,
    %c2_i32_38 = arith.constant 2 : i32
    %121 = arith.addi %2, %c2_i32_38 : i32
    %c3_i32_39 = arith.constant 3 : i32
    %122 = arith.minsi %121, %c3_i32_39 : i32
    %c2_i32_40 = arith.constant 2 : i32
    %123 = arith.muli %c2_i32_40, %122 : i32
    %c0_41 = arith.constant 0 : index
    %124 = arith.index_cast %123 : i32 to index
    %c0_42 = arith.constant 0 : index
    %c0_43 = arith.constant 0 : index
    %125 = vector.load %arg2[%c0_41, %124, %c0_42, %c0_43] : memref<1x10x5x32xbf16, #tpu.memory_space<vmem>>, vector<1x3x5x32xbf16>
    %126 = vector.shape_cast %125 : vector<1x3x5x32xbf16> to vector<3x5x32xbf16>
    %127 = vector.extract_strided_slice %126 {offsets = [0, 0, 0], sizes = [1, 4, 32], strides = [1, 1, 1]} : vector<3x5x32xbf16> to vector<1x4x32xbf16>
    %128 = vector.shape_cast %127 : vector<1x4x32xbf16> to vector<4x32xbf16>
    %129 = vector.extract_strided_slice %126 {offsets = [0, 1, 0], sizes = [1, 4, 32], strides = [1, 1, 1]} : vector<3x5x32xbf16> to vector<1x4x32xbf16>
    %130 = vector.shape_cast %129 : vector<1x4x32xbf16> to vector<4x32xbf16>
    %131 = vector.extract_strided_slice %0 {offsets = [0, 0, 0], sizes = [1, 32, 32], strides = [1, 1, 1]} : vector<6x32x32xbf16> to vector<1x32x32xbf16>
    %132 = vector.shape_cast %131 : vector<1x32x32xbf16> to vector<32x32xbf16>
    %cst_44 = arith.constant dense<0.000000e+00> : vector<4x32xf32>
    %133 = tpu.matmul %128, %132, %cst_44 {dimension_numbers = #tpu.dot_dimension_numbers<[1], [0], [0], [1], [0, 0, 1, 1], [], []>} : vector<4x32xbf16>, vector<32x32xbf16>, vector<4x32xf32> -> vector<4x32xf32>
    %134 = vector.extract_strided_slice %0 {offsets = [3, 0, 0], sizes = [1, 32, 32], strides = [1, 1, 1]} : vector<6x32x32xbf16> to vector<1x32x32xbf16>
    %135 = vector.shape_cast %134 : vector<1x32x32xbf16> to vector<32x32xbf16>
    %cst_45 = arith.constant dense<0.000000e+00> : vector<4x32xf32>
    %136 = tpu.matmul %130, %135, %cst_45 {dimension_numbers = #tpu.dot_dimension_numbers<[1], [0], [0], [1], [0, 0, 1, 1], [], []>} : vector<4x32xbf16>, vector<32x32xbf16>, vector<4x32xf32> -> vector<4x32xf32>
    %137 = arith.addf %133, %136 : vector<4x32xf32>
    %138 = vector.extract_strided_slice %126 {offsets = [1, 0, 0], sizes = [1, 4, 32], strides = [1, 1, 1]} : vector<3x5x32xbf16> to vector<1x4x32xbf16>
    %139 = vector.shape_cast %138 : vector<1x4x32xbf16> to vector<4x32xbf16>
    %140 = vector.extract_strided_slice %126 {offsets = [1, 1, 0], sizes = [1, 4, 32], strides = [1, 1, 1]} : vector<3x5x32xbf16> to vector<1x4x32xbf16>
    %141 = vector.shape_cast %140 : vector<1x4x32xbf16> to vector<4x32xbf16>
    %142 = vector.extract_strided_slice %0 {offsets = [1, 0, 0], sizes = [1, 32, 32], strides = [1, 1, 1]} : vector<6x32x32xbf16> to vector<1x32x32xbf16>
    %143 = vector.shape_cast %142 : vector<1x32x32xbf16> to vector<32x32xbf16>
    %cst_46 = arith.constant dense<0.000000e+00> : vector<4x32xf32>
    %144 = tpu.matmul %139, %143, %cst_46 {dimension_numbers = #tpu.dot_dimension_numbers<[1], [0], [0], [1], [0, 0, 1, 1], [], []>} : vector<4x32xbf16>, vector<32x32xbf16>, vector<4x32xf32> -> vector<4x32xf32>
    %145 = vector.extract_strided_slice %0 {offsets = [4, 0, 0], sizes = [1, 32, 32], strides = [1, 1, 1]} : vector<6x32x32xbf16> to vector<1x32x32xbf16>
    %146 = vector.shape_cast %145 : vector<1x32x32xbf16> to vector<32x32xbf16>
    %cst_47 = arith.constant dense<0.000000e+00> : vector<4x32xf32>
    %147 = tpu.matmul %141, %146, %cst_47 {dimension_numbers = #tpu.dot_dimension_numbers<[1], [0], [0], [1], [0, 0, 1, 1], [], []>} : vector<4x32xbf16>, vector<32x32xbf16>, vector<4x32xf32> -> vector<4x32xf32>
    %148 = arith.addf %137, %144 : vector<4x32xf32>
    %149 = arith.addf %148, %147 : vector<4x32xf32>
    %150 = vector.extract_strided_slice %126 {offsets = [2, 0, 0], sizes = [1, 4, 32], strides = [1, 1, 1]} : vector<3x5x32xbf16> to vector<1x4x32xbf16>
    %151 = vector.shape_cast %150 : vector<1x4x32xbf16> to vector<4x32xbf16>
    %152 = vector.extract_strided_slice %126 {offsets = [2, 1, 0], sizes = [1, 4, 32], strides = [1, 1, 1]} : vector<3x5x32xbf16> to vector<1x4x32xbf16>
    %153 = vector.shape_cast %152 : vector<1x4x32xbf16> to vector<4x32xbf16>
    %154 = vector.extract_strided_slice %0 {offsets = [2, 0, 0], sizes = [1, 32, 32], strides = [1, 1, 1]} : vector<6x32x32xbf16> to vector<1x32x32xbf16>
    %155 = vector.shape_cast %154 : vector<1x32x32xbf16> to vector<32x32xbf16>
    %cst_48 = arith.constant dense<0.000000e+00> : vector<4x32xf32>
    %156 = tpu.matmul %151, %155, %cst_48 {dimension_numbers = #tpu.dot_dimension_numbers<[1], [0], [0], [1], [0, 0, 1, 1], [], []>} : vector<4x32xbf16>, vector<32x32xbf16>, vector<4x32xf32> -> vector<4x32xf32>
    %157 = vector.extract_strided_slice %0 {offsets = [5, 0, 0], sizes = [1, 32, 32], strides = [1, 1, 1]} : vector<6x32x32xbf16> to vector<1x32x32xbf16>
    %158 = vector.shape_cast %157 : vector<1x32x32xbf16> to vector<32x32xbf16>
    %cst_49 = arith.constant dense<0.000000e+00> : vector<4x32xf32>
    %159 = tpu.matmul %153, %158, %cst_49 {dimension_numbers = #tpu.dot_dimension_numbers<[1], [0], [0], [1], [0, 0, 1, 1], [], []>} : vector<4x32xbf16>, vector<32x32xbf16>, vector<4x32xf32> -> vector<4x32xf32>
    %160 = arith.addf %149, %156 : vector<4x32xf32>
    %161 = arith.addf %160, %159 : vector<4x32xf32>
    %162 = vector.broadcast %1 : vector<1x32xf32> to vector<4x32xf32>
    %163 = arith.addf %161, %162 : vector<4x32xf32>
    %cst_50 = arith.constant 5.000000e-01 : f32
    %164 = vector.broadcast %cst_50 : f32 to vector<4x32xf32>
    %165 = arith.mulf %164, %163 : vector<4x32xf32>
    %166 = arith.mulf %163, %163 : vector<4x32xf32>
    %167 = arith.mulf %166, %163 : vector<4x32xf32>
    %cst_51 = arith.constant 4.471500e-02 : f32
    %168 = vector.broadcast %cst_51 : f32 to vector<4x32xf32>
    %169 = arith.mulf %168, %167 : vector<4x32xf32>
    %170 = arith.addf %163, %169 : vector<4x32xf32>
    %cst_52 = arith.constant 0.797884583 : f32
    %171 = vector.broadcast %cst_52 : f32 to vector<4x32xf32>
    %172 = arith.mulf %171, %170 : vector<4x32xf32>
    %173 = math.tanh %172 : vector<4x32xf32>
    %cst_53 = arith.constant 1.000000e+00 : f32
    %174 = vector.broadcast %cst_53 : f32 to vector<4x32xf32>
    %175 = arith.addf %174, %173 : vector<4x32xf32>
    %176 = arith.mulf %165, %175 : vector<4x32xf32>
    %c0_54 = arith.constant 0 : index
    %c2 = arith.constant 2 : index
    %c0_55 = arith.constant 0 : index
    %c0_56 = arith.constant 0 : index
    %177 = vector.load %arg5[%c0_54, %c2, %c0_55, %c0_56] : memref<1x4x4x32xf32, #tpu.memory_space<vmem>>, vector<1x1x4x32xf32>
    %178 = vector.shape_cast %177 : vector<1x1x4x32xf32> to vector<4x32xf32>
    %179 = vector.shape_cast %176 : vector<4x32xf32> to vector<1x1x4x32xf32>
    tpu.vector_store %arg5[%c0_54, %c2, %c0_55, %c0_56], %179 {strides = array<i32>} : memref<1x4x4x32xf32, #tpu.memory_space<vmem>>, vector<1x1x4x32xf32>,
    %c3_i32_57 = arith.constant 3 : i32
    %180 = arith.addi %2, %c3_i32_57 : i32
    %c3_i32_58 = arith.constant 3 : i32
    %181 = arith.minsi %180, %c3_i32_58 : i32
    %c2_i32_59 = arith.constant 2 : i32
    %182 = arith.muli %c2_i32_59, %181 : i32
    %c0_60 = arith.constant 0 : index
    %183 = arith.index_cast %182 : i32 to index
    %c0_61 = arith.constant 0 : index
    %c0_62 = arith.constant 0 : index
    %184 = vector.load %arg2[%c0_60, %183, %c0_61, %c0_62] : memref<1x10x5x32xbf16, #tpu.memory_space<vmem>>, vector<1x3x5x32xbf16>
    %185 = vector.shape_cast %184 : vector<1x3x5x32xbf16> to vector<3x5x32xbf16>
    %186 = vector.extract_strided_slice %185 {offsets = [0, 0, 0], sizes = [1, 4, 32], strides = [1, 1, 1]} : vector<3x5x32xbf16> to vector<1x4x32xbf16>
    %187 = vector.shape_cast %186 : vector<1x4x32xbf16> to vector<4x32xbf16>
    %188 = vector.extract_strided_slice %185 {offsets = [0, 1, 0], sizes = [1, 4, 32], strides = [1, 1, 1]} : vector<3x5x32xbf16> to vector<1x4x32xbf16>
    %189 = vector.shape_cast %188 : vector<1x4x32xbf16> to vector<4x32xbf16>
    %190 = vector.extract_strided_slice %0 {offsets = [0, 0, 0], sizes = [1, 32, 32], strides = [1, 1, 1]} : vector<6x32x32xbf16> to vector<1x32x32xbf16>
    %191 = vector.shape_cast %190 : vector<1x32x32xbf16> to vector<32x32xbf16>
    %cst_63 = arith.constant dense<0.000000e+00> : vector<4x32xf32>
    %192 = tpu.matmul %187, %191, %cst_63 {dimension_numbers = #tpu.dot_dimension_numbers<[1], [0], [0], [1], [0, 0, 1, 1], [], []>} : vector<4x32xbf16>, vector<32x32xbf16>, vector<4x32xf32> -> vector<4x32xf32>
    %193 = vector.extract_strided_slice %0 {offsets = [3, 0, 0], sizes = [1, 32, 32], strides = [1, 1, 1]} : vector<6x32x32xbf16> to vector<1x32x32xbf16>
    %194 = vector.shape_cast %193 : vector<1x32x32xbf16> to vector<32x32xbf16>
    %cst_64 = arith.constant dense<0.000000e+00> : vector<4x32xf32>
    %195 = tpu.matmul %189, %194, %cst_64 {dimension_numbers = #tpu.dot_dimension_numbers<[1], [0], [0], [1], [0, 0, 1, 1], [], []>} : vector<4x32xbf16>, vector<32x32xbf16>, vector<4x32xf32> -> vector<4x32xf32>
    %196 = arith.addf %192, %195 : vector<4x32xf32>
    %197 = vector.extract_strided_slice %185 {offsets = [1, 0, 0], sizes = [1, 4, 32], strides = [1, 1, 1]} : vector<3x5x32xbf16> to vector<1x4x32xbf16>
    %198 = vector.shape_cast %197 : vector<1x4x32xbf16> to vector<4x32xbf16>
    %199 = vector.extract_strided_slice %185 {offsets = [1, 1, 0], sizes = [1, 4, 32], strides = [1, 1, 1]} : vector<3x5x32xbf16> to vector<1x4x32xbf16>
    %200 = vector.shape_cast %199 : vector<1x4x32xbf16> to vector<4x32xbf16>
    %201 = vector.extract_strided_slice %0 {offsets = [1, 0, 0], sizes = [1, 32, 32], strides = [1, 1, 1]} : vector<6x32x32xbf16> to vector<1x32x32xbf16>
    %202 = vector.shape_cast %201 : vector<1x32x32xbf16> to vector<32x32xbf16>
    %cst_65 = arith.constant dense<0.000000e+00> : vector<4x32xf32>
    %203 = tpu.matmul %198, %202, %cst_65 {dimension_numbers = #tpu.dot_dimension_numbers<[1], [0], [0], [1], [0, 0, 1, 1], [], []>} : vector<4x32xbf16>, vector<32x32xbf16>, vector<4x32xf32> -> vector<4x32xf32>
    %204 = vector.extract_strided_slice %0 {offsets = [4, 0, 0], sizes = [1, 32, 32], strides = [1, 1, 1]} : vector<6x32x32xbf16> to vector<1x32x32xbf16>
    %205 = vector.shape_cast %204 : vector<1x32x32xbf16> to vector<32x32xbf16>
    %cst_66 = arith.constant dense<0.000000e+00> : vector<4x32xf32>
    %206 = tpu.matmul %200, %205, %cst_66 {dimension_numbers = #tpu.dot_dimension_numbers<[1], [0], [0], [1], [0, 0, 1, 1], [], []>} : vector<4x32xbf16>, vector<32x32xbf16>, vector<4x32xf32> -> vector<4x32xf32>
    %207 = arith.addf %196, %203 : vector<4x32xf32>
    %208 = arith.addf %207, %206 : vector<4x32xf32>
    %209 = vector.extract_strided_slice %185 {offsets = [2, 0, 0], sizes = [1, 4, 32], strides = [1, 1, 1]} : vector<3x5x32xbf16> to vector<1x4x32xbf16>
    %210 = vector.shape_cast %209 : vector<1x4x32xbf16> to vector<4x32xbf16>
    %211 = vector.extract_strided_slice %185 {offsets = [2, 1, 0], sizes = [1, 4, 32], strides = [1, 1, 1]} : vector<3x5x32xbf16> to vector<1x4x32xbf16>
    %212 = vector.shape_cast %211 : vector<1x4x32xbf16> to vector<4x32xbf16>
    %213 = vector.extract_strided_slice %0 {offsets = [2, 0, 0], sizes = [1, 32, 32], strides = [1, 1, 1]} : vector<6x32x32xbf16> to vector<1x32x32xbf16>
    %214 = vector.shape_cast %213 : vector<1x32x32xbf16> to vector<32x32xbf16>
    %cst_67 = arith.constant dense<0.000000e+00> : vector<4x32xf32>
    %215 = tpu.matmul %210, %214, %cst_67 {dimension_numbers = #tpu.dot_dimension_numbers<[1], [0], [0], [1], [0, 0, 1, 1], [], []>} : vector<4x32xbf16>, vector<32x32xbf16>, vector<4x32xf32> -> vector<4x32xf32>
    %216 = vector.extract_strided_slice %0 {offsets = [5, 0, 0], sizes = [1, 32, 32], strides = [1, 1, 1]} : vector<6x32x32xbf16> to vector<1x32x32xbf16>
    %217 = vector.shape_cast %216 : vector<1x32x32xbf16> to vector<32x32xbf16>
    %cst_68 = arith.constant dense<0.000000e+00> : vector<4x32xf32>
    %218 = tpu.matmul %212, %217, %cst_68 {dimension_numbers = #tpu.dot_dimension_numbers<[1], [0], [0], [1], [0, 0, 1, 1], [], []>} : vector<4x32xbf16>, vector<32x32xbf16>, vector<4x32xf32> -> vector<4x32xf32>
    %219 = arith.addf %208, %215 : vector<4x32xf32>
    %220 = arith.addf %219, %218 : vector<4x32xf32>
    %221 = vector.broadcast %1 : vector<1x32xf32> to vector<4x32xf32>
    %222 = arith.addf %220, %221 : vector<4x32xf32>
    %cst_69 = arith.constant 5.000000e-01 : f32
    %223 = vector.broadcast %cst_69 : f32 to vector<4x32xf32>
    %224 = arith.mulf %223, %222 : vector<4x32xf32>
    %225 = arith.mulf %222, %222 : vector<4x32xf32>
    %226 = arith.mulf %225, %222 : vector<4x32xf32>
    %cst_70 = arith.constant 4.471500e-02 : f32
    %227 = vector.broadcast %cst_70 : f32 to vector<4x32xf32>
    %228 = arith.mulf %227, %226 : vector<4x32xf32>
    %229 = arith.addf %222, %228 : vector<4x32xf32>
    %cst_71 = arith.constant 0.797884583 : f32
    %230 = vector.broadcast %cst_71 : f32 to vector<4x32xf32>
    %231 = arith.mulf %230, %229 : vector<4x32xf32>
    %232 = math.tanh %231 : vector<4x32xf32>
    %cst_72 = arith.constant 1.000000e+00 : f32
    %233 = vector.broadcast %cst_72 : f32 to vector<4x32xf32>
    %234 = arith.addf %233, %232 : vector<4x32xf32>
    %235 = arith.mulf %224, %234 : vector<4x32xf32>
    %c0_73 = arith.constant 0 : index
    %c3 = arith.constant 3 : index
    %c0_74 = arith.constant 0 : index
    %c0_75 = arith.constant 0 : index
    %236 = vector.load %arg5[%c0_73, %c3, %c0_74, %c0_75] : memref<1x4x4x32xf32, #tpu.memory_space<vmem>>, vector<1x1x4x32xf32>
    %237 = vector.shape_cast %236 : vector<1x1x4x32xf32> to vector<4x32xf32>
    %238 = vector.shape_cast %235 : vector<4x32xf32> to vector<1x1x4x32xf32>
    tpu.vector_store %arg5[%c0_73, %c3, %c0_74, %c0_75], %238 {strides = array<i32>} : memref<1x4x4x32xf32, #tpu.memory_space<vmem>>, vector<1x1x4x32xf32>,
    return
  }
  func.func @transform_0(%arg0: i32, %arg1: i32) -> (i32, i32, i32, i32) {
    %c0_i32 = arith.constant 0 : i32
    %c0_i32_0 = arith.constant 0 : i32
    %c0_i32_1 = arith.constant 0 : i32
    %c0_i32_2 = arith.constant 0 : i32
    return %arg0, %c0_i32, %c0_i32_0, %c0_i32_1 : i32, i32, i32, i32
  }
  func.func @transform_1(%arg0: i32, %arg1: i32) -> (i32, i32, i32) {
    %c0_i32 = arith.constant 0 : i32
    %c0_i32_0 = arith.constant 0 : i32
    %c0_i32_1 = arith.constant 0 : i32
    %c0_i32_2 = arith.constant 0 : i32
    return %c0_i32, %c0_i32_0, %c0_i32_1 : i32, i32, i32
  }
  func.func @transform_2(%arg0: i32, %arg1: i32) -> (i32, i32) {
    %c0_i32 = arith.constant 0 : i32
    %c0_i32_0 = arith.constant 0 : i32
    %c0_i32_1 = arith.constant 0 : i32
    return %c0_i32, %c0_i32_0 : i32, i32
  }
  func.func @transform_3(%arg0: i32, %arg1: i32) -> (i32, i32, i32, i32) {
    %c0_i32 = arith.constant 0 : i32
    %c0_i32_0 = arith.constant 0 : i32
    %c0_i32_1 = arith.constant 0 : i32
    return %arg0, %arg1, %c0_i32, %c0_i32_0 : i32, i32, i32, i32
  }
}

module attributes {stable_mosaic.version = 11 : i64} {
  func.func @_conv3x3s2_bn_gelu_kernel(%arg0: i32, %arg1: i32, %arg2: memref<1x18x9x6xbf16, #tpu.memory_space<vmem>>, %arg3: memref<6x6x16xbf16, #tpu.memory_space<vmem>>, %arg4: memref<1x16xf32, #tpu.memory_space<vmem>>, %arg5: memref<1x8x8x16xbf16, #tpu.memory_space<vmem>>) attributes {dimension_semantics = [#tpu.dimension_semantics<parallel>, #tpu.dimension_semantics<parallel>], iteration_bounds = array<i64: 2, 1>, scalar_prefetch = 0 : i64, scratch_operands = 0 : i64, tpu.core_type = #tpu.core_type<tc>, window_params = [{transform_indices = @transform_0, window_bounds = array<i64: 1, 18, 9, 6>}, {pipeline_mode = #tpu.pipeline_mode<synchronous>, transform_indices = @transform_1, window_bounds = array<i64: 6, 6, 16>}, {pipeline_mode = #tpu.pipeline_mode<synchronous>, transform_indices = @transform_2, window_bounds = array<i64: 1, 16>}, {transform_indices = @transform_3, window_bounds = array<i64: 1, 8, 8, 16>}]} {
    %c0 = arith.constant 0 : index
    %c0_0 = arith.constant 0 : index
    %c0_1 = arith.constant 0 : index
    %0 = vector.load %arg3[%c0, %c0_0, %c0_1] : memref<6x6x16xbf16, #tpu.memory_space<vmem>>, vector<6x6x16xbf16>
    %c0_2 = arith.constant 0 : index
    %c0_3 = arith.constant 0 : index
    %1 = vector.load %arg4[%c0_2, %c0_3] : memref<1x16xf32, #tpu.memory_space<vmem>>, vector<1x16xf32>
    %c8_i32 = arith.constant 8 : i32
    %2 = arith.muli %arg1, %c8_i32 : i32
    %c0_i32 = arith.constant 0 : i32
    %3 = arith.addi %2, %c0_i32 : i32
    %c7_i32 = arith.constant 7 : i32
    %4 = arith.minsi %3, %c7_i32 : i32
    %c2_i32 = arith.constant 2 : i32
    %5 = arith.muli %c2_i32, %4 : i32
    %c0_4 = arith.constant 0 : index
    %6 = arith.index_cast %5 : i32 to index
    %c0_5 = arith.constant 0 : index
    %c0_6 = arith.constant 0 : index
    %7 = vector.load %arg2[%c0_4, %6, %c0_5, %c0_6] : memref<1x18x9x6xbf16, #tpu.memory_space<vmem>>, vector<1x3x9x6xbf16>
    %8 = vector.shape_cast %7 : vector<1x3x9x6xbf16> to vector<3x9x6xbf16>
    %9 = vector.extract_strided_slice %8 {offsets = [0, 0, 0], sizes = [1, 8, 6], strides = [1, 1, 1]} : vector<3x9x6xbf16> to vector<1x8x6xbf16>
    %10 = vector.shape_cast %9 : vector<1x8x6xbf16> to vector<8x6xbf16>
    %11 = vector.extract_strided_slice %8 {offsets = [0, 1, 0], sizes = [1, 8, 6], strides = [1, 1, 1]} : vector<3x9x6xbf16> to vector<1x8x6xbf16>
    %12 = vector.shape_cast %11 : vector<1x8x6xbf16> to vector<8x6xbf16>
    %13 = vector.extract_strided_slice %0 {offsets = [0, 0, 0], sizes = [1, 6, 16], strides = [1, 1, 1]} : vector<6x6x16xbf16> to vector<1x6x16xbf16>
    %14 = vector.shape_cast %13 : vector<1x6x16xbf16> to vector<6x16xbf16>
    %cst = arith.constant dense<0.000000e+00> : vector<8x16xf32>
    %15 = tpu.matmul %10, %14, %cst {dimension_numbers = #tpu.dot_dimension_numbers<[1], [0], [0], [1], [0, 0, 1, 1], [], []>} : vector<8x6xbf16>, vector<6x16xbf16>, vector<8x16xf32> -> vector<8x16xf32>
    %16 = vector.extract_strided_slice %0 {offsets = [3, 0, 0], sizes = [1, 6, 16], strides = [1, 1, 1]} : vector<6x6x16xbf16> to vector<1x6x16xbf16>
    %17 = vector.shape_cast %16 : vector<1x6x16xbf16> to vector<6x16xbf16>
    %cst_7 = arith.constant dense<0.000000e+00> : vector<8x16xf32>
    %18 = tpu.matmul %12, %17, %cst_7 {dimension_numbers = #tpu.dot_dimension_numbers<[1], [0], [0], [1], [0, 0, 1, 1], [], []>} : vector<8x6xbf16>, vector<6x16xbf16>, vector<8x16xf32> -> vector<8x16xf32>
    %19 = arith.addf %15, %18 : vector<8x16xf32>
    %20 = vector.extract_strided_slice %8 {offsets = [1, 0, 0], sizes = [1, 8, 6], strides = [1, 1, 1]} : vector<3x9x6xbf16> to vector<1x8x6xbf16>
    %21 = vector.shape_cast %20 : vector<1x8x6xbf16> to vector<8x6xbf16>
    %22 = vector.extract_strided_slice %8 {offsets = [1, 1, 0], sizes = [1, 8, 6], strides = [1, 1, 1]} : vector<3x9x6xbf16> to vector<1x8x6xbf16>
    %23 = vector.shape_cast %22 : vector<1x8x6xbf16> to vector<8x6xbf16>
    %24 = vector.extract_strided_slice %0 {offsets = [1, 0, 0], sizes = [1, 6, 16], strides = [1, 1, 1]} : vector<6x6x16xbf16> to vector<1x6x16xbf16>
    %25 = vector.shape_cast %24 : vector<1x6x16xbf16> to vector<6x16xbf16>
    %cst_8 = arith.constant dense<0.000000e+00> : vector<8x16xf32>
    %26 = tpu.matmul %21, %25, %cst_8 {dimension_numbers = #tpu.dot_dimension_numbers<[1], [0], [0], [1], [0, 0, 1, 1], [], []>} : vector<8x6xbf16>, vector<6x16xbf16>, vector<8x16xf32> -> vector<8x16xf32>
    %27 = vector.extract_strided_slice %0 {offsets = [4, 0, 0], sizes = [1, 6, 16], strides = [1, 1, 1]} : vector<6x6x16xbf16> to vector<1x6x16xbf16>
    %28 = vector.shape_cast %27 : vector<1x6x16xbf16> to vector<6x16xbf16>
    %cst_9 = arith.constant dense<0.000000e+00> : vector<8x16xf32>
    %29 = tpu.matmul %23, %28, %cst_9 {dimension_numbers = #tpu.dot_dimension_numbers<[1], [0], [0], [1], [0, 0, 1, 1], [], []>} : vector<8x6xbf16>, vector<6x16xbf16>, vector<8x16xf32> -> vector<8x16xf32>
    %30 = arith.addf %19, %26 : vector<8x16xf32>
    %31 = arith.addf %30, %29 : vector<8x16xf32>
    %32 = vector.extract_strided_slice %8 {offsets = [2, 0, 0], sizes = [1, 8, 6], strides = [1, 1, 1]} : vector<3x9x6xbf16> to vector<1x8x6xbf16>
    %33 = vector.shape_cast %32 : vector<1x8x6xbf16> to vector<8x6xbf16>
    %34 = vector.extract_strided_slice %8 {offsets = [2, 1, 0], sizes = [1, 8, 6], strides = [1, 1, 1]} : vector<3x9x6xbf16> to vector<1x8x6xbf16>
    %35 = vector.shape_cast %34 : vector<1x8x6xbf16> to vector<8x6xbf16>
    %36 = vector.extract_strided_slice %0 {offsets = [2, 0, 0], sizes = [1, 6, 16], strides = [1, 1, 1]} : vector<6x6x16xbf16> to vector<1x6x16xbf16>
    %37 = vector.shape_cast %36 : vector<1x6x16xbf16> to vector<6x16xbf16>
    %cst_10 = arith.constant dense<0.000000e+00> : vector<8x16xf32>
    %38 = tpu.matmul %33, %37, %cst_10 {dimension_numbers = #tpu.dot_dimension_numbers<[1], [0], [0], [1], [0, 0, 1, 1], [], []>} : vector<8x6xbf16>, vector<6x16xbf16>, vector<8x16xf32> -> vector<8x16xf32>
    %39 = vector.extract_strided_slice %0 {offsets = [5, 0, 0], sizes = [1, 6, 16], strides = [1, 1, 1]} : vector<6x6x16xbf16> to vector<1x6x16xbf16>
    %40 = vector.shape_cast %39 : vector<1x6x16xbf16> to vector<6x16xbf16>
    %cst_11 = arith.constant dense<0.000000e+00> : vector<8x16xf32>
    %41 = tpu.matmul %35, %40, %cst_11 {dimension_numbers = #tpu.dot_dimension_numbers<[1], [0], [0], [1], [0, 0, 1, 1], [], []>} : vector<8x6xbf16>, vector<6x16xbf16>, vector<8x16xf32> -> vector<8x16xf32>
    %42 = arith.addf %31, %38 : vector<8x16xf32>
    %43 = arith.addf %42, %41 : vector<8x16xf32>
    %44 = vector.broadcast %1 : vector<1x16xf32> to vector<8x16xf32>
    %45 = arith.addf %43, %44 : vector<8x16xf32>
    %cst_12 = arith.constant 5.000000e-01 : f32
    %46 = vector.broadcast %cst_12 : f32 to vector<8x16xf32>
    %47 = arith.mulf %46, %45 : vector<8x16xf32>
    %48 = arith.mulf %45, %45 : vector<8x16xf32>
    %49 = arith.mulf %48, %45 : vector<8x16xf32>
    %cst_13 = arith.constant 4.471500e-02 : f32
    %50 = vector.broadcast %cst_13 : f32 to vector<8x16xf32>
    %51 = arith.mulf %50, %49 : vector<8x16xf32>
    %52 = arith.addf %45, %51 : vector<8x16xf32>
    %cst_14 = arith.constant 0.797884583 : f32
    %53 = vector.broadcast %cst_14 : f32 to vector<8x16xf32>
    %54 = arith.mulf %53, %52 : vector<8x16xf32>
    %55 = math.tanh %54 : vector<8x16xf32>
    %cst_15 = arith.constant 1.000000e+00 : f32
    %56 = vector.broadcast %cst_15 : f32 to vector<8x16xf32>
    %57 = arith.addf %56, %55 : vector<8x16xf32>
    %58 = arith.mulf %47, %57 : vector<8x16xf32>
    %59 = arith.truncf %58 : vector<8x16xf32> to vector<8x16xbf16>
    %c0_16 = arith.constant 0 : index
    %c0_17 = arith.constant 0 : index
    %c0_18 = arith.constant 0 : index
    %c0_19 = arith.constant 0 : index
    %60 = vector.load %arg5[%c0_16, %c0_17, %c0_18, %c0_19] : memref<1x8x8x16xbf16, #tpu.memory_space<vmem>>, vector<1x1x8x16xbf16>
    %61 = vector.shape_cast %60 : vector<1x1x8x16xbf16> to vector<8x16xbf16>
    %62 = vector.shape_cast %59 : vector<8x16xbf16> to vector<1x1x8x16xbf16>
    tpu.vector_store %arg5[%c0_16, %c0_17, %c0_18, %c0_19], %62 {strides = array<i32>} : memref<1x8x8x16xbf16, #tpu.memory_space<vmem>>, vector<1x1x8x16xbf16>,
    %c1_i32 = arith.constant 1 : i32
    %63 = arith.addi %2, %c1_i32 : i32
    %c7_i32_20 = arith.constant 7 : i32
    %64 = arith.minsi %63, %c7_i32_20 : i32
    %c2_i32_21 = arith.constant 2 : i32
    %65 = arith.muli %c2_i32_21, %64 : i32
    %c0_22 = arith.constant 0 : index
    %66 = arith.index_cast %65 : i32 to index
    %c0_23 = arith.constant 0 : index
    %c0_24 = arith.constant 0 : index
    %67 = vector.load %arg2[%c0_22, %66, %c0_23, %c0_24] : memref<1x18x9x6xbf16, #tpu.memory_space<vmem>>, vector<1x3x9x6xbf16>
    %68 = vector.shape_cast %67 : vector<1x3x9x6xbf16> to vector<3x9x6xbf16>
    %69 = vector.extract_strided_slice %68 {offsets = [0, 0, 0], sizes = [1, 8, 6], strides = [1, 1, 1]} : vector<3x9x6xbf16> to vector<1x8x6xbf16>
    %70 = vector.shape_cast %69 : vector<1x8x6xbf16> to vector<8x6xbf16>
    %71 = vector.extract_strided_slice %68 {offsets = [0, 1, 0], sizes = [1, 8, 6], strides = [1, 1, 1]} : vector<3x9x6xbf16> to vector<1x8x6xbf16>
    %72 = vector.shape_cast %71 : vector<1x8x6xbf16> to vector<8x6xbf16>
    %73 = vector.extract_strided_slice %0 {offsets = [0, 0, 0], sizes = [1, 6, 16], strides = [1, 1, 1]} : vector<6x6x16xbf16> to vector<1x6x16xbf16>
    %74 = vector.shape_cast %73 : vector<1x6x16xbf16> to vector<6x16xbf16>
    %cst_25 = arith.constant dense<0.000000e+00> : vector<8x16xf32>
    %75 = tpu.matmul %70, %74, %cst_25 {dimension_numbers = #tpu.dot_dimension_numbers<[1], [0], [0], [1], [0, 0, 1, 1], [], []>} : vector<8x6xbf16>, vector<6x16xbf16>, vector<8x16xf32> -> vector<8x16xf32>
    %76 = vector.extract_strided_slice %0 {offsets = [3, 0, 0], sizes = [1, 6, 16], strides = [1, 1, 1]} : vector<6x6x16xbf16> to vector<1x6x16xbf16>
    %77 = vector.shape_cast %76 : vector<1x6x16xbf16> to vector<6x16xbf16>
    %cst_26 = arith.constant dense<0.000000e+00> : vector<8x16xf32>
    %78 = tpu.matmul %72, %77, %cst_26 {dimension_numbers = #tpu.dot_dimension_numbers<[1], [0], [0], [1], [0, 0, 1, 1], [], []>} : vector<8x6xbf16>, vector<6x16xbf16>, vector<8x16xf32> -> vector<8x16xf32>
    %79 = arith.addf %75, %78 : vector<8x16xf32>
    %80 = vector.extract_strided_slice %68 {offsets = [1, 0, 0], sizes = [1, 8, 6], strides = [1, 1, 1]} : vector<3x9x6xbf16> to vector<1x8x6xbf16>
    %81 = vector.shape_cast %80 : vector<1x8x6xbf16> to vector<8x6xbf16>
    %82 = vector.extract_strided_slice %68 {offsets = [1, 1, 0], sizes = [1, 8, 6], strides = [1, 1, 1]} : vector<3x9x6xbf16> to vector<1x8x6xbf16>
    %83 = vector.shape_cast %82 : vector<1x8x6xbf16> to vector<8x6xbf16>
    %84 = vector.extract_strided_slice %0 {offsets = [1, 0, 0], sizes = [1, 6, 16], strides = [1, 1, 1]} : vector<6x6x16xbf16> to vector<1x6x16xbf16>
    %85 = vector.shape_cast %84 : vector<1x6x16xbf16> to vector<6x16xbf16>
    %cst_27 = arith.constant dense<0.000000e+00> : vector<8x16xf32>
    %86 = tpu.matmul %81, %85, %cst_27 {dimension_numbers = #tpu.dot_dimension_numbers<[1], [0], [0], [1], [0, 0, 1, 1], [], []>} : vector<8x6xbf16>, vector<6x16xbf16>, vector<8x16xf32> -> vector<8x16xf32>
    %87 = vector.extract_strided_slice %0 {offsets = [4, 0, 0], sizes = [1, 6, 16], strides = [1, 1, 1]} : vector<6x6x16xbf16> to vector<1x6x16xbf16>
    %88 = vector.shape_cast %87 : vector<1x6x16xbf16> to vector<6x16xbf16>
    %cst_28 = arith.constant dense<0.000000e+00> : vector<8x16xf32>
    %89 = tpu.matmul %83, %88, %cst_28 {dimension_numbers = #tpu.dot_dimension_numbers<[1], [0], [0], [1], [0, 0, 1, 1], [], []>} : vector<8x6xbf16>, vector<6x16xbf16>, vector<8x16xf32> -> vector<8x16xf32>
    %90 = arith.addf %79, %86 : vector<8x16xf32>
    %91 = arith.addf %90, %89 : vector<8x16xf32>
    %92 = vector.extract_strided_slice %68 {offsets = [2, 0, 0], sizes = [1, 8, 6], strides = [1, 1, 1]} : vector<3x9x6xbf16> to vector<1x8x6xbf16>
    %93 = vector.shape_cast %92 : vector<1x8x6xbf16> to vector<8x6xbf16>
    %94 = vector.extract_strided_slice %68 {offsets = [2, 1, 0], sizes = [1, 8, 6], strides = [1, 1, 1]} : vector<3x9x6xbf16> to vector<1x8x6xbf16>
    %95 = vector.shape_cast %94 : vector<1x8x6xbf16> to vector<8x6xbf16>
    %96 = vector.extract_strided_slice %0 {offsets = [2, 0, 0], sizes = [1, 6, 16], strides = [1, 1, 1]} : vector<6x6x16xbf16> to vector<1x6x16xbf16>
    %97 = vector.shape_cast %96 : vector<1x6x16xbf16> to vector<6x16xbf16>
    %cst_29 = arith.constant dense<0.000000e+00> : vector<8x16xf32>
    %98 = tpu.matmul %93, %97, %cst_29 {dimension_numbers = #tpu.dot_dimension_numbers<[1], [0], [0], [1], [0, 0, 1, 1], [], []>} : vector<8x6xbf16>, vector<6x16xbf16>, vector<8x16xf32> -> vector<8x16xf32>
    %99 = vector.extract_strided_slice %0 {offsets = [5, 0, 0], sizes = [1, 6, 16], strides = [1, 1, 1]} : vector<6x6x16xbf16> to vector<1x6x16xbf16>
    %100 = vector.shape_cast %99 : vector<1x6x16xbf16> to vector<6x16xbf16>
    %cst_30 = arith.constant dense<0.000000e+00> : vector<8x16xf32>
    %101 = tpu.matmul %95, %100, %cst_30 {dimension_numbers = #tpu.dot_dimension_numbers<[1], [0], [0], [1], [0, 0, 1, 1], [], []>} : vector<8x6xbf16>, vector<6x16xbf16>, vector<8x16xf32> -> vector<8x16xf32>
    %102 = arith.addf %91, %98 : vector<8x16xf32>
    %103 = arith.addf %102, %101 : vector<8x16xf32>
    %104 = vector.broadcast %1 : vector<1x16xf32> to vector<8x16xf32>
    %105 = arith.addf %103, %104 : vector<8x16xf32>
    %cst_31 = arith.constant 5.000000e-01 : f32
    %106 = vector.broadcast %cst_31 : f32 to vector<8x16xf32>
    %107 = arith.mulf %106, %105 : vector<8x16xf32>
    %108 = arith.mulf %105, %105 : vector<8x16xf32>
    %109 = arith.mulf %108, %105 : vector<8x16xf32>
    %cst_32 = arith.constant 4.471500e-02 : f32
    %110 = vector.broadcast %cst_32 : f32 to vector<8x16xf32>
    %111 = arith.mulf %110, %109 : vector<8x16xf32>
    %112 = arith.addf %105, %111 : vector<8x16xf32>
    %cst_33 = arith.constant 0.797884583 : f32
    %113 = vector.broadcast %cst_33 : f32 to vector<8x16xf32>
    %114 = arith.mulf %113, %112 : vector<8x16xf32>
    %115 = math.tanh %114 : vector<8x16xf32>
    %cst_34 = arith.constant 1.000000e+00 : f32
    %116 = vector.broadcast %cst_34 : f32 to vector<8x16xf32>
    %117 = arith.addf %116, %115 : vector<8x16xf32>
    %118 = arith.mulf %107, %117 : vector<8x16xf32>
    %119 = arith.truncf %118 : vector<8x16xf32> to vector<8x16xbf16>
    %c0_35 = arith.constant 0 : index
    %c1 = arith.constant 1 : index
    %c0_36 = arith.constant 0 : index
    %c0_37 = arith.constant 0 : index
    %120 = vector.load %arg5[%c0_35, %c1, %c0_36, %c0_37] : memref<1x8x8x16xbf16, #tpu.memory_space<vmem>>, vector<1x1x8x16xbf16>
    %121 = vector.shape_cast %120 : vector<1x1x8x16xbf16> to vector<8x16xbf16>
    %122 = vector.shape_cast %119 : vector<8x16xbf16> to vector<1x1x8x16xbf16>
    tpu.vector_store %arg5[%c0_35, %c1, %c0_36, %c0_37], %122 {strides = array<i32>} : memref<1x8x8x16xbf16, #tpu.memory_space<vmem>>, vector<1x1x8x16xbf16>,
    %c2_i32_38 = arith.constant 2 : i32
    %123 = arith.addi %2, %c2_i32_38 : i32
    %c7_i32_39 = arith.constant 7 : i32
    %124 = arith.minsi %123, %c7_i32_39 : i32
    %c2_i32_40 = arith.constant 2 : i32
    %125 = arith.muli %c2_i32_40, %124 : i32
    %c0_41 = arith.constant 0 : index
    %126 = arith.index_cast %125 : i32 to index
    %c0_42 = arith.constant 0 : index
    %c0_43 = arith.constant 0 : index
    %127 = vector.load %arg2[%c0_41, %126, %c0_42, %c0_43] : memref<1x18x9x6xbf16, #tpu.memory_space<vmem>>, vector<1x3x9x6xbf16>
    %128 = vector.shape_cast %127 : vector<1x3x9x6xbf16> to vector<3x9x6xbf16>
    %129 = vector.extract_strided_slice %128 {offsets = [0, 0, 0], sizes = [1, 8, 6], strides = [1, 1, 1]} : vector<3x9x6xbf16> to vector<1x8x6xbf16>
    %130 = vector.shape_cast %129 : vector<1x8x6xbf16> to vector<8x6xbf16>
    %131 = vector.extract_strided_slice %128 {offsets = [0, 1, 0], sizes = [1, 8, 6], strides = [1, 1, 1]} : vector<3x9x6xbf16> to vector<1x8x6xbf16>
    %132 = vector.shape_cast %131 : vector<1x8x6xbf16> to vector<8x6xbf16>
    %133 = vector.extract_strided_slice %0 {offsets = [0, 0, 0], sizes = [1, 6, 16], strides = [1, 1, 1]} : vector<6x6x16xbf16> to vector<1x6x16xbf16>
    %134 = vector.shape_cast %133 : vector<1x6x16xbf16> to vector<6x16xbf16>
    %cst_44 = arith.constant dense<0.000000e+00> : vector<8x16xf32>
    %135 = tpu.matmul %130, %134, %cst_44 {dimension_numbers = #tpu.dot_dimension_numbers<[1], [0], [0], [1], [0, 0, 1, 1], [], []>} : vector<8x6xbf16>, vector<6x16xbf16>, vector<8x16xf32> -> vector<8x16xf32>
    %136 = vector.extract_strided_slice %0 {offsets = [3, 0, 0], sizes = [1, 6, 16], strides = [1, 1, 1]} : vector<6x6x16xbf16> to vector<1x6x16xbf16>
    %137 = vector.shape_cast %136 : vector<1x6x16xbf16> to vector<6x16xbf16>
    %cst_45 = arith.constant dense<0.000000e+00> : vector<8x16xf32>
    %138 = tpu.matmul %132, %137, %cst_45 {dimension_numbers = #tpu.dot_dimension_numbers<[1], [0], [0], [1], [0, 0, 1, 1], [], []>} : vector<8x6xbf16>, vector<6x16xbf16>, vector<8x16xf32> -> vector<8x16xf32>
    %139 = arith.addf %135, %138 : vector<8x16xf32>
    %140 = vector.extract_strided_slice %128 {offsets = [1, 0, 0], sizes = [1, 8, 6], strides = [1, 1, 1]} : vector<3x9x6xbf16> to vector<1x8x6xbf16>
    %141 = vector.shape_cast %140 : vector<1x8x6xbf16> to vector<8x6xbf16>
    %142 = vector.extract_strided_slice %128 {offsets = [1, 1, 0], sizes = [1, 8, 6], strides = [1, 1, 1]} : vector<3x9x6xbf16> to vector<1x8x6xbf16>
    %143 = vector.shape_cast %142 : vector<1x8x6xbf16> to vector<8x6xbf16>
    %144 = vector.extract_strided_slice %0 {offsets = [1, 0, 0], sizes = [1, 6, 16], strides = [1, 1, 1]} : vector<6x6x16xbf16> to vector<1x6x16xbf16>
    %145 = vector.shape_cast %144 : vector<1x6x16xbf16> to vector<6x16xbf16>
    %cst_46 = arith.constant dense<0.000000e+00> : vector<8x16xf32>
    %146 = tpu.matmul %141, %145, %cst_46 {dimension_numbers = #tpu.dot_dimension_numbers<[1], [0], [0], [1], [0, 0, 1, 1], [], []>} : vector<8x6xbf16>, vector<6x16xbf16>, vector<8x16xf32> -> vector<8x16xf32>
    %147 = vector.extract_strided_slice %0 {offsets = [4, 0, 0], sizes = [1, 6, 16], strides = [1, 1, 1]} : vector<6x6x16xbf16> to vector<1x6x16xbf16>
    %148 = vector.shape_cast %147 : vector<1x6x16xbf16> to vector<6x16xbf16>
    %cst_47 = arith.constant dense<0.000000e+00> : vector<8x16xf32>
    %149 = tpu.matmul %143, %148, %cst_47 {dimension_numbers = #tpu.dot_dimension_numbers<[1], [0], [0], [1], [0, 0, 1, 1], [], []>} : vector<8x6xbf16>, vector<6x16xbf16>, vector<8x16xf32> -> vector<8x16xf32>
    %150 = arith.addf %139, %146 : vector<8x16xf32>
    %151 = arith.addf %150, %149 : vector<8x16xf32>
    %152 = vector.extract_strided_slice %128 {offsets = [2, 0, 0], sizes = [1, 8, 6], strides = [1, 1, 1]} : vector<3x9x6xbf16> to vector<1x8x6xbf16>
    %153 = vector.shape_cast %152 : vector<1x8x6xbf16> to vector<8x6xbf16>
    %154 = vector.extract_strided_slice %128 {offsets = [2, 1, 0], sizes = [1, 8, 6], strides = [1, 1, 1]} : vector<3x9x6xbf16> to vector<1x8x6xbf16>
    %155 = vector.shape_cast %154 : vector<1x8x6xbf16> to vector<8x6xbf16>
    %156 = vector.extract_strided_slice %0 {offsets = [2, 0, 0], sizes = [1, 6, 16], strides = [1, 1, 1]} : vector<6x6x16xbf16> to vector<1x6x16xbf16>
    %157 = vector.shape_cast %156 : vector<1x6x16xbf16> to vector<6x16xbf16>
    %cst_48 = arith.constant dense<0.000000e+00> : vector<8x16xf32>
    %158 = tpu.matmul %153, %157, %cst_48 {dimension_numbers = #tpu.dot_dimension_numbers<[1], [0], [0], [1], [0, 0, 1, 1], [], []>} : vector<8x6xbf16>, vector<6x16xbf16>, vector<8x16xf32> -> vector<8x16xf32>
    %159 = vector.extract_strided_slice %0 {offsets = [5, 0, 0], sizes = [1, 6, 16], strides = [1, 1, 1]} : vector<6x6x16xbf16> to vector<1x6x16xbf16>
    %160 = vector.shape_cast %159 : vector<1x6x16xbf16> to vector<6x16xbf16>
    %cst_49 = arith.constant dense<0.000000e+00> : vector<8x16xf32>
    %161 = tpu.matmul %155, %160, %cst_49 {dimension_numbers = #tpu.dot_dimension_numbers<[1], [0], [0], [1], [0, 0, 1, 1], [], []>} : vector<8x6xbf16>, vector<6x16xbf16>, vector<8x16xf32> -> vector<8x16xf32>
    %162 = arith.addf %151, %158 : vector<8x16xf32>
    %163 = arith.addf %162, %161 : vector<8x16xf32>
    %164 = vector.broadcast %1 : vector<1x16xf32> to vector<8x16xf32>
    %165 = arith.addf %163, %164 : vector<8x16xf32>
    %cst_50 = arith.constant 5.000000e-01 : f32
    %166 = vector.broadcast %cst_50 : f32 to vector<8x16xf32>
    %167 = arith.mulf %166, %165 : vector<8x16xf32>
    %168 = arith.mulf %165, %165 : vector<8x16xf32>
    %169 = arith.mulf %168, %165 : vector<8x16xf32>
    %cst_51 = arith.constant 4.471500e-02 : f32
    %170 = vector.broadcast %cst_51 : f32 to vector<8x16xf32>
    %171 = arith.mulf %170, %169 : vector<8x16xf32>
    %172 = arith.addf %165, %171 : vector<8x16xf32>
    %cst_52 = arith.constant 0.797884583 : f32
    %173 = vector.broadcast %cst_52 : f32 to vector<8x16xf32>
    %174 = arith.mulf %173, %172 : vector<8x16xf32>
    %175 = math.tanh %174 : vector<8x16xf32>
    %cst_53 = arith.constant 1.000000e+00 : f32
    %176 = vector.broadcast %cst_53 : f32 to vector<8x16xf32>
    %177 = arith.addf %176, %175 : vector<8x16xf32>
    %178 = arith.mulf %167, %177 : vector<8x16xf32>
    %179 = arith.truncf %178 : vector<8x16xf32> to vector<8x16xbf16>
    %c0_54 = arith.constant 0 : index
    %c2 = arith.constant 2 : index
    %c0_55 = arith.constant 0 : index
    %c0_56 = arith.constant 0 : index
    %180 = vector.load %arg5[%c0_54, %c2, %c0_55, %c0_56] : memref<1x8x8x16xbf16, #tpu.memory_space<vmem>>, vector<1x1x8x16xbf16>
    %181 = vector.shape_cast %180 : vector<1x1x8x16xbf16> to vector<8x16xbf16>
    %182 = vector.shape_cast %179 : vector<8x16xbf16> to vector<1x1x8x16xbf16>
    tpu.vector_store %arg5[%c0_54, %c2, %c0_55, %c0_56], %182 {strides = array<i32>} : memref<1x8x8x16xbf16, #tpu.memory_space<vmem>>, vector<1x1x8x16xbf16>,
    %c3_i32 = arith.constant 3 : i32
    %183 = arith.addi %2, %c3_i32 : i32
    %c7_i32_57 = arith.constant 7 : i32
    %184 = arith.minsi %183, %c7_i32_57 : i32
    %c2_i32_58 = arith.constant 2 : i32
    %185 = arith.muli %c2_i32_58, %184 : i32
    %c0_59 = arith.constant 0 : index
    %186 = arith.index_cast %185 : i32 to index
    %c0_60 = arith.constant 0 : index
    %c0_61 = arith.constant 0 : index
    %187 = vector.load %arg2[%c0_59, %186, %c0_60, %c0_61] : memref<1x18x9x6xbf16, #tpu.memory_space<vmem>>, vector<1x3x9x6xbf16>
    %188 = vector.shape_cast %187 : vector<1x3x9x6xbf16> to vector<3x9x6xbf16>
    %189 = vector.extract_strided_slice %188 {offsets = [0, 0, 0], sizes = [1, 8, 6], strides = [1, 1, 1]} : vector<3x9x6xbf16> to vector<1x8x6xbf16>
    %190 = vector.shape_cast %189 : vector<1x8x6xbf16> to vector<8x6xbf16>
    %191 = vector.extract_strided_slice %188 {offsets = [0, 1, 0], sizes = [1, 8, 6], strides = [1, 1, 1]} : vector<3x9x6xbf16> to vector<1x8x6xbf16>
    %192 = vector.shape_cast %191 : vector<1x8x6xbf16> to vector<8x6xbf16>
    %193 = vector.extract_strided_slice %0 {offsets = [0, 0, 0], sizes = [1, 6, 16], strides = [1, 1, 1]} : vector<6x6x16xbf16> to vector<1x6x16xbf16>
    %194 = vector.shape_cast %193 : vector<1x6x16xbf16> to vector<6x16xbf16>
    %cst_62 = arith.constant dense<0.000000e+00> : vector<8x16xf32>
    %195 = tpu.matmul %190, %194, %cst_62 {dimension_numbers = #tpu.dot_dimension_numbers<[1], [0], [0], [1], [0, 0, 1, 1], [], []>} : vector<8x6xbf16>, vector<6x16xbf16>, vector<8x16xf32> -> vector<8x16xf32>
    %196 = vector.extract_strided_slice %0 {offsets = [3, 0, 0], sizes = [1, 6, 16], strides = [1, 1, 1]} : vector<6x6x16xbf16> to vector<1x6x16xbf16>
    %197 = vector.shape_cast %196 : vector<1x6x16xbf16> to vector<6x16xbf16>
    %cst_63 = arith.constant dense<0.000000e+00> : vector<8x16xf32>
    %198 = tpu.matmul %192, %197, %cst_63 {dimension_numbers = #tpu.dot_dimension_numbers<[1], [0], [0], [1], [0, 0, 1, 1], [], []>} : vector<8x6xbf16>, vector<6x16xbf16>, vector<8x16xf32> -> vector<8x16xf32>
    %199 = arith.addf %195, %198 : vector<8x16xf32>
    %200 = vector.extract_strided_slice %188 {offsets = [1, 0, 0], sizes = [1, 8, 6], strides = [1, 1, 1]} : vector<3x9x6xbf16> to vector<1x8x6xbf16>
    %201 = vector.shape_cast %200 : vector<1x8x6xbf16> to vector<8x6xbf16>
    %202 = vector.extract_strided_slice %188 {offsets = [1, 1, 0], sizes = [1, 8, 6], strides = [1, 1, 1]} : vector<3x9x6xbf16> to vector<1x8x6xbf16>
    %203 = vector.shape_cast %202 : vector<1x8x6xbf16> to vector<8x6xbf16>
    %204 = vector.extract_strided_slice %0 {offsets = [1, 0, 0], sizes = [1, 6, 16], strides = [1, 1, 1]} : vector<6x6x16xbf16> to vector<1x6x16xbf16>
    %205 = vector.shape_cast %204 : vector<1x6x16xbf16> to vector<6x16xbf16>
    %cst_64 = arith.constant dense<0.000000e+00> : vector<8x16xf32>
    %206 = tpu.matmul %201, %205, %cst_64 {dimension_numbers = #tpu.dot_dimension_numbers<[1], [0], [0], [1], [0, 0, 1, 1], [], []>} : vector<8x6xbf16>, vector<6x16xbf16>, vector<8x16xf32> -> vector<8x16xf32>
    %207 = vector.extract_strided_slice %0 {offsets = [4, 0, 0], sizes = [1, 6, 16], strides = [1, 1, 1]} : vector<6x6x16xbf16> to vector<1x6x16xbf16>
    %208 = vector.shape_cast %207 : vector<1x6x16xbf16> to vector<6x16xbf16>
    %cst_65 = arith.constant dense<0.000000e+00> : vector<8x16xf32>
    %209 = tpu.matmul %203, %208, %cst_65 {dimension_numbers = #tpu.dot_dimension_numbers<[1], [0], [0], [1], [0, 0, 1, 1], [], []>} : vector<8x6xbf16>, vector<6x16xbf16>, vector<8x16xf32> -> vector<8x16xf32>
    %210 = arith.addf %199, %206 : vector<8x16xf32>
    %211 = arith.addf %210, %209 : vector<8x16xf32>
    %212 = vector.extract_strided_slice %188 {offsets = [2, 0, 0], sizes = [1, 8, 6], strides = [1, 1, 1]} : vector<3x9x6xbf16> to vector<1x8x6xbf16>
    %213 = vector.shape_cast %212 : vector<1x8x6xbf16> to vector<8x6xbf16>
    %214 = vector.extract_strided_slice %188 {offsets = [2, 1, 0], sizes = [1, 8, 6], strides = [1, 1, 1]} : vector<3x9x6xbf16> to vector<1x8x6xbf16>
    %215 = vector.shape_cast %214 : vector<1x8x6xbf16> to vector<8x6xbf16>
    %216 = vector.extract_strided_slice %0 {offsets = [2, 0, 0], sizes = [1, 6, 16], strides = [1, 1, 1]} : vector<6x6x16xbf16> to vector<1x6x16xbf16>
    %217 = vector.shape_cast %216 : vector<1x6x16xbf16> to vector<6x16xbf16>
    %cst_66 = arith.constant dense<0.000000e+00> : vector<8x16xf32>
    %218 = tpu.matmul %213, %217, %cst_66 {dimension_numbers = #tpu.dot_dimension_numbers<[1], [0], [0], [1], [0, 0, 1, 1], [], []>} : vector<8x6xbf16>, vector<6x16xbf16>, vector<8x16xf32> -> vector<8x16xf32>
    %219 = vector.extract_strided_slice %0 {offsets = [5, 0, 0], sizes = [1, 6, 16], strides = [1, 1, 1]} : vector<6x6x16xbf16> to vector<1x6x16xbf16>
    %220 = vector.shape_cast %219 : vector<1x6x16xbf16> to vector<6x16xbf16>
    %cst_67 = arith.constant dense<0.000000e+00> : vector<8x16xf32>
    %221 = tpu.matmul %215, %220, %cst_67 {dimension_numbers = #tpu.dot_dimension_numbers<[1], [0], [0], [1], [0, 0, 1, 1], [], []>} : vector<8x6xbf16>, vector<6x16xbf16>, vector<8x16xf32> -> vector<8x16xf32>
    %222 = arith.addf %211, %218 : vector<8x16xf32>
    %223 = arith.addf %222, %221 : vector<8x16xf32>
    %224 = vector.broadcast %1 : vector<1x16xf32> to vector<8x16xf32>
    %225 = arith.addf %223, %224 : vector<8x16xf32>
    %cst_68 = arith.constant 5.000000e-01 : f32
    %226 = vector.broadcast %cst_68 : f32 to vector<8x16xf32>
    %227 = arith.mulf %226, %225 : vector<8x16xf32>
    %228 = arith.mulf %225, %225 : vector<8x16xf32>
    %229 = arith.mulf %228, %225 : vector<8x16xf32>
    %cst_69 = arith.constant 4.471500e-02 : f32
    %230 = vector.broadcast %cst_69 : f32 to vector<8x16xf32>
    %231 = arith.mulf %230, %229 : vector<8x16xf32>
    %232 = arith.addf %225, %231 : vector<8x16xf32>
    %cst_70 = arith.constant 0.797884583 : f32
    %233 = vector.broadcast %cst_70 : f32 to vector<8x16xf32>
    %234 = arith.mulf %233, %232 : vector<8x16xf32>
    %235 = math.tanh %234 : vector<8x16xf32>
    %cst_71 = arith.constant 1.000000e+00 : f32
    %236 = vector.broadcast %cst_71 : f32 to vector<8x16xf32>
    %237 = arith.addf %236, %235 : vector<8x16xf32>
    %238 = arith.mulf %227, %237 : vector<8x16xf32>
    %239 = arith.truncf %238 : vector<8x16xf32> to vector<8x16xbf16>
    %c0_72 = arith.constant 0 : index
    %c3 = arith.constant 3 : index
    %c0_73 = arith.constant 0 : index
    %c0_74 = arith.constant 0 : index
    %240 = vector.load %arg5[%c0_72, %c3, %c0_73, %c0_74] : memref<1x8x8x16xbf16, #tpu.memory_space<vmem>>, vector<1x1x8x16xbf16>
    %241 = vector.shape_cast %240 : vector<1x1x8x16xbf16> to vector<8x16xbf16>
    %242 = vector.shape_cast %239 : vector<8x16xbf16> to vector<1x1x8x16xbf16>
    tpu.vector_store %arg5[%c0_72, %c3, %c0_73, %c0_74], %242 {strides = array<i32>} : memref<1x8x8x16xbf16, #tpu.memory_space<vmem>>, vector<1x1x8x16xbf16>,
    %c4_i32 = arith.constant 4 : i32
    %243 = arith.addi %2, %c4_i32 : i32
    %c7_i32_75 = arith.constant 7 : i32
    %244 = arith.minsi %243, %c7_i32_75 : i32
    %c2_i32_76 = arith.constant 2 : i32
    %245 = arith.muli %c2_i32_76, %244 : i32
    %c0_77 = arith.constant 0 : index
    %246 = arith.index_cast %245 : i32 to index
    %c0_78 = arith.constant 0 : index
    %c0_79 = arith.constant 0 : index
    %247 = vector.load %arg2[%c0_77, %246, %c0_78, %c0_79] : memref<1x18x9x6xbf16, #tpu.memory_space<vmem>>, vector<1x3x9x6xbf16>
    %248 = vector.shape_cast %247 : vector<1x3x9x6xbf16> to vector<3x9x6xbf16>
    %249 = vector.extract_strided_slice %248 {offsets = [0, 0, 0], sizes = [1, 8, 6], strides = [1, 1, 1]} : vector<3x9x6xbf16> to vector<1x8x6xbf16>
    %250 = vector.shape_cast %249 : vector<1x8x6xbf16> to vector<8x6xbf16>
    %251 = vector.extract_strided_slice %248 {offsets = [0, 1, 0], sizes = [1, 8, 6], strides = [1, 1, 1]} : vector<3x9x6xbf16> to vector<1x8x6xbf16>
    %252 = vector.shape_cast %251 : vector<1x8x6xbf16> to vector<8x6xbf16>
    %253 = vector.extract_strided_slice %0 {offsets = [0, 0, 0], sizes = [1, 6, 16], strides = [1, 1, 1]} : vector<6x6x16xbf16> to vector<1x6x16xbf16>
    %254 = vector.shape_cast %253 : vector<1x6x16xbf16> to vector<6x16xbf16>
    %cst_80 = arith.constant dense<0.000000e+00> : vector<8x16xf32>
    %255 = tpu.matmul %250, %254, %cst_80 {dimension_numbers = #tpu.dot_dimension_numbers<[1], [0], [0], [1], [0, 0, 1, 1], [], []>} : vector<8x6xbf16>, vector<6x16xbf16>, vector<8x16xf32> -> vector<8x16xf32>
    %256 = vector.extract_strided_slice %0 {offsets = [3, 0, 0], sizes = [1, 6, 16], strides = [1, 1, 1]} : vector<6x6x16xbf16> to vector<1x6x16xbf16>
    %257 = vector.shape_cast %256 : vector<1x6x16xbf16> to vector<6x16xbf16>
    %cst_81 = arith.constant dense<0.000000e+00> : vector<8x16xf32>
    %258 = tpu.matmul %252, %257, %cst_81 {dimension_numbers = #tpu.dot_dimension_numbers<[1], [0], [0], [1], [0, 0, 1, 1], [], []>} : vector<8x6xbf16>, vector<6x16xbf16>, vector<8x16xf32> -> vector<8x16xf32>
    %259 = arith.addf %255, %258 : vector<8x16xf32>
    %260 = vector.extract_strided_slice %248 {offsets = [1, 0, 0], sizes = [1, 8, 6], strides = [1, 1, 1]} : vector<3x9x6xbf16> to vector<1x8x6xbf16>
    %261 = vector.shape_cast %260 : vector<1x8x6xbf16> to vector<8x6xbf16>
    %262 = vector.extract_strided_slice %248 {offsets = [1, 1, 0], sizes = [1, 8, 6], strides = [1, 1, 1]} : vector<3x9x6xbf16> to vector<1x8x6xbf16>
    %263 = vector.shape_cast %262 : vector<1x8x6xbf16> to vector<8x6xbf16>
    %264 = vector.extract_strided_slice %0 {offsets = [1, 0, 0], sizes = [1, 6, 16], strides = [1, 1, 1]} : vector<6x6x16xbf16> to vector<1x6x16xbf16>
    %265 = vector.shape_cast %264 : vector<1x6x16xbf16> to vector<6x16xbf16>
    %cst_82 = arith.constant dense<0.000000e+00> : vector<8x16xf32>
    %266 = tpu.matmul %261, %265, %cst_82 {dimension_numbers = #tpu.dot_dimension_numbers<[1], [0], [0], [1], [0, 0, 1, 1], [], []>} : vector<8x6xbf16>, vector<6x16xbf16>, vector<8x16xf32> -> vector<8x16xf32>
    %267 = vector.extract_strided_slice %0 {offsets = [4, 0, 0], sizes = [1, 6, 16], strides = [1, 1, 1]} : vector<6x6x16xbf16> to vector<1x6x16xbf16>
    %268 = vector.shape_cast %267 : vector<1x6x16xbf16> to vector<6x16xbf16>
    %cst_83 = arith.constant dense<0.000000e+00> : vector<8x16xf32>
    %269 = tpu.matmul %263, %268, %cst_83 {dimension_numbers = #tpu.dot_dimension_numbers<[1], [0], [0], [1], [0, 0, 1, 1], [], []>} : vector<8x6xbf16>, vector<6x16xbf16>, vector<8x16xf32> -> vector<8x16xf32>
    %270 = arith.addf %259, %266 : vector<8x16xf32>
    %271 = arith.addf %270, %269 : vector<8x16xf32>
    %272 = vector.extract_strided_slice %248 {offsets = [2, 0, 0], sizes = [1, 8, 6], strides = [1, 1, 1]} : vector<3x9x6xbf16> to vector<1x8x6xbf16>
    %273 = vector.shape_cast %272 : vector<1x8x6xbf16> to vector<8x6xbf16>
    %274 = vector.extract_strided_slice %248 {offsets = [2, 1, 0], sizes = [1, 8, 6], strides = [1, 1, 1]} : vector<3x9x6xbf16> to vector<1x8x6xbf16>
    %275 = vector.shape_cast %274 : vector<1x8x6xbf16> to vector<8x6xbf16>
    %276 = vector.extract_strided_slice %0 {offsets = [2, 0, 0], sizes = [1, 6, 16], strides = [1, 1, 1]} : vector<6x6x16xbf16> to vector<1x6x16xbf16>
    %277 = vector.shape_cast %276 : vector<1x6x16xbf16> to vector<6x16xbf16>
    %cst_84 = arith.constant dense<0.000000e+00> : vector<8x16xf32>
    %278 = tpu.matmul %273, %277, %cst_84 {dimension_numbers = #tpu.dot_dimension_numbers<[1], [0], [0], [1], [0, 0, 1, 1], [], []>} : vector<8x6xbf16>, vector<6x16xbf16>, vector<8x16xf32> -> vector<8x16xf32>
    %279 = vector.extract_strided_slice %0 {offsets = [5, 0, 0], sizes = [1, 6, 16], strides = [1, 1, 1]} : vector<6x6x16xbf16> to vector<1x6x16xbf16>
    %280 = vector.shape_cast %279 : vector<1x6x16xbf16> to vector<6x16xbf16>
    %cst_85 = arith.constant dense<0.000000e+00> : vector<8x16xf32>
    %281 = tpu.matmul %275, %280, %cst_85 {dimension_numbers = #tpu.dot_dimension_numbers<[1], [0], [0], [1], [0, 0, 1, 1], [], []>} : vector<8x6xbf16>, vector<6x16xbf16>, vector<8x16xf32> -> vector<8x16xf32>
    %282 = arith.addf %271, %278 : vector<8x16xf32>
    %283 = arith.addf %282, %281 : vector<8x16xf32>
    %284 = vector.broadcast %1 : vector<1x16xf32> to vector<8x16xf32>
    %285 = arith.addf %283, %284 : vector<8x16xf32>
    %cst_86 = arith.constant 5.000000e-01 : f32
    %286 = vector.broadcast %cst_86 : f32 to vector<8x16xf32>
    %287 = arith.mulf %286, %285 : vector<8x16xf32>
    %288 = arith.mulf %285, %285 : vector<8x16xf32>
    %289 = arith.mulf %288, %285 : vector<8x16xf32>
    %cst_87 = arith.constant 4.471500e-02 : f32
    %290 = vector.broadcast %cst_87 : f32 to vector<8x16xf32>
    %291 = arith.mulf %290, %289 : vector<8x16xf32>
    %292 = arith.addf %285, %291 : vector<8x16xf32>
    %cst_88 = arith.constant 0.797884583 : f32
    %293 = vector.broadcast %cst_88 : f32 to vector<8x16xf32>
    %294 = arith.mulf %293, %292 : vector<8x16xf32>
    %295 = math.tanh %294 : vector<8x16xf32>
    %cst_89 = arith.constant 1.000000e+00 : f32
    %296 = vector.broadcast %cst_89 : f32 to vector<8x16xf32>
    %297 = arith.addf %296, %295 : vector<8x16xf32>
    %298 = arith.mulf %287, %297 : vector<8x16xf32>
    %299 = arith.truncf %298 : vector<8x16xf32> to vector<8x16xbf16>
    %c0_90 = arith.constant 0 : index
    %c4 = arith.constant 4 : index
    %c0_91 = arith.constant 0 : index
    %c0_92 = arith.constant 0 : index
    %300 = vector.load %arg5[%c0_90, %c4, %c0_91, %c0_92] : memref<1x8x8x16xbf16, #tpu.memory_space<vmem>>, vector<1x1x8x16xbf16>
    %301 = vector.shape_cast %300 : vector<1x1x8x16xbf16> to vector<8x16xbf16>
    %302 = vector.shape_cast %299 : vector<8x16xbf16> to vector<1x1x8x16xbf16>
    tpu.vector_store %arg5[%c0_90, %c4, %c0_91, %c0_92], %302 {strides = array<i32>} : memref<1x8x8x16xbf16, #tpu.memory_space<vmem>>, vector<1x1x8x16xbf16>,
    %c5_i32 = arith.constant 5 : i32
    %303 = arith.addi %2, %c5_i32 : i32
    %c7_i32_93 = arith.constant 7 : i32
    %304 = arith.minsi %303, %c7_i32_93 : i32
    %c2_i32_94 = arith.constant 2 : i32
    %305 = arith.muli %c2_i32_94, %304 : i32
    %c0_95 = arith.constant 0 : index
    %306 = arith.index_cast %305 : i32 to index
    %c0_96 = arith.constant 0 : index
    %c0_97 = arith.constant 0 : index
    %307 = vector.load %arg2[%c0_95, %306, %c0_96, %c0_97] : memref<1x18x9x6xbf16, #tpu.memory_space<vmem>>, vector<1x3x9x6xbf16>
    %308 = vector.shape_cast %307 : vector<1x3x9x6xbf16> to vector<3x9x6xbf16>
    %309 = vector.extract_strided_slice %308 {offsets = [0, 0, 0], sizes = [1, 8, 6], strides = [1, 1, 1]} : vector<3x9x6xbf16> to vector<1x8x6xbf16>
    %310 = vector.shape_cast %309 : vector<1x8x6xbf16> to vector<8x6xbf16>
    %311 = vector.extract_strided_slice %308 {offsets = [0, 1, 0], sizes = [1, 8, 6], strides = [1, 1, 1]} : vector<3x9x6xbf16> to vector<1x8x6xbf16>
    %312 = vector.shape_cast %311 : vector<1x8x6xbf16> to vector<8x6xbf16>
    %313 = vector.extract_strided_slice %0 {offsets = [0, 0, 0], sizes = [1, 6, 16], strides = [1, 1, 1]} : vector<6x6x16xbf16> to vector<1x6x16xbf16>
    %314 = vector.shape_cast %313 : vector<1x6x16xbf16> to vector<6x16xbf16>
    %cst_98 = arith.constant dense<0.000000e+00> : vector<8x16xf32>
    %315 = tpu.matmul %310, %314, %cst_98 {dimension_numbers = #tpu.dot_dimension_numbers<[1], [0], [0], [1], [0, 0, 1, 1], [], []>} : vector<8x6xbf16>, vector<6x16xbf16>, vector<8x16xf32> -> vector<8x16xf32>
    %316 = vector.extract_strided_slice %0 {offsets = [3, 0, 0], sizes = [1, 6, 16], strides = [1, 1, 1]} : vector<6x6x16xbf16> to vector<1x6x16xbf16>
    %317 = vector.shape_cast %316 : vector<1x6x16xbf16> to vector<6x16xbf16>
    %cst_99 = arith.constant dense<0.000000e+00> : vector<8x16xf32>
    %318 = tpu.matmul %312, %317, %cst_99 {dimension_numbers = #tpu.dot_dimension_numbers<[1], [0], [0], [1], [0, 0, 1, 1], [], []>} : vector<8x6xbf16>, vector<6x16xbf16>, vector<8x16xf32> -> vector<8x16xf32>
    %319 = arith.addf %315, %318 : vector<8x16xf32>
    %320 = vector.extract_strided_slice %308 {offsets = [1, 0, 0], sizes = [1, 8, 6], strides = [1, 1, 1]} : vector<3x9x6xbf16> to vector<1x8x6xbf16>
    %321 = vector.shape_cast %320 : vector<1x8x6xbf16> to vector<8x6xbf16>
    %322 = vector.extract_strided_slice %308 {offsets = [1, 1, 0], sizes = [1, 8, 6], strides = [1, 1, 1]} : vector<3x9x6xbf16> to vector<1x8x6xbf16>
    %323 = vector.shape_cast %322 : vector<1x8x6xbf16> to vector<8x6xbf16>
    %324 = vector.extract_strided_slice %0 {offsets = [1, 0, 0], sizes = [1, 6, 16], strides = [1, 1, 1]} : vector<6x6x16xbf16> to vector<1x6x16xbf16>
    %325 = vector.shape_cast %324 : vector<1x6x16xbf16> to vector<6x16xbf16>
    %cst_100 = arith.constant dense<0.000000e+00> : vector<8x16xf32>
    %326 = tpu.matmul %321, %325, %cst_100 {dimension_numbers = #tpu.dot_dimension_numbers<[1], [0], [0], [1], [0, 0, 1, 1], [], []>} : vector<8x6xbf16>, vector<6x16xbf16>, vector<8x16xf32> -> vector<8x16xf32>
    %327 = vector.extract_strided_slice %0 {offsets = [4, 0, 0], sizes = [1, 6, 16], strides = [1, 1, 1]} : vector<6x6x16xbf16> to vector<1x6x16xbf16>
    %328 = vector.shape_cast %327 : vector<1x6x16xbf16> to vector<6x16xbf16>
    %cst_101 = arith.constant dense<0.000000e+00> : vector<8x16xf32>
    %329 = tpu.matmul %323, %328, %cst_101 {dimension_numbers = #tpu.dot_dimension_numbers<[1], [0], [0], [1], [0, 0, 1, 1], [], []>} : vector<8x6xbf16>, vector<6x16xbf16>, vector<8x16xf32> -> vector<8x16xf32>
    %330 = arith.addf %319, %326 : vector<8x16xf32>
    %331 = arith.addf %330, %329 : vector<8x16xf32>
    %332 = vector.extract_strided_slice %308 {offsets = [2, 0, 0], sizes = [1, 8, 6], strides = [1, 1, 1]} : vector<3x9x6xbf16> to vector<1x8x6xbf16>
    %333 = vector.shape_cast %332 : vector<1x8x6xbf16> to vector<8x6xbf16>
    %334 = vector.extract_strided_slice %308 {offsets = [2, 1, 0], sizes = [1, 8, 6], strides = [1, 1, 1]} : vector<3x9x6xbf16> to vector<1x8x6xbf16>
    %335 = vector.shape_cast %334 : vector<1x8x6xbf16> to vector<8x6xbf16>
    %336 = vector.extract_strided_slice %0 {offsets = [2, 0, 0], sizes = [1, 6, 16], strides = [1, 1, 1]} : vector<6x6x16xbf16> to vector<1x6x16xbf16>
    %337 = vector.shape_cast %336 : vector<1x6x16xbf16> to vector<6x16xbf16>
    %cst_102 = arith.constant dense<0.000000e+00> : vector<8x16xf32>
    %338 = tpu.matmul %333, %337, %cst_102 {dimension_numbers = #tpu.dot_dimension_numbers<[1], [0], [0], [1], [0, 0, 1, 1], [], []>} : vector<8x6xbf16>, vector<6x16xbf16>, vector<8x16xf32> -> vector<8x16xf32>
    %339 = vector.extract_strided_slice %0 {offsets = [5, 0, 0], sizes = [1, 6, 16], strides = [1, 1, 1]} : vector<6x6x16xbf16> to vector<1x6x16xbf16>
    %340 = vector.shape_cast %339 : vector<1x6x16xbf16> to vector<6x16xbf16>
    %cst_103 = arith.constant dense<0.000000e+00> : vector<8x16xf32>
    %341 = tpu.matmul %335, %340, %cst_103 {dimension_numbers = #tpu.dot_dimension_numbers<[1], [0], [0], [1], [0, 0, 1, 1], [], []>} : vector<8x6xbf16>, vector<6x16xbf16>, vector<8x16xf32> -> vector<8x16xf32>
    %342 = arith.addf %331, %338 : vector<8x16xf32>
    %343 = arith.addf %342, %341 : vector<8x16xf32>
    %344 = vector.broadcast %1 : vector<1x16xf32> to vector<8x16xf32>
    %345 = arith.addf %343, %344 : vector<8x16xf32>
    %cst_104 = arith.constant 5.000000e-01 : f32
    %346 = vector.broadcast %cst_104 : f32 to vector<8x16xf32>
    %347 = arith.mulf %346, %345 : vector<8x16xf32>
    %348 = arith.mulf %345, %345 : vector<8x16xf32>
    %349 = arith.mulf %348, %345 : vector<8x16xf32>
    %cst_105 = arith.constant 4.471500e-02 : f32
    %350 = vector.broadcast %cst_105 : f32 to vector<8x16xf32>
    %351 = arith.mulf %350, %349 : vector<8x16xf32>
    %352 = arith.addf %345, %351 : vector<8x16xf32>
    %cst_106 = arith.constant 0.797884583 : f32
    %353 = vector.broadcast %cst_106 : f32 to vector<8x16xf32>
    %354 = arith.mulf %353, %352 : vector<8x16xf32>
    %355 = math.tanh %354 : vector<8x16xf32>
    %cst_107 = arith.constant 1.000000e+00 : f32
    %356 = vector.broadcast %cst_107 : f32 to vector<8x16xf32>
    %357 = arith.addf %356, %355 : vector<8x16xf32>
    %358 = arith.mulf %347, %357 : vector<8x16xf32>
    %359 = arith.truncf %358 : vector<8x16xf32> to vector<8x16xbf16>
    %c0_108 = arith.constant 0 : index
    %c5 = arith.constant 5 : index
    %c0_109 = arith.constant 0 : index
    %c0_110 = arith.constant 0 : index
    %360 = vector.load %arg5[%c0_108, %c5, %c0_109, %c0_110] : memref<1x8x8x16xbf16, #tpu.memory_space<vmem>>, vector<1x1x8x16xbf16>
    %361 = vector.shape_cast %360 : vector<1x1x8x16xbf16> to vector<8x16xbf16>
    %362 = vector.shape_cast %359 : vector<8x16xbf16> to vector<1x1x8x16xbf16>
    tpu.vector_store %arg5[%c0_108, %c5, %c0_109, %c0_110], %362 {strides = array<i32>} : memref<1x8x8x16xbf16, #tpu.memory_space<vmem>>, vector<1x1x8x16xbf16>,
    %c6_i32 = arith.constant 6 : i32
    %363 = arith.addi %2, %c6_i32 : i32
    %c7_i32_111 = arith.constant 7 : i32
    %364 = arith.minsi %363, %c7_i32_111 : i32
    %c2_i32_112 = arith.constant 2 : i32
    %365 = arith.muli %c2_i32_112, %364 : i32
    %c0_113 = arith.constant 0 : index
    %366 = arith.index_cast %365 : i32 to index
    %c0_114 = arith.constant 0 : index
    %c0_115 = arith.constant 0 : index
    %367 = vector.load %arg2[%c0_113, %366, %c0_114, %c0_115] : memref<1x18x9x6xbf16, #tpu.memory_space<vmem>>, vector<1x3x9x6xbf16>
    %368 = vector.shape_cast %367 : vector<1x3x9x6xbf16> to vector<3x9x6xbf16>
    %369 = vector.extract_strided_slice %368 {offsets = [0, 0, 0], sizes = [1, 8, 6], strides = [1, 1, 1]} : vector<3x9x6xbf16> to vector<1x8x6xbf16>
    %370 = vector.shape_cast %369 : vector<1x8x6xbf16> to vector<8x6xbf16>
    %371 = vector.extract_strided_slice %368 {offsets = [0, 1, 0], sizes = [1, 8, 6], strides = [1, 1, 1]} : vector<3x9x6xbf16> to vector<1x8x6xbf16>
    %372 = vector.shape_cast %371 : vector<1x8x6xbf16> to vector<8x6xbf16>
    %373 = vector.extract_strided_slice %0 {offsets = [0, 0, 0], sizes = [1, 6, 16], strides = [1, 1, 1]} : vector<6x6x16xbf16> to vector<1x6x16xbf16>
    %374 = vector.shape_cast %373 : vector<1x6x16xbf16> to vector<6x16xbf16>
    %cst_116 = arith.constant dense<0.000000e+00> : vector<8x16xf32>
    %375 = tpu.matmul %370, %374, %cst_116 {dimension_numbers = #tpu.dot_dimension_numbers<[1], [0], [0], [1], [0, 0, 1, 1], [], []>} : vector<8x6xbf16>, vector<6x16xbf16>, vector<8x16xf32> -> vector<8x16xf32>
    %376 = vector.extract_strided_slice %0 {offsets = [3, 0, 0], sizes = [1, 6, 16], strides = [1, 1, 1]} : vector<6x6x16xbf16> to vector<1x6x16xbf16>
    %377 = vector.shape_cast %376 : vector<1x6x16xbf16> to vector<6x16xbf16>
    %cst_117 = arith.constant dense<0.000000e+00> : vector<8x16xf32>
    %378 = tpu.matmul %372, %377, %cst_117 {dimension_numbers = #tpu.dot_dimension_numbers<[1], [0], [0], [1], [0, 0, 1, 1], [], []>} : vector<8x6xbf16>, vector<6x16xbf16>, vector<8x16xf32> -> vector<8x16xf32>
    %379 = arith.addf %375, %378 : vector<8x16xf32>
    %380 = vector.extract_strided_slice %368 {offsets = [1, 0, 0], sizes = [1, 8, 6], strides = [1, 1, 1]} : vector<3x9x6xbf16> to vector<1x8x6xbf16>
    %381 = vector.shape_cast %380 : vector<1x8x6xbf16> to vector<8x6xbf16>
    %382 = vector.extract_strided_slice %368 {offsets = [1, 1, 0], sizes = [1, 8, 6], strides = [1, 1, 1]} : vector<3x9x6xbf16> to vector<1x8x6xbf16>
    %383 = vector.shape_cast %382 : vector<1x8x6xbf16> to vector<8x6xbf16>
    %384 = vector.extract_strided_slice %0 {offsets = [1, 0, 0], sizes = [1, 6, 16], strides = [1, 1, 1]} : vector<6x6x16xbf16> to vector<1x6x16xbf16>
    %385 = vector.shape_cast %384 : vector<1x6x16xbf16> to vector<6x16xbf16>
    %cst_118 = arith.constant dense<0.000000e+00> : vector<8x16xf32>
    %386 = tpu.matmul %381, %385, %cst_118 {dimension_numbers = #tpu.dot_dimension_numbers<[1], [0], [0], [1], [0, 0, 1, 1], [], []>} : vector<8x6xbf16>, vector<6x16xbf16>, vector<8x16xf32> -> vector<8x16xf32>
    %387 = vector.extract_strided_slice %0 {offsets = [4, 0, 0], sizes = [1, 6, 16], strides = [1, 1, 1]} : vector<6x6x16xbf16> to vector<1x6x16xbf16>
    %388 = vector.shape_cast %387 : vector<1x6x16xbf16> to vector<6x16xbf16>
    %cst_119 = arith.constant dense<0.000000e+00> : vector<8x16xf32>
    %389 = tpu.matmul %383, %388, %cst_119 {dimension_numbers = #tpu.dot_dimension_numbers<[1], [0], [0], [1], [0, 0, 1, 1], [], []>} : vector<8x6xbf16>, vector<6x16xbf16>, vector<8x16xf32> -> vector<8x16xf32>
    %390 = arith.addf %379, %386 : vector<8x16xf32>
    %391 = arith.addf %390, %389 : vector<8x16xf32>
    %392 = vector.extract_strided_slice %368 {offsets = [2, 0, 0], sizes = [1, 8, 6], strides = [1, 1, 1]} : vector<3x9x6xbf16> to vector<1x8x6xbf16>
    %393 = vector.shape_cast %392 : vector<1x8x6xbf16> to vector<8x6xbf16>
    %394 = vector.extract_strided_slice %368 {offsets = [2, 1, 0], sizes = [1, 8, 6], strides = [1, 1, 1]} : vector<3x9x6xbf16> to vector<1x8x6xbf16>
    %395 = vector.shape_cast %394 : vector<1x8x6xbf16> to vector<8x6xbf16>
    %396 = vector.extract_strided_slice %0 {offsets = [2, 0, 0], sizes = [1, 6, 16], strides = [1, 1, 1]} : vector<6x6x16xbf16> to vector<1x6x16xbf16>
    %397 = vector.shape_cast %396 : vector<1x6x16xbf16> to vector<6x16xbf16>
    %cst_120 = arith.constant dense<0.000000e+00> : vector<8x16xf32>
    %398 = tpu.matmul %393, %397, %cst_120 {dimension_numbers = #tpu.dot_dimension_numbers<[1], [0], [0], [1], [0, 0, 1, 1], [], []>} : vector<8x6xbf16>, vector<6x16xbf16>, vector<8x16xf32> -> vector<8x16xf32>
    %399 = vector.extract_strided_slice %0 {offsets = [5, 0, 0], sizes = [1, 6, 16], strides = [1, 1, 1]} : vector<6x6x16xbf16> to vector<1x6x16xbf16>
    %400 = vector.shape_cast %399 : vector<1x6x16xbf16> to vector<6x16xbf16>
    %cst_121 = arith.constant dense<0.000000e+00> : vector<8x16xf32>
    %401 = tpu.matmul %395, %400, %cst_121 {dimension_numbers = #tpu.dot_dimension_numbers<[1], [0], [0], [1], [0, 0, 1, 1], [], []>} : vector<8x6xbf16>, vector<6x16xbf16>, vector<8x16xf32> -> vector<8x16xf32>
    %402 = arith.addf %391, %398 : vector<8x16xf32>
    %403 = arith.addf %402, %401 : vector<8x16xf32>
    %404 = vector.broadcast %1 : vector<1x16xf32> to vector<8x16xf32>
    %405 = arith.addf %403, %404 : vector<8x16xf32>
    %cst_122 = arith.constant 5.000000e-01 : f32
    %406 = vector.broadcast %cst_122 : f32 to vector<8x16xf32>
    %407 = arith.mulf %406, %405 : vector<8x16xf32>
    %408 = arith.mulf %405, %405 : vector<8x16xf32>
    %409 = arith.mulf %408, %405 : vector<8x16xf32>
    %cst_123 = arith.constant 4.471500e-02 : f32
    %410 = vector.broadcast %cst_123 : f32 to vector<8x16xf32>
    %411 = arith.mulf %410, %409 : vector<8x16xf32>
    %412 = arith.addf %405, %411 : vector<8x16xf32>
    %cst_124 = arith.constant 0.797884583 : f32
    %413 = vector.broadcast %cst_124 : f32 to vector<8x16xf32>
    %414 = arith.mulf %413, %412 : vector<8x16xf32>
    %415 = math.tanh %414 : vector<8x16xf32>
    %cst_125 = arith.constant 1.000000e+00 : f32
    %416 = vector.broadcast %cst_125 : f32 to vector<8x16xf32>
    %417 = arith.addf %416, %415 : vector<8x16xf32>
    %418 = arith.mulf %407, %417 : vector<8x16xf32>
    %419 = arith.truncf %418 : vector<8x16xf32> to vector<8x16xbf16>
    %c0_126 = arith.constant 0 : index
    %c6 = arith.constant 6 : index
    %c0_127 = arith.constant 0 : index
    %c0_128 = arith.constant 0 : index
    %420 = vector.load %arg5[%c0_126, %c6, %c0_127, %c0_128] : memref<1x8x8x16xbf16, #tpu.memory_space<vmem>>, vector<1x1x8x16xbf16>
    %421 = vector.shape_cast %420 : vector<1x1x8x16xbf16> to vector<8x16xbf16>
    %422 = vector.shape_cast %419 : vector<8x16xbf16> to vector<1x1x8x16xbf16>
    tpu.vector_store %arg5[%c0_126, %c6, %c0_127, %c0_128], %422 {strides = array<i32>} : memref<1x8x8x16xbf16, #tpu.memory_space<vmem>>, vector<1x1x8x16xbf16>,
    %c7_i32_129 = arith.constant 7 : i32
    %423 = arith.addi %2, %c7_i32_129 : i32
    %c7_i32_130 = arith.constant 7 : i32
    %424 = arith.minsi %423, %c7_i32_130 : i32
    %c2_i32_131 = arith.constant 2 : i32
    %425 = arith.muli %c2_i32_131, %424 : i32
    %c0_132 = arith.constant 0 : index
    %426 = arith.index_cast %425 : i32 to index
    %c0_133 = arith.constant 0 : index
    %c0_134 = arith.constant 0 : index
    %427 = vector.load %arg2[%c0_132, %426, %c0_133, %c0_134] : memref<1x18x9x6xbf16, #tpu.memory_space<vmem>>, vector<1x3x9x6xbf16>
    %428 = vector.shape_cast %427 : vector<1x3x9x6xbf16> to vector<3x9x6xbf16>
    %429 = vector.extract_strided_slice %428 {offsets = [0, 0, 0], sizes = [1, 8, 6], strides = [1, 1, 1]} : vector<3x9x6xbf16> to vector<1x8x6xbf16>
    %430 = vector.shape_cast %429 : vector<1x8x6xbf16> to vector<8x6xbf16>
    %431 = vector.extract_strided_slice %428 {offsets = [0, 1, 0], sizes = [1, 8, 6], strides = [1, 1, 1]} : vector<3x9x6xbf16> to vector<1x8x6xbf16>
    %432 = vector.shape_cast %431 : vector<1x8x6xbf16> to vector<8x6xbf16>
    %433 = vector.extract_strided_slice %0 {offsets = [0, 0, 0], sizes = [1, 6, 16], strides = [1, 1, 1]} : vector<6x6x16xbf16> to vector<1x6x16xbf16>
    %434 = vector.shape_cast %433 : vector<1x6x16xbf16> to vector<6x16xbf16>
    %cst_135 = arith.constant dense<0.000000e+00> : vector<8x16xf32>
    %435 = tpu.matmul %430, %434, %cst_135 {dimension_numbers = #tpu.dot_dimension_numbers<[1], [0], [0], [1], [0, 0, 1, 1], [], []>} : vector<8x6xbf16>, vector<6x16xbf16>, vector<8x16xf32> -> vector<8x16xf32>
    %436 = vector.extract_strided_slice %0 {offsets = [3, 0, 0], sizes = [1, 6, 16], strides = [1, 1, 1]} : vector<6x6x16xbf16> to vector<1x6x16xbf16>
    %437 = vector.shape_cast %436 : vector<1x6x16xbf16> to vector<6x16xbf16>
    %cst_136 = arith.constant dense<0.000000e+00> : vector<8x16xf32>
    %438 = tpu.matmul %432, %437, %cst_136 {dimension_numbers = #tpu.dot_dimension_numbers<[1], [0], [0], [1], [0, 0, 1, 1], [], []>} : vector<8x6xbf16>, vector<6x16xbf16>, vector<8x16xf32> -> vector<8x16xf32>
    %439 = arith.addf %435, %438 : vector<8x16xf32>
    %440 = vector.extract_strided_slice %428 {offsets = [1, 0, 0], sizes = [1, 8, 6], strides = [1, 1, 1]} : vector<3x9x6xbf16> to vector<1x8x6xbf16>
    %441 = vector.shape_cast %440 : vector<1x8x6xbf16> to vector<8x6xbf16>
    %442 = vector.extract_strided_slice %428 {offsets = [1, 1, 0], sizes = [1, 8, 6], strides = [1, 1, 1]} : vector<3x9x6xbf16> to vector<1x8x6xbf16>
    %443 = vector.shape_cast %442 : vector<1x8x6xbf16> to vector<8x6xbf16>
    %444 = vector.extract_strided_slice %0 {offsets = [1, 0, 0], sizes = [1, 6, 16], strides = [1, 1, 1]} : vector<6x6x16xbf16> to vector<1x6x16xbf16>
    %445 = vector.shape_cast %444 : vector<1x6x16xbf16> to vector<6x16xbf16>
    %cst_137 = arith.constant dense<0.000000e+00> : vector<8x16xf32>
    %446 = tpu.matmul %441, %445, %cst_137 {dimension_numbers = #tpu.dot_dimension_numbers<[1], [0], [0], [1], [0, 0, 1, 1], [], []>} : vector<8x6xbf16>, vector<6x16xbf16>, vector<8x16xf32> -> vector<8x16xf32>
    %447 = vector.extract_strided_slice %0 {offsets = [4, 0, 0], sizes = [1, 6, 16], strides = [1, 1, 1]} : vector<6x6x16xbf16> to vector<1x6x16xbf16>
    %448 = vector.shape_cast %447 : vector<1x6x16xbf16> to vector<6x16xbf16>
    %cst_138 = arith.constant dense<0.000000e+00> : vector<8x16xf32>
    %449 = tpu.matmul %443, %448, %cst_138 {dimension_numbers = #tpu.dot_dimension_numbers<[1], [0], [0], [1], [0, 0, 1, 1], [], []>} : vector<8x6xbf16>, vector<6x16xbf16>, vector<8x16xf32> -> vector<8x16xf32>
    %450 = arith.addf %439, %446 : vector<8x16xf32>
    %451 = arith.addf %450, %449 : vector<8x16xf32>
    %452 = vector.extract_strided_slice %428 {offsets = [2, 0, 0], sizes = [1, 8, 6], strides = [1, 1, 1]} : vector<3x9x6xbf16> to vector<1x8x6xbf16>
    %453 = vector.shape_cast %452 : vector<1x8x6xbf16> to vector<8x6xbf16>
    %454 = vector.extract_strided_slice %428 {offsets = [2, 1, 0], sizes = [1, 8, 6], strides = [1, 1, 1]} : vector<3x9x6xbf16> to vector<1x8x6xbf16>
    %455 = vector.shape_cast %454 : vector<1x8x6xbf16> to vector<8x6xbf16>
    %456 = vector.extract_strided_slice %0 {offsets = [2, 0, 0], sizes = [1, 6, 16], strides = [1, 1, 1]} : vector<6x6x16xbf16> to vector<1x6x16xbf16>
    %457 = vector.shape_cast %456 : vector<1x6x16xbf16> to vector<6x16xbf16>
    %cst_139 = arith.constant dense<0.000000e+00> : vector<8x16xf32>
    %458 = tpu.matmul %453, %457, %cst_139 {dimension_numbers = #tpu.dot_dimension_numbers<[1], [0], [0], [1], [0, 0, 1, 1], [], []>} : vector<8x6xbf16>, vector<6x16xbf16>, vector<8x16xf32> -> vector<8x16xf32>
    %459 = vector.extract_strided_slice %0 {offsets = [5, 0, 0], sizes = [1, 6, 16], strides = [1, 1, 1]} : vector<6x6x16xbf16> to vector<1x6x16xbf16>
    %460 = vector.shape_cast %459 : vector<1x6x16xbf16> to vector<6x16xbf16>
    %cst_140 = arith.constant dense<0.000000e+00> : vector<8x16xf32>
    %461 = tpu.matmul %455, %460, %cst_140 {dimension_numbers = #tpu.dot_dimension_numbers<[1], [0], [0], [1], [0, 0, 1, 1], [], []>} : vector<8x6xbf16>, vector<6x16xbf16>, vector<8x16xf32> -> vector<8x16xf32>
    %462 = arith.addf %451, %458 : vector<8x16xf32>
    %463 = arith.addf %462, %461 : vector<8x16xf32>
    %464 = vector.broadcast %1 : vector<1x16xf32> to vector<8x16xf32>
    %465 = arith.addf %463, %464 : vector<8x16xf32>
    %cst_141 = arith.constant 5.000000e-01 : f32
    %466 = vector.broadcast %cst_141 : f32 to vector<8x16xf32>
    %467 = arith.mulf %466, %465 : vector<8x16xf32>
    %468 = arith.mulf %465, %465 : vector<8x16xf32>
    %469 = arith.mulf %468, %465 : vector<8x16xf32>
    %cst_142 = arith.constant 4.471500e-02 : f32
    %470 = vector.broadcast %cst_142 : f32 to vector<8x16xf32>
    %471 = arith.mulf %470, %469 : vector<8x16xf32>
    %472 = arith.addf %465, %471 : vector<8x16xf32>
    %cst_143 = arith.constant 0.797884583 : f32
    %473 = vector.broadcast %cst_143 : f32 to vector<8x16xf32>
    %474 = arith.mulf %473, %472 : vector<8x16xf32>
    %475 = math.tanh %474 : vector<8x16xf32>
    %cst_144 = arith.constant 1.000000e+00 : f32
    %476 = vector.broadcast %cst_144 : f32 to vector<8x16xf32>
    %477 = arith.addf %476, %475 : vector<8x16xf32>
    %478 = arith.mulf %467, %477 : vector<8x16xf32>
    %479 = arith.truncf %478 : vector<8x16xf32> to vector<8x16xbf16>
    %c0_145 = arith.constant 0 : index
    %c7 = arith.constant 7 : index
    %c0_146 = arith.constant 0 : index
    %c0_147 = arith.constant 0 : index
    %480 = vector.load %arg5[%c0_145, %c7, %c0_146, %c0_147] : memref<1x8x8x16xbf16, #tpu.memory_space<vmem>>, vector<1x1x8x16xbf16>
    %481 = vector.shape_cast %480 : vector<1x1x8x16xbf16> to vector<8x16xbf16>
    %482 = vector.shape_cast %479 : vector<8x16xbf16> to vector<1x1x8x16xbf16>
    tpu.vector_store %arg5[%c0_145, %c7, %c0_146, %c0_147], %482 {strides = array<i32>} : memref<1x8x8x16xbf16, #tpu.memory_space<vmem>>, vector<1x1x8x16xbf16>,
    return
  }
  func.func @transform_0(%arg0: i32, %arg1: i32) -> (i32, i32, i32, i32) {
    %c0_i32 = arith.constant 0 : i32
    %c0_i32_0 = arith.constant 0 : i32
    %c0_i32_1 = arith.constant 0 : i32
    %c0_i32_2 = arith.constant 0 : i32
    return %arg0, %c0_i32, %c0_i32_0, %c0_i32_1 : i32, i32, i32, i32
  }
  func.func @transform_1(%arg0: i32, %arg1: i32) -> (i32, i32, i32) {
    %c0_i32 = arith.constant 0 : i32
    %c0_i32_0 = arith.constant 0 : i32
    %c0_i32_1 = arith.constant 0 : i32
    %c0_i32_2 = arith.constant 0 : i32
    return %c0_i32, %c0_i32_0, %c0_i32_1 : i32, i32, i32
  }
  func.func @transform_2(%arg0: i32, %arg1: i32) -> (i32, i32) {
    %c0_i32 = arith.constant 0 : i32
    %c0_i32_0 = arith.constant 0 : i32
    %c0_i32_1 = arith.constant 0 : i32
    return %c0_i32, %c0_i32_0 : i32, i32
  }
  func.func @transform_3(%arg0: i32, %arg1: i32) -> (i32, i32, i32, i32) {
    %c0_i32 = arith.constant 0 : i32
    %c0_i32_0 = arith.constant 0 : i32
    %c0_i32_1 = arith.constant 0 : i32
    return %arg0, %arg1, %c0_i32, %c0_i32_0 : i32, i32, i32, i32
  }
}

</mosaic_0001>

<bundles_post_ra>
// kernel: _po_patch_embed_impl.3
= control target key start
LH: loop header
LB: loop body
LE: loop exit
PB: predicated region body
PF: predicated region fallthrough
CT: control target
= control target key end

     0   :  { %s2081_s12 = smov 0   ;;  %s2083_s13 = smov 0   ;;  %s2379_s0 = inlined_call_operand.vmem [shape: bf16[2,10,5,32], index: 0, kind: input, shape index: {}]   ;;  %s2380_s1 = inlined_call_operand.vmem [shape: bf16[6,32,32], index: 1, kind: input, shape index: {}]   ;;  %s2381_s2 = inlined_call_operand.vmem [shape: f32[1,32], index: 2, kind: input, shape index: {}]   ;;  %s2382_s3 = inlined_call_operand.vmem [shape: f32[2,4,4,32], index: 3, kind: output, shape index: {}]  }
   0x1   :  { %s2085_s14 = smov 0  }
   0x2 LB: > { %s25_s15 = sadd.s32 1, %s2053_s13  ;;  %p1644_p0 = scmp.ge.s32.totalorder %s2057_s14, 1  ;;  %s2057_s14 = sphi %s2085_s14, %s13_s14   ;;  %s2053_s13 = sphi %s2083_s13, %s2384_s13   ;;  %s2049_s12 = sphi %s2081_s12, %s2383_s12  }
   0x3   : > { %p27_p1 = scmp.ge.s32.totalorder %s25_s15, 2  ;;  %p151_p2 = scmp.lt.s32.totalorder %s2057_s14, 3 }
   0x5   : > { %s2386_s15 = smov (%p27_p1, %s25_s15), 0  ;;  %p152_p3 = pnand %p1644_p0, %p151_p2 }
   0x6   : > { %p179_p4 = scmp.lt.s32.totalorder (!%p152_p3), %s2049_s12, 1 }
   0x7   : > { %155 = sbr.rel (%p152_p3) target bundleno = 342 (0x156), region = 32 }
   0xc   : > { %v2102_v0 = vld [vmem:[%s2380_s1 + $0x8] sm:$0xff]   ;;  %v2059_v1 = vmov 0.0   ;;  %v2109_v2 = vld [vmem:[%s2380_s1 + $0x38] sm:$0xff]   ;;  %v2115_v3 = vld [vmem:[%s2380_s1] sm:$0xff]   ;;  %vm2060_vm0 = vmmov 0   ;;  %s2388_s12 = smov (!%p179_p4, %s2049_s12), 1 }
   0xd   : > { %1792 = vmatprep.subr.bf16.mxu1 %v2059_v1  ;;  %1784 = vmatprep.subr.bf16.mxu0 %v2059_v1  ;;  %v2124_v4 = vld [vmem:[%s2380_s1 + $0x30] sm:$0xff]   ;;  %s1976_s24 = smul.u32 40, %s2388_s12  ;;  %vm251_vm1 = vcmask 261120   ;;  %v2138_v5 = vld [vmem:[%s2380_s1 + $0x48] sm:$0xff]   ;;  %v2153_v10 = vld [vmem:[%s2380_s1 + $0x40] sm:$0xff]   ;;  %s1711_s23 = sshll.u32 %s2388_s12, 4 }
   0xe   : > { %1793 = vmatpush3.bf16.msra.mxu1 %v2102_v0  ;;  %1796 = vmatprep.mubr.msk.bf16.mxu1 %vm2060_vm0, %v2059_v1  ;;  %v2162_v19 = vld [vmem:[%s2380_s1 + $0x18] sm:$0xff]   ;;  %v2177_v26 = vld [vmem:[%s2380_s1 + $0x10] sm:$0xff]   ;;  %v2195_v29 = vld [vmem:[%s2380_s1 + $0x28] sm:$0xff]   ;;  %s2358_s26 = scalar_lea.vmem %s2382_s3, %s1711_s23  ;;  %vm610_vm2 = vcmask 257024  }
   0xf   : > { %1785 = vmatpush3.bf16.msra.mxu0 %v2109_v2  ;;  %1794 = vmatprep.subr.bf16.mxu1 %v2059_v1  ;;  %s2143_s29 = scalar_lea.vmem %s2379_s0, %s1976_s24  ;;  %v2168_v20 = vld [vmem:[%s2380_s1 + $0x58] sm:$0xff]   ;;  %v2183_v27 = vld [vmem:[%s2380_s1 + $0x50] sm:$0xff]   ;;  %v2208_v34 = vld [vmem:[%s2380_s1 + $0x20] sm:$0xff]  }
  0x10   : > { %1786 = vmatprep.subr.bf16.mxu0 %v2059_v1  ;;  %1788 = vmatprep.mubr.msk.bf16.mxu0 %vm2060_vm0, %v2059_v1  ;;  %v226_v6 = vld [vmem:[%s2143_s29] sm:$0x7]  ;;  %v227_v7 = vld [vmem:[%s2143_s29 + $0x4] sm:$0x7]  ;;  %v228_v15 = vld [vmem:[%s2143_s29 + $0x8] sm:$0x7] }
  0x11   : > { %v1648_v8 = vcombine.low %v226_v6, %v226_v6  ;;  %v1658_v9 = vcombine.low %v227_v7, %v227_v7  ;;  %v1665_v18 = vcombine.low %v228_v15, %v228_v15  ;;  %v1670_v30 = vld [vmem:[%s2143_s29 + $0x8] sm:$0x7]  ;;  %v1671_v31 = vld [vmem:[%s2143_s29 + $0xc] sm:$0x7]  ;;  %v1672_v37 = vld [vmem:[%s2143_s29 + $0x10] sm:$0x7] }
  0x12   : > { %1795 = vmatpush3.bf16.msra.mxu1 %v2115_v3  ;;  %v1673_v32 = vcombine.low %v1670_v30, %v1670_v30  ;;  %v1677_v33 = vcombine.low %v1671_v31, %v1671_v31  ;;  %v1680_v38 = vcombine.low %v1672_v37, %v1672_v37  ;;  %v1683_v49 = vld [vmem:[%s2143_s29 + $0x10] sm:$0x7]  ;;  %v1684_v50 = vld [vmem:[%s2143_s29 + $0x14] sm:$0x7]  ;;  %v1685_v55 = vld [vmem:[%s2143_s29 + $0x18] sm:$0x7] }
  0x13   : > { %1787 = vmatpush3.bf16.msra.mxu0 %v2124_v4  ;;  %1808 = vmatprep.subr.bf16.mxu1 %v2059_v1  ;;  %v233_v11 = vshrl.u32 %v1648_v8, 16  ;;  %v235_v12 = vshll.u32 %v1648_v8, 16  ;;  %v409_v13 = vshrl.u32 %v1658_v9, 16  ;;  %v411_v14 = vshll.u32 %v1658_v9, 16  ;;  %v1696_v9 = vld [vmem:[%s2143_s29 + $0x18] sm:$0x7] }
  0x14   : > { %1800 = vmatprep.subr.bf16.mxu0 %v2059_v1  ;;  %v533_v23 = vshll.u32 %v1665_v18, 16  ;;  %v531_v24 = vshrl.u32 %v1665_v18, 16  ;;  %v627_v35 = vshll.u32 %v1673_v32, 16  ;;  %v766_v36 = vshll.u32 %v1677_v33, 16 }
  0x15   : > { %1797 = vmatmul.mubr.msk.bf16.vlgmr.msra.gmra.mxu1 %vm251_vm1, %v226_v6  ;;  %v237_v16 = vrot.slane %v235_v12, 1  ;;  %v413_v17 = vrot.slane %v411_v14, 1  ;;  %v625_v39 = vshrl.u32 %v1673_v32, 16  ;;  %v764_v41 = vshrl.u32 %v1677_v33, 16 }
  0x16   : > { %1809 = vmatpush3.bf16.msra.mxu1 %v2138_v5  ;;  %1812 = vmatprep.mubr.msk.bf16.mxu1 %vm2060_vm0, %v2059_v1  ;;  %v535_v25 = vrot.slane %v533_v23, 1  ;;  %v629_v40 = vrot.slane %v627_v35, 1  ;;  %v768_v42 = vrot.slane %v766_v36, 1  ;;  %v864_v45 = vshll.u32 %v1680_v38, 16 }
  0x17   : > { %1810 = vmatprep.subr.bf16.mxu1 %v2059_v1  ;;  %v238_v21 = vor.u32 %v237_v16, %v233_v11  ;;  %v414_v22 = vor.u32 %v413_v17, %v409_v13  ;;  %v862_v46 = vshrl.u32 %v1680_v38, 16  ;;  %v1686_v51 = vcombine.low %v1683_v49, %v1683_v49  ;;  %v1697_v11 = vld [vmem:[%s2143_s29 + $0x1c] sm:$0x7]  ;;  %v1698_v16 = vld [vmem:[%s2143_s29 + $0x20] sm:$0x7] }
  0x18   : > { %v536_v28 = vor.u32 %v535_v25, %v531_v24  ;;  %v630_v43 = vor.u32 %v629_v40, %v625_v39  ;;  %v769_v44 = vor.u32 %v768_v42, %v764_v41  ;;  %v866_v47 = vrot.slane %v864_v45, 1 }
  0x19   : > { %1789 = vmatmul.mubr.msk.bf16.vlgmr.msra.gmra.mxu0 %vm251_vm1, %v238_v21  ;;  %v1690_v52 = vcombine.low %v1684_v50, %v1684_v50  ;;  %v940_v53 = vshll.u32 %v1686_v51, 16  ;;  %v1693_v56 = vcombine.low %v1685_v55, %v1685_v55  ;;  %v938_v57 = vshrl.u32 %v1686_v51, 16 }
  0x1a   : > { %1811 = vmatpush3.bf16.msra.mxu1 %v2153_v10  ;;  %1801 = vmatpush3.bf16.msra.mxu0 %v2162_v19  ;;  %v867_v48 = vor.u32 %v866_v47, %v862_v46  ;;  %v1699_v12 = vcombine.low %v1696_v9, %v1696_v9  ;;  %v1703_v13 = vcombine.low %v1697_v11, %v1697_v11  ;;  %v2350_v47 = vld [vmem:[%s2381_s2] ss:$0 sm:$0xff] }
  0x1b   : > { %1824 = vmatprep.subr.bf16.mxu1 %v2059_v1  ;;  %1802 = vmatprep.subr.bf16.mxu0 %v2059_v1  ;;  %v1079_v54 = vshll.u32 %v1690_v52, 16  ;;  %v942_v58 = vrot.slane %v940_v53, 1  ;;  %v1077_v59 = vshrl.u32 %v1690_v52, 16  ;;  %v1177_v63 = vshll.u32 %v1693_v56, 16 }
  0x1c   : > { %1804 = vmatprep.mubr.msk.bf16.mxu0 %vm2060_vm0, %v2059_v1  ;;  %v1175_v6 = vshrl.u32 %v1693_v56, 16  ;;  %v1253_v14 = vshll.u32 %v1699_v12, 16  ;;  %v1251_v17 = vshrl.u32 %v1699_v12, 16  ;;  %v1390_v21 = vshrl.u32 %v1703_v13, 16 }
  0x1d   : > { %1813 = vmatmul.mubr.msk.bf16.vlgmr.msra.gmra.mxu1 %vm251_vm1, %v414_v22  ;;  %v1081_v60 = vrot.slane %v1079_v54, 1  ;;  %v943_v61 = vor.u32 %v942_v58, %v938_v57 }
  0x1e   : > { %1825 = vmatpush3.bf16.msra.mxu1 %v2168_v20  ;;  %1828 = vmatprep.mubr.msk.bf16.mxu1 %vm2060_vm0, %v2059_v1  ;;  %v1255_v18 = vrot.slane %v1253_v14, 1 }
  0x1f   : > { %1826 = vmatprep.subr.bf16.mxu1 %v2059_v1  ;;  %1803 = vmatpush3.bf16.msra.mxu0 %v2177_v26  ;;  %v1082_v62 = vor.u32 %v1081_v60, %v1077_v59 }
  0x20   : > { %1816 = vmatprep.subr.bf16.mxu0 %v2059_v1 }
  0x22   : > { %1827 = vmatpush3.bf16.msra.mxu1 %v2183_v27  ;;  %1805 = vmatmul.mubr.msk.bf16.vlgmr.msra.gmra.mxu0 %vm251_vm1, %v227_v7  ;;  %v1179_v7 = vrot.slane %v1177_v63, 1 }
  0x23   : > { %1840 = vmatprep.subr.bf16.mxu1 %v2059_v1  ;;  %1817 = vmatpush3.bf16.msra.mxu0 %v2195_v29 }
  0x24   : > { %1818 = vmatprep.subr.bf16.mxu0 %v2059_v1  ;;  %1820 = vmatprep.mubr.msk.bf16.mxu0 %vm2060_vm0, %v2059_v1  ;;  %v1180_v8 = vor.u32 %v1179_v7, %v1175_v6 }
  0x25   : > { %1829 = vmatmul.mubr.msk.bf16.vlgmr.msra.gmra.mxu1 %vm251_vm1, %v536_v28 }
  0x26   : > { %1841 = vmatpush3.bf16.msra.mxu1 %v2102_v0  ;;  %1844 = vmatprep.mubr.msk.bf16.mxu1 %vm2060_vm0, %v2059_v1 }
  0x27   : > { %1842 = vmatprep.subr.bf16.mxu1 %v2059_v1  ;;  %1819 = vmatpush3.bf16.msra.mxu0 %v2208_v34 }
  0x28   : > { %1832 = vmatprep.subr.bf16.mxu0 %v2059_v1 }
  0x2a   : > { %1843 = vmatpush3.bf16.msra.mxu1 %v2115_v3  ;;  %1821 = vmatmul.mubr.msk.bf16.vlgmr.msra.gmra.mxu0 %vm251_vm1, %v228_v15  ;;  %v1392_v15 = vshll.u32 %v1703_v13, 16 }
  0x2b   : > { %1856 = vmatprep.subr.bf16.mxu1 %v2059_v1  ;;  %1833 = vmatpush3.bf16.msra.mxu0 %v2109_v2 }
  0x2c   : > { %1834 = vmatprep.subr.bf16.mxu0 %v2059_v1  ;;  %1836 = vmatprep.mubr.msk.bf16.mxu0 %vm2060_vm0, %v2059_v1  ;;  %v1394_v22 = vrot.slane %v1392_v15, 1 }
  0x2d   : > { %1845 = vmatmul.mubr.msk.bf16.vlgmr.msra.gmra.mxu1 %vm251_vm1, %v1670_v30 }
  0x2e   : > { %1857 = vmatpush3.bf16.msra.mxu1 %v2138_v5  ;;  %1860 = vmatprep.mubr.msk.bf16.mxu1 %vm2060_vm0, %v2059_v1  ;;  %v1395_v23 = vor.u32 %v1394_v22, %v1390_v21 }
  0x2f   : > { %1858 = vmatprep.subr.bf16.mxu1 %v2059_v1  ;;  %1835 = vmatpush3.bf16.msra.mxu0 %v2124_v4 }
  0x30   : > { %1848 = vmatprep.subr.bf16.mxu0 %v2059_v1 }
  0x32   : > { %1859 = vmatpush3.bf16.msra.mxu1 %v2153_v10  ;;  %1837 = vmatmul.mubr.msk.bf16.vlgmr.msra.gmra.mxu0 %vm251_vm1, %v630_v43 }
  0x33   : > { %1872 = vmatprep.subr.bf16.mxu1 %v2059_v1  ;;  %1849 = vmatpush3.bf16.msra.mxu0 %v2162_v19 }
  0x34   : > { %1850 = vmatprep.subr.bf16.mxu0 %v2059_v1  ;;  %1852 = vmatprep.mubr.msk.bf16.mxu0 %vm2060_vm0, %v2059_v1 }
  0x35   : > { %1861 = vmatmul.mubr.msk.bf16.vlgmr.msra.gmra.mxu1 %vm251_vm1, %v769_v44 }
  0x36   : > { %1873 = vmatpush3.bf16.msra.mxu1 %v2168_v20  ;;  %1876 = vmatprep.mubr.msk.bf16.mxu1 %vm2060_vm0, %v2059_v1 }
  0x37   : > { %1874 = vmatprep.subr.bf16.mxu1 %v2059_v1  ;;  %1851 = vmatpush3.bf16.msra.mxu0 %v2177_v26 }
  0x38   : > { %1864 = vmatprep.subr.bf16.mxu0 %v2059_v1 }
  0x3a   : > { %1875 = vmatpush3.bf16.msra.mxu1 %v2183_v27  ;;  %1853 = vmatmul.mubr.msk.bf16.vlgmr.msra.gmra.mxu0 %vm251_vm1, %v1671_v31 }
  0x3b   : > { %1888 = vmatprep.subr.bf16.mxu1 %v2059_v1  ;;  %1865 = vmatpush3.bf16.msra.mxu0 %v2195_v29 }
  0x3c   : > { %1866 = vmatprep.subr.bf16.mxu0 %v2059_v1  ;;  %1868 = vmatprep.mubr.msk.bf16.mxu0 %vm2060_vm0, %v2059_v1 }
  0x3d   : > { %1877 = vmatmul.mubr.msk.bf16.vlgmr.msra.gmra.mxu1 %vm251_vm1, %v867_v48 }
  0x3e   : > { %1889 = vmatpush3.bf16.msra.mxu1 %v2102_v0  ;;  %1892 = vmatprep.mubr.msk.bf16.mxu1 %vm2060_vm0, %v2059_v1 }
  0x3f   : > { %1890 = vmatprep.subr.bf16.mxu1 %v2059_v1  ;;  %1867 = vmatpush3.bf16.msra.mxu0 %v2208_v34 }
  0x40   : > { %1880 = vmatprep.subr.bf16.mxu0 %v2059_v1 }
  0x42   : > { %1891 = vmatpush3.bf16.msra.mxu1 %v2115_v3  ;;  %1869 = vmatmul.mubr.msk.bf16.vlgmr.msra.gmra.mxu0 %vm251_vm1, %v1672_v37 }
  0x43   : > { %1904 = vmatprep.subr.bf16.mxu1 %v2059_v1  ;;  %1881 = vmatpush3.bf16.msra.mxu0 %v2109_v2 }
  0x44   : > { %1882 = vmatprep.subr.bf16.mxu0 %v2059_v1  ;;  %1884 = vmatprep.mubr.msk.bf16.mxu0 %vm2060_vm0, %v2059_v1 }
  0x45   : > { %1893 = vmatmul.mubr.msk.bf16.vlgmr.msra.gmra.mxu1 %vm251_vm1, %v1683_v49 }
  0x46   : > { %1905 = vmatpush3.bf16.msra.mxu1 %v2138_v5  ;;  %1908 = vmatprep.mubr.msk.bf16.mxu1 %vm2060_vm0, %v2059_v1 }
  0x47   : > { %1906 = vmatprep.subr.bf16.mxu1 %v2059_v1  ;;  %1883 = vmatpush3.bf16.msra.mxu0 %v2124_v4 }
  0x48   : > { %1896 = vmatprep.subr.bf16.mxu0 %v2059_v1 }
  0x4a   : > { %1907 = vmatpush3.bf16.msra.mxu1 %v2153_v10  ;;  %1885 = vmatmul.mubr.msk.bf16.vlgmr.msra.gmra.mxu0 %vm251_vm1, %v943_v61 }
  0x4b   : > { %1920 = vmatprep.subr.bf16.mxu1 %v2059_v1  ;;  %1897 = vmatpush3.bf16.msra.mxu0 %v2162_v19 }
  0x4c   : > { %1898 = vmatprep.subr.bf16.mxu0 %v2059_v1  ;;  %1900 = vmatprep.mubr.msk.bf16.mxu0 %vm2060_vm0, %v2059_v1 }
  0x4d   : > { %1909 = vmatmul.mubr.msk.bf16.vlgmr.msra.gmra.mxu1 %vm251_vm1, %v1082_v62 }
  0x4e   : > { %1921 = vmatpush3.bf16.msra.mxu1 %v2168_v20  ;;  %1924 = vmatprep.mubr.msk.bf16.mxu1 %vm2060_vm0, %v2059_v1 }
  0x4f   : > { %1922 = vmatprep.subr.bf16.mxu1 %v2059_v1  ;;  %1899 = vmatpush3.bf16.msra.mxu0 %v2177_v26 }
  0x50   : > { %1912 = vmatprep.subr.bf16.mxu0 %v2059_v1 }
  0x52   : > { %1923 = vmatpush3.bf16.msra.mxu1 %v2183_v27  ;;  %1901 = vmatmul.mubr.msk.bf16.vlgmr.msra.gmra.mxu0 %vm251_vm1, %v1684_v50 }
  0x53   : > { %1936 = vmatprep.subr.bf16.mxu1 %v2059_v1  ;;  %1913 = vmatpush3.bf16.msra.mxu0 %v2195_v29 }
  0x54   : > { %1914 = vmatprep.subr.bf16.mxu0 %v2059_v1  ;;  %1916 = vmatprep.mubr.msk.bf16.mxu0 %vm2060_vm0, %v2059_v1 }
  0x55   : > { %1925 = vmatmul.mubr.msk.bf16.vlgmr.msra.gmra.mxu1 %vm251_vm1, %v1180_v8 }
  0x56   : > { %1937 = vmatpush3.bf16.msra.mxu1 %v2102_v0  ;;  %1940 = vmatprep.mubr.msk.bf16.mxu1 %vm2060_vm0, %v2059_v1  ;;  %v1706_v0 = vcombine.low %v1698_v16, %v1698_v16 }
  0x57   : > { %1938 = vmatprep.subr.bf16.mxu1 %v2059_v1  ;;  %1915 = vmatpush3.bf16.msra.mxu0 %v2208_v34 }
  0x58   : > { %1928 = vmatprep.subr.bf16.mxu0 %v2059_v1  ;;  %v1490_v24 = vshll.u32 %v1706_v0, 16 }
  0x5a   : > { %1939 = vmatpush3.bf16.msra.mxu1 %v2115_v3  ;;  %1917 = vmatmul.mubr.msk.bf16.vlgmr.msra.gmra.mxu0 %vm251_vm1, %v1685_v55  ;;  %v1256_v3 = vor.u32 %v1255_v18, %v1251_v17 }
  0x5b   : > { %1952 = vmatprep.subr.bf16.mxu1 %v2059_v1  ;;  %1929 = vmatpush3.bf16.msra.mxu0 %v2109_v2  ;;  %v1488_v2 = vshrl.u32 %v1706_v0, 16 }
  0x5c   : > { %1930 = vmatprep.subr.bf16.mxu0 %v2059_v1  ;;  %1932 = vmatprep.mubr.msk.bf16.mxu0 %vm2060_vm0, %v2059_v1 }
  0x5d   : > { %1941 = vmatmul.mubr.msk.bf16.vlgmr.msra.gmra.mxu1 %vm251_vm1, %v1696_v9 }
  0x5e   : > { %1953 = vmatpush3.bf16.msra.mxu1 %v2138_v5  ;;  %1956 = vmatprep.mubr.msk.bf16.mxu1 %vm2060_vm0, %v2059_v1  ;;  %v1492_v5 = vrot.slane %v1490_v24, 1 }
  0x5f   : > { %1954 = vmatprep.subr.bf16.mxu1 %v2059_v1  ;;  %1931 = vmatpush3.bf16.msra.mxu0 %v2124_v4 }
  0x60   : > { %1944 = vmatprep.subr.bf16.mxu0 %v2059_v1  ;;  %v1493_v4 = vor.u32 %v1492_v5, %v1488_v2 }
  0x62   : > { %1955 = vmatpush3.bf16.msra.mxu1 %v2153_v10  ;;  %1933 = vmatmul.mubr.msk.bf16.vlgmr.msra.gmra.mxu0 %vm251_vm1, %v1256_v3 }
  0x63   : > { %1968 = vmatprep.subr.bf16.mxu1 %v2059_v1  ;;  %1945 = vmatpush3.bf16.msra.mxu0 %v2162_v19 }
  0x64   : > { %1946 = vmatprep.subr.bf16.mxu0 %v2059_v1  ;;  %1948 = vmatprep.mubr.msk.bf16.mxu0 %vm2060_vm0, %v2059_v1 }
  0x65   : > { %1957 = vmatmul.mubr.msk.bf16.vlgmr.msra.gmra.mxu1 %vm251_vm1, %v1395_v23 }
  0x66   : > { %1969 = vmatpush3.bf16.msra.mxu1 %v2168_v20  ;;  %1972 = vmatprep.mubr.msk.bf16.mxu1 %vm2060_vm0, %v2059_v1 }
  0x67   : > { %1970 = vmatprep.subr.bf16.mxu1 %v2059_v1  ;;  %1947 = vmatpush3.bf16.msra.mxu0 %v2177_v26 }
  0x68   : > { %1960 = vmatprep.subr.bf16.mxu0 %v2059_v1 }
  0x6a   : > { %1971 = vmatpush3.bf16.msra.mxu1 %v2183_v27  ;;  %1949 = vmatmul.mubr.msk.bf16.vlgmr.msra.gmra.mxu0 %vm251_vm1, %v1697_v11 }
  0x6b   : > { %1961 = vmatpush3.bf16.msra.mxu0 %v2195_v29  ;;  %1964 = vmatprep.mubr.msk.bf16.mxu0 %vm2060_vm0, %v2059_v1 }
  0x6c   : > { %1962 = vmatprep.subr.bf16.mxu0 %v2059_v1 }
  0x6d   : > { %1973 = vmatmul.mubr.msk.bf16.vlgmr.msra.gmra.mxu1 %vm251_vm1, %v1493_v4 }
  0x6f   : > { %1963 = vmatpush3.bf16.msra.mxu0 %v2208_v34 }
  0x72   : > { %1965 = vmatmul.mubr.msk.bf16.vlgmr.msra.gmra.mxu0 %vm251_vm1, %v1698_v16 }
  0xd5   : > { %v344_v10 = vpop.f32.mrf.mxu1 }
  0xd7   : > { %v1798_v19 = vpop.f32.mrf.mxu1 }
  0xd9   : > { %v347_v20 = vpop.f32.mrf.mxu1  ;;  %v289_v26 = vpop.f32.mrf.mxu0 }
  0xda   : > { %v345_v37 = vadd.f32 %v344_v10, %v289_v26 }
  0xdb   : > { %v1799_v25 = vpop.f32.mrf.mxu1  ;;  %v1790_v28 = vpop.f32.mrf.mxu0 }
  0xdd   : > { %v464_v27 = vpop.f32.mrf.mxu1  ;;  %v292_v31 = vpop.f32.mrf.mxu0 }
  0xdf   : > { %v1814_v30 = vpop.f32.mrf.mxu1  ;;  %v1791_v29 = vpop.f32.mrf.mxu0 }
  0xe1   : > { %v467_v32 = vpop.f32.mrf.mxu1 }
  0xe2   : > { %v399_v35 = vpop.f32.mrf.mxu0 }
  0xe3   : > { %v1815_v33 = vpop.f32.mrf.mxu1  ;;  %v470_v34 = vadd.f32 %v399_v35, %v345_v37 }
  0xe4   : > { %v1806_v1 = vpop.f32.mrf.mxu0 }
  0xe5   : > { %v586_v36 = vpop.f32.mrf.mxu1  ;;  %v471_v43 = vadd.f32 %v470_v34, %v464_v27 }
  0xe6   : > { %v402_v39 = vpop.f32.mrf.mxu0 }
  0xe7   : > { %v1830_v38 = vpop.f32.mrf.mxu1 }
  0xe8   : > { %v1807_v41 = vpop.f32.mrf.mxu0 }
  0xe9   : > { %v589_v40 = vpop.f32.mrf.mxu1 }
  0xea   : > { %v521_v44 = vpop.f32.mrf.mxu0 }
  0xeb   : > { %v1831_v42 = vpop.f32.mrf.mxu1  ;;  %v592_v46 = vadd.f32 %v521_v44, %v471_v43 }
  0xec   : > { %v1822_v48 = vpop.f32.mrf.mxu0 }
  0xed   : > { %v711_v45 = vpop.f32.mrf.mxu1  ;;  %v593_v50 = vadd.f32 %v592_v46, %v586_v36 }
  0xee   : > { %v524_v51 = vpop.f32.mrf.mxu0 }
  0xef   : > { %v1846_v49 = vpop.f32.mrf.mxu1  ;;  %v600_v53 = vadd.f32 %v2350_v47, %v593_v50 }
  0xf0   : > { %v1823_v54 = vpop.f32.mrf.mxu0 }
  0xf1   : > { %v714_v52 = vpop.f32.mrf.mxu1  ;;  %v602_v56 = vmul.f32 %v600_v53, %v600_v53  ;;  %v601_v30 = vmul.f32 0.5, %v600_v53 }
  0xf2   : > { %v668_v57 = vpop.f32.mrf.mxu0 }
  0xf3   : > { %v1847_v55 = vpop.f32.mrf.mxu1  ;;  %v603_v59 = vmul.f32 %v602_v56, %v600_v53  ;;  %v712_v14 = vadd.f32 %v711_v45, %v668_v57 }
  0xf4   : > { %v1838_v60 = vpop.f32.mrf.mxu0 }
  0xf5   : > { %v807_v58 = vpop.f32.mrf.mxu1  ;;  %v604_v62 = vmul.f32 0.044715, %v603_v59 }
  0xf6   : > { %v671_v63 = vpop.f32.mrf.mxu0 }
  0xf7   : > { %v1862_v61 = vpop.f32.mrf.mxu1  ;;  %v605_v7 = vadd.f32 %v604_v62, %v600_v53 }
  0xf8   : > { %v1839_v8 = vpop.f32.mrf.mxu0 }
  0xf9   : > { %v810_v6 = vpop.f32.mrf.mxu1  ;;  %v606_v11 = vmul.f32 0.7978846, %v605_v7 }
  0xfa   : > { %v754_v12 = vpop.f32.mrf.mxu0 }
  0xfb   : > { %v1863_v9 = vpop.f32.mrf.mxu1  ;;  %2027 = vtanh.f32 %v606_v11  ;;  %v813_v0 = vadd.f32 %v754_v12, %v712_v14 }
  0xfc   : > { %v1854_v15 = vpop.f32.mrf.mxu0 }
  0xfd   : > { %v905_v13 = vpop.f32.mrf.mxu1  ;;  %v814_v3 = vadd.f32 %v813_v0, %v807_v58 }
  0xfe   : > { %v757_v17 = vpop.f32.mrf.mxu0 }
  0xff   : > { %v1878_v16 = vpop.f32.mrf.mxu1 }
 0x100   : > { %v1855_v21 = vpop.f32.mrf.mxu0 }
 0x101   : > { %v908_v18 = vpop.f32.mrf.mxu1 }
 0x102   : > { %v852_v23 = vpop.f32.mrf.mxu0 }
 0x103   : > { %v1879_v22 = vpop.f32.mrf.mxu1  ;;  %v911_v2 = vadd.f32 %v852_v23, %v814_v3 }
 0x104   : > { %v1870_v5 = vpop.f32.mrf.mxu0 }
 0x105   : > { %v1024_v24 = vpop.f32.mrf.mxu1  ;;  %v912_v10 = vadd.f32 %v911_v2, %v905_v13 }
 0x106   : > { %v855_v19 = vpop.f32.mrf.mxu0 }
 0x107   : > { %v1894_v4 = vpop.f32.mrf.mxu1  ;;  %v913_v25 = vadd.f32 %v2350_v47, %v912_v10 }
 0x108   : > { %v2028_v26 = vpop.eup %2027  ;;  %v1871_v27 = vpop.f32.mrf.mxu0 }
 0x109   : > { %v1027_v20 = vpop.f32.mrf.mxu1  ;;  %v608_v31 = vadd.f32 1.0, %v2028_v26  ;;  %v915_v32 = vmul.f32 %v913_v25, %v913_v25  ;;  %v914_v11 = vmul.f32 0.5, %v913_v25 }
 0x10a   : > { %v981_v29 = vpop.f32.mrf.mxu0 }
 0x10b   : > { %v1895_v28 = vpop.f32.mrf.mxu1  ;;  %v609_v35 = vmul.f32 %v608_v31, %v601_v30  ;;  %v916_v36 = vmul.f32 %v915_v32, %v913_v25  ;;  %v1025_v46 = vadd.f32 %v1024_v24, %v981_v29 }
 0x10c   : > { %v1886_v37 = vpop.f32.mrf.mxu0 }
 0x10d   : > { %v1120_v33 = vpop.f32.mrf.mxu1  ;;  %611 = vst.msk [vmem:[%s2358_s26] sm:$0xf] %vm610_vm2, %v609_v35  ;;  %v917_v38 = vmul.f32 0.044715, %v916_v36 }
 0x10e   : > { %v984_v34 = vpop.f32.mrf.mxu0 }
 0x10f   : > { %v1910_v1 = vpop.f32.mrf.mxu1  ;;  %v918_v40 = vadd.f32 %v917_v38, %v913_v25 }
 0x110   : > { %v1887_v41 = vpop.f32.mrf.mxu0 }
 0x111   : > { %v1123_v39 = vpop.f32.mrf.mxu1  ;;  %v919_v43 = vmul.f32 0.7978846, %v918_v40 }
 0x112   : > { %v1067_v44 = vpop.f32.mrf.mxu0 }
 0x113   : > { %v1911_v42 = vpop.f32.mrf.mxu1  ;;  %2029 = vtanh.f32 %v919_v43  ;;  %v1126_v50 = vadd.f32 %v1067_v44, %v1025_v46 }
 0x114   : > { %v1902_v48 = vpop.f32.mrf.mxu0 }
 0x115   : > { %v1218_v45 = vpop.f32.mrf.mxu1  ;;  %v1127_v55 = vadd.f32 %v1126_v50, %v1120_v33 }
 0x116   : > { %v1070_v51 = vpop.f32.mrf.mxu0 }
 0x117   : > { %v1926_v49 = vpop.f32.mrf.mxu1 }
 0x118   : > { %v1903_v53 = vpop.f32.mrf.mxu0 }
 0x119   : > { %v1221_v52 = vpop.f32.mrf.mxu1 }
 0x11a   : > { %v1165_v56 = vpop.f32.mrf.mxu0 }
 0x11b   : > { %v1927_v54 = vpop.f32.mrf.mxu1  ;;  %v1224_v58 = vadd.f32 %v1165_v56, %v1127_v55 }
 0x11c   : > { %v1918_v59 = vpop.f32.mrf.mxu0 }
 0x11d   : > { %v1337_v57 = vpop.f32.mrf.mxu1  ;;  %v1225_v61 = vadd.f32 %v1224_v58, %v1218_v45 }
 0x11e   : > { %v1168_v62 = vpop.f32.mrf.mxu0 }
 0x11f   : > { %v1942_v60 = vpop.f32.mrf.mxu1  ;;  %v1226_v6 = vadd.f32 %v2350_v47, %v1225_v61 }
 0x120   : > { %v2030_v7 = vpop.eup %2029  ;;  %v1919_v8 = vpop.f32.mrf.mxu0 }
 0x121   : > { %v1340_v63 = vpop.f32.mrf.mxu1  ;;  %v921_v12 = vadd.f32 1.0, %v2030_v7  ;;  %v1228_v13 = vmul.f32 %v1226_v6, %v1226_v6  ;;  %v1227_v39 = vmul.f32 0.5, %v1226_v6 }
 0x122   : > { %v1294_v14 = vpop.f32.mrf.mxu0 }
 0x123   : > { %v1943_v9 = vpop.f32.mrf.mxu1  ;;  %v922_v16 = vmul.f32 %v921_v12, %v914_v11  ;;  %v1229_v0 = vmul.f32 %v1228_v13, %v1226_v6  ;;  %v1338_v19 = vadd.f32 %v1337_v57, %v1294_v14 }
 0x124   : > { %v1934_v17 = vpop.f32.mrf.mxu0 }
 0x125   : > { %v1433_v15 = vpop.f32.mrf.mxu1  ;;  %1682 = vst.msk [vmem:[%s2358_s26 + $0x4] sm:$0xf] %vm610_vm2, %v922_v16  ;;  %v1230_v21 = vmul.f32 0.044715, %v1229_v0 }
 0x126   : > { %v1297_v22 = vpop.f32.mrf.mxu0 }
 0x127   : > { %v1958_v18 = vpop.f32.mrf.mxu1  ;;  %v1231_v23 = vadd.f32 %v1230_v21, %v1226_v6 }
 0x128   : > { %v1935_v24 = vpop.f32.mrf.mxu0 }
 0x129   : > { %v1436_v3 = vpop.f32.mrf.mxu1  ;;  %v1232_v5 = vmul.f32 0.7978846, %v1231_v23 }
 0x12a   : > { %v1380_v4 = vpop.f32.mrf.mxu0 }
 0x12b   : > { %v1959_v2 = vpop.f32.mrf.mxu1  ;;  %2031 = vtanh.f32 %v1232_v5  ;;  %v1439_v26 = vadd.f32 %v1380_v4, %v1338_v19 }
 0x12c   : > { %v1950_v20 = vpop.f32.mrf.mxu0 }
 0x12d   : > { %v1531_v10 = vpop.f32.mrf.mxu1  ;;  %v1440_v32 = vadd.f32 %v1439_v26, %v1433_v15 }
 0x12e   : > { %v1383_v27 = vpop.f32.mrf.mxu0 }
 0x12f   : > { %v1974_v25 = vpop.f32.mrf.mxu1 }
 0x130   : > { %v1951_v30 = vpop.f32.mrf.mxu0 }
 0x131   : > { %v1534_v28 = vpop.f32.mrf.mxu1 }
 0x132   : > { %v1478_v29 = vpop.f32.mrf.mxu0 }
 0x133   : > { %v1975_v31 = vpop.f32.mrf.mxu1  ;;  %v1537_v33 = vadd.f32 %v1478_v29, %v1440_v32 }
 0x134   : > { %v1966_v35 = vpop.f32.mrf.mxu0 }
 0x135   : > { %v1538_v36 = vadd.f32 %v1537_v33, %v1531_v10 }
 0x136   : > { %v1481_v37 = vpop.f32.mrf.mxu0 }
 0x137   : > { %v1539_v1 = vadd.f32 %v2350_v47, %v1538_v36 }
 0x138   : > { %v2032_v38 = vpop.eup %2031  ;;  %v1967_v34 = vpop.f32.mrf.mxu0 }
 0x139   : > { %v1234_v40 = vadd.f32 1.0, %v2032_v38  ;;  %v1541_v41 = vmul.f32 %v1539_v1, %v1539_v1  ;;  %v1540_v49 = vmul.f32 0.5, %v1539_v1 }
 0x13b   : > { %v1235_v42 = vmul.f32 %v1234_v40, %v1227_v39  ;;  %v1542_v43 = vmul.f32 %v1541_v41, %v1539_v1 }
 0x13d   : > { %1695 = vst.msk [vmem:[%s2358_s26 + $0x8] sm:$0xf] %vm610_vm2, %v1235_v42  ;;  %v1543_v44 = vmul.f32 0.044715, %v1542_v43 }
 0x13f   : > { %v1544_v45 = vadd.f32 %v1543_v44, %v1539_v1 }
 0x141   : > { %v1545_v46 = vmul.f32 0.7978846, %v1544_v45 }
 0x143   : > { %2033 = vtanh.f32 %v1545_v46 }
 0x150   : > { %v2034_v48 = vpop.eup %2033 }
 0x151   : > { %v1547_v50 = vadd.f32 1.0, %v2034_v48 }
 0x153   : > { %v1548_v51 = vmul.f32 %v1547_v50, %v1540_v49 }
 0x155   : > { %1708 = vst.msk [vmem:[%s2358_s26 + $0xc] sm:$0xf] %vm610_vm2, %v1548_v51 }
 0x156 PF: > { %s13_s14 = sadd.s32 1, %s2057_s14   ;;  %s2383_s12 = smov %s2053_s13 }
 0x157   : > { %p10_p5 = scmp.ge.s32.totalorder %s13_s14, 4   ;;  %s2384_s13 = smov %s2386_s15 }
 0x159   :  { %12 = sbr.rel (!%p10_p5) target bundleno = 2 (0x2), region = 69 }

// kernel: _po_patch_embed_impl.2
= control target key start
LH: loop header
LB: loop body
LE: loop exit
PB: predicated region body
PF: predicated region fallthrough
CT: control target
= control target key end

     0   :  { %s3547_s12 = smov 0   ;;  %s3549_s13 = smov 0   ;;  %s3941_s0 = inlined_call_operand.vmem [shape: bf16[2,18,9,6], index: 0, kind: input, shape index: {}]   ;;  %s3942_s1 = inlined_call_operand.vmem [shape: bf16[6,6,16], index: 1, kind: input, shape index: {}]   ;;  %s3943_s2 = inlined_call_operand.vmem [shape: f32[1,16], index: 2, kind: input, shape index: {}]   ;;  %s3944_s3 = inlined_call_operand.vmem [shape: bf16[2,8,8,16], index: 3, kind: output, shape index: {}]  }
   0x1   :  { %s3551_s14 = smov 0  }
   0x2 LB: > { %s25_s15 = sadd.s32 1, %s3519_s13  ;;  %p2921_p0 = scmp.ge.s32.totalorder %s3523_s14, 1  ;;  %s3523_s14 = sphi %s3551_s14, %s13_s14   ;;  %s3519_s13 = sphi %s3549_s13, %s3946_s13   ;;  %s3515_s12 = sphi %s3547_s12, %s3945_s12  }
   0x3   : > { %p27_p1 = scmp.ge.s32.totalorder %s25_s15, 2  ;;  %p151_p2 = scmp.lt.s32.totalorder %s3523_s14, 3 }
   0x5   : > { %s3948_s15 = smov (%p27_p1, %s25_s15), 0  ;;  %p152_p3 = pnand %p2921_p0, %p151_p2 }
   0x6   : > { %p179_p4 = scmp.lt.s32.totalorder (!%p152_p3), %s3515_s12, 1 }
   0x7   : > { %155 = sbr.rel (%p152_p3) target bundleno = 440 (0x1b8), region = 32 }
   0xc   : > { %v195_v0 = vld [vmem:[%s3942_s1] sm:$0x7]  ;;  %vm231_vm0 = vcmask 1042432   ;;  %v3525_v1 = vmov 0.0   ;;  %v198_v3 = vld [vmem:[%s3942_s1 + $0xc] sm:$0x7] }
   0xd   : > { %3152 = vmatprep.subr.bf16.mxu1 %v3525_v1  ;;  %v3570_v2 = vsel %vm231_vm0, %v195_v0, 0  ;;  %3146 = vmatprep.subr.bf16.mxu0 %v3525_v1  ;;  %vm3526_vm1 = vmmov 0   ;;  %v3580_v4 = vsel %vm231_vm0, %v198_v3, 0  ;;  %s3950_s12 = smov (!%p179_p4, %s3515_s12), 1  ;;  %v199_v5 = vld [vmem:[%s3942_s1 + $0x10] sm:$0x7] }
   0xe   : > { %3153 = vmatpush3.bf16.msra.mxu1 %v3570_v2  ;;  %3154 = vmatprep.mubr.msk.bf16.mxu1 %vm3526_vm1, %v3525_v1  ;;  %s3434_s22 = smul.u32 144, %s3950_s12  ;;  %vm227_vm2 = vcmask 48128   ;;  %v3599_v6 = vsel %vm231_vm0, %v199_v5, 0  ;;  %v196_v18 = vld [vmem:[%s3942_s1 + $0x4] sm:$0x7]  ;;  %s3049_s7 = sshll.u32 %s3950_s12, 5 }
   0xf   : > { %3147 = vmatpush3.bf16.msra.mxu0 %v3580_v4  ;;  %3148 = vmatprep.mubr.msk.bf16.mxu0 %vm3526_vm1, %v3525_v1  ;;  %v200_v23 = vld [vmem:[%s3942_s1 + $0x14] sm:$0x7]  ;;  %v3619_v26 = vsel %vm231_vm0, %v196_v18, 0  ;;  %v197_v31 = vld [vmem:[%s3942_s1 + $0x8] sm:$0x7]  ;;  %s3908_s10 = scalar_lea.vmem %s3944_s3, %s3049_s7  ;;  %vm550_vm3 = vcmask 125952  }
  0x10   : > { %3158 = vmatprep.subr.bf16.mxu0 %v3525_v1  ;;  %3164 = vmatprep.subr.bf16.mxu1 %v3525_v1  ;;  %s3596_s25 = scalar_lea.vmem %s3941_s0, %s3434_s22  ;;  %v3623_v28 = vsel %vm231_vm0, %v200_v23, 0  ;;  %v3640_v35 = vsel %vm231_vm0, %v197_v31, 0 }
  0x11   : > { %v209_v7 = vld [vmem:[%s3596_s25] sm:$0xf]  ;;  %v210_v8 = vld [vmem:[%s3596_s25 + $0x4] sm:$0x1]  ;;  %v211_v9 = vld [vmem:[%s3596_s25 + $0x8] sm:$0xf] }
  0x12   : > { %v2925_v10 = vcombine.low %v209_v7, %v210_v8  ;;  %3155 = vmatmul.mubr.msk.bf16.vlgmr.msra.gmra.mxu1 %vm227_vm2, %v209_v7  ;;  %v212_v11 = vld [vmem:[%s3596_s25 + $0xc] sm:$0x1]  ;;  %v213_v12 = vld [vmem:[%s3596_s25 + $0x10] sm:$0xf]  ;;  %v214_v13 = vld [vmem:[%s3596_s25 + $0x14] sm:$0x1] }
  0x13   : > { %3165 = vmatpush3.bf16.msra.mxu1 %v3599_v6  ;;  %3166 = vmatprep.mubr.msk.bf16.mxu1 %vm3526_vm1, %v3525_v1  ;;  %v2929_v14 = vcombine.low %v211_v9, %v212_v11  ;;  %v2932_v15 = vcombine.low %v213_v12, %v214_v13  ;;  %v2935_v33 = vld [vmem:[%s3596_s25 + $0x10] sm:$0xf]  ;;  %v2936_v34 = vld [vmem:[%s3596_s25 + $0x14] sm:$0x1]  ;;  %v2937_v36 = vld [vmem:[%s3596_s25 + $0x18] sm:$0xf] }
  0x14   : > { %v221_v16 = vshrl.u32 %v2925_v10, 16  ;;  %v223_v17 = vshll.u32 %v2925_v10, 16  ;;  %3176 = vmatprep.subr.bf16.mxu1 %v3525_v1  ;;  %v2938_v37 = vld [vmem:[%s3596_s25 + $0x1c] sm:$0x1]  ;;  %v2941_v38 = vcombine.low %v2935_v33, %v2936_v34  ;;  %v2939_v42 = vld [vmem:[%s3596_s25 + $0x20] sm:$0xf] }
  0x15   : > { %v373_v19 = vshrl.u32 %v2929_v14, 16  ;;  %v375_v20 = vshll.u32 %v2929_v14, 16  ;;  %v481_v24 = vshll.u32 %v2932_v15, 16  ;;  %v479_v29 = vshrl.u32 %v2932_v15, 16  ;;  %v2940_v43 = vld [vmem:[%s3596_s25 + $0x24] sm:$0x1] }
  0x16   : > { %v225_v21 = vrot.slane %v223_v17, 1  ;;  %v2945_v39 = vcombine.low %v2937_v36, %v2938_v37  ;;  %v573_v40 = vshll.u32 %v2941_v38, 16  ;;  %v571_v44 = vshrl.u32 %v2941_v38, 16  ;;  %v2951_v55 = vld [vmem:[%s3596_s25 + $0x20] sm:$0xf] }
  0x17   : > { %v377_v22 = vrot.slane %v375_v20, 1  ;;  %v483_v30 = vrot.slane %v481_v24, 1  ;;  %v2948_v48 = vcombine.low %v2939_v42, %v2940_v43  ;;  %v2952_v56 = vld [vmem:[%s3596_s25 + $0x24] sm:$0x1]  ;;  %v2953_v57 = vld [vmem:[%s3596_s25 + $0x28] sm:$0xf] }
  0x18   : > { %v226_v25 = vor.u32 %v225_v21, %v221_v16  ;;  %v714_v41 = vshll.u32 %v2945_v39, 16  ;;  %v575_v45 = vrot.slane %v573_v40, 1  ;;  %v712_v46 = vshrl.u32 %v2945_v39, 16  ;;  %v2954_v58 = vld [vmem:[%s3596_s25 + $0x2c] sm:$0x1] }
  0x19   : > { %v378_v27 = vor.u32 %v377_v22, %v373_v19  ;;  %v484_v32 = vor.u32 %v483_v30, %v479_v29  ;;  %v814_v51 = vshll.u32 %v2948_v48, 16  ;;  %v812_v52 = vshrl.u32 %v2948_v48, 16  ;;  %v2955_v63 = vld [vmem:[%s3596_s25 + $0x30] sm:$0xf]  ;;  %v2956_v0 = vld [vmem:[%s3596_s25 + $0x34] sm:$0x1] }
  0x1a   : > { %3149 = vmatmul.mubr.msk.bf16.vlgmr.msra.gmra.mxu0 %vm227_vm2, %v226_v25  ;;  %v716_v47 = vrot.slane %v714_v41, 1  ;;  %v576_v49 = vor.u32 %v575_v45, %v571_v44  ;;  %v2957_v59 = vcombine.low %v2951_v55, %v2952_v56  ;;  %v2961_v60 = vcombine.low %v2953_v57, %v2954_v58  ;;  %v2967_v16 = vld [vmem:[%s3596_s25 + $0x30] sm:$0xf]  ;;  %v2968_v17 = vld [vmem:[%s3596_s25 + $0x34] sm:$0x1] }
  0x1b   : > { %3159 = vmatpush3.bf16.msra.mxu0 %v3619_v26  ;;  %3167 = vmatmul.mubr.msk.bf16.vlgmr.msra.gmra.mxu1 %vm227_vm2, %v378_v27  ;;  %v816_v53 = vrot.slane %v814_v51, 1  ;;  %v2969_v18 = vld [vmem:[%s3596_s25 + $0x38] sm:$0xf]  ;;  %v2970_v19 = vld [vmem:[%s3596_s25 + $0x3c] sm:$0x1]  ;;  %v2973_v20 = vcombine.low %v2967_v16, %v2968_v17 }
  0x1c   : > { %3160 = vmatprep.mubr.msk.bf16.mxu0 %vm3526_vm1, %v3525_v1  ;;  %3170 = vmatprep.subr.bf16.mxu0 %v3525_v1  ;;  %v717_v50 = vor.u32 %v716_v47, %v712_v46  ;;  %v897_v61 = vshll.u32 %v2957_v59, 16  ;;  %v1038_v62 = vshll.u32 %v2961_v60, 16  ;;  %v895_v3 = vshrl.u32 %v2957_v59, 16  ;;  %v2971_v24 = vld [vmem:[%s3596_s25 + $0x40] sm:$0xf] }
  0x1d   : > { %3177 = vmatpush3.bf16.msra.mxu1 %v3623_v28  ;;  %3178 = vmatprep.mubr.msk.bf16.mxu1 %vm3526_vm1, %v3525_v1  ;;  %v817_v54 = vor.u32 %v816_v53, %v812_v52  ;;  %v1036_v7 = vshrl.u32 %v2961_v60, 16  ;;  %v2977_v21 = vcombine.low %v2969_v18, %v2970_v19  ;;  %v1221_v22 = vshll.u32 %v2973_v20, 16  ;;  %v2972_v25 = vld [vmem:[%s3596_s25 + $0x44] sm:$0x1]  ;;  %v2983_v40 = vld [vmem:[%s3596_s25 + $0x40] sm:$0xf] }
  0x1e   : > { %3188 = vmatprep.subr.bf16.mxu1 %v3525_v1  ;;  %v899_v5 = vrot.slane %v897_v61, 1  ;;  %v1040_v8 = vrot.slane %v1038_v62, 1  ;;  %v1219_v27 = vshrl.u32 %v2973_v20, 16  ;;  %v2984_v41 = vld [vmem:[%s3596_s25 + $0x44] sm:$0x1] }
  0x1f   : > { %v1362_v23 = vshll.u32 %v2977_v21, 16  ;;  %v1223_v29 = vrot.slane %v1221_v22, 1  ;;  %v1360_v30 = vshrl.u32 %v2977_v21, 16  ;;  %v2986_v43 = vld [vmem:[%s3596_s25 + $0x4c] sm:$0x1]  ;;  %v2989_v44 = vcombine.low %v2983_v40, %v2984_v41 }
  0x20   : > { %v900_v10 = vor.u32 %v899_v5, %v895_v3  ;;  %v1041_v11 = vor.u32 %v1040_v8, %v1036_v7  ;;  %v2987_v48 = vld [vmem:[%s3596_s25 + $0x50] sm:$0xf]  ;;  %v3000_v62 = vld [vmem:[%s3596_s25 + $0x54] sm:$0x1]  ;;  %v3015_v22 = vld [vmem:[%s3596_s25 + $0x60] sm:$0xf] }
  0x21   : > { %v1364_v31 = vrot.slane %v1362_v23, 1  ;;  %v1545_v46 = vshll.u32 %v2989_v44, 16  ;;  %v2999_v61 = vld [vmem:[%s3596_s25 + $0x50] sm:$0xf]  ;;  %v3016_v23 = vld [vmem:[%s3596_s25 + $0x64] sm:$0x1] }
  0x22   : > { %3161 = vmatmul.mubr.msk.bf16.vlgmr.msra.gmra.mxu0 %vm227_vm2, %v211_v9  ;;  %v2964_v9 = vcombine.low %v2955_v63, %v2956_v0  ;;  %v3002_v0 = vld [vmem:[%s3596_s25 + $0x5c] sm:$0x1]  ;;  %v3005_v3 = vcombine.low %v2999_v61, %v3000_v62 }
  0x23   : > { %3171 = vmatpush3.bf16.msra.mxu0 %v3640_v35  ;;  %3179 = vmatmul.mubr.msk.bf16.vlgmr.msra.gmra.mxu1 %vm227_vm2, %v484_v32  ;;  %v2980_v32 = vcombine.low %v2971_v24, %v2972_v25  ;;  %v1365_v34 = vor.u32 %v1364_v31, %v1360_v30  ;;  %v1547_v51 = vrot.slane %v1545_v46, 1  ;;  %v3018_v25 = vld [vmem:[%s3596_s25 + $0x6c] sm:$0x1]  ;;  %v3031_v46 = vld [vmem:[%s3596_s25 + $0x70] sm:$0xf] }
  0x24   : > { %3172 = vmatprep.mubr.msk.bf16.mxu0 %vm3526_vm1, %v3525_v1  ;;  %3182 = vmatprep.subr.bf16.mxu0 %v3525_v1  ;;  %v1136_v13 = vshrl.u32 %v2964_v9, 16  ;;  %v1869_v7 = vshll.u32 %v3005_v3, 16 }
  0x25   : > { %3189 = vmatpush3.bf16.msra.mxu1 %v3570_v2  ;;  %3190 = vmatprep.mubr.msk.bf16.mxu1 %vm3526_vm1, %v3525_v1  ;;  %v1460_v37 = vshrl.u32 %v2980_v32, 16 }
  0x26   : > { %3200 = vmatprep.subr.bf16.mxu1 %v3525_v1 }
  0x2a   : > { %3173 = vmatmul.mubr.msk.bf16.vlgmr.msra.gmra.mxu0 %vm227_vm2, %v213_v12  ;;  %v1138_v12 = vshll.u32 %v2964_v9, 16  ;;  %v3003_v9 = vld [vmem:[%s3596_s25 + $0x60] sm:$0xf] }
  0x2b   : > { %3183 = vmatpush3.bf16.msra.mxu0 %v3580_v4  ;;  %3191 = vmatmul.mubr.msk.bf16.vlgmr.msra.gmra.mxu1 %vm227_vm2, %v2935_v33  ;;  %v1224_v33 = vor.u32 %v1223_v29, %v1219_v27  ;;  %v3021_v27 = vcombine.low %v3015_v22, %v3016_v23 }
  0x2c   : > { %3184 = vmatprep.mubr.msk.bf16.mxu0 %vm3526_vm1, %v3525_v1  ;;  %3194 = vmatprep.subr.bf16.mxu0 %v3525_v1  ;;  %v1140_v14 = vrot.slane %v1138_v12, 1  ;;  %v1871_v12 = vrot.slane %v1869_v7, 1 }
  0x2d   : > { %3201 = vmatpush3.bf16.msra.mxu1 %v3599_v6  ;;  %3202 = vmatprep.mubr.msk.bf16.mxu1 %vm3526_vm1, %v3525_v1  ;;  %v2193_v30 = vshll.u32 %v3021_v27, 16 }
  0x2e   : > { %3212 = vmatprep.subr.bf16.mxu1 %v3525_v1  ;;  %v1141_v15 = vor.u32 %v1140_v14, %v1136_v13 }
  0x32   : > { %3185 = vmatmul.mubr.msk.bf16.vlgmr.msra.gmra.mxu0 %vm227_vm2, %v576_v49  ;;  %v2988_v49 = vld [vmem:[%s3596_s25 + $0x54] sm:$0x1] }
  0x33   : > { %3195 = vmatpush3.bf16.msra.mxu0 %v3619_v26  ;;  %3203 = vmatmul.mubr.msk.bf16.vlgmr.msra.gmra.mxu1 %vm227_vm2, %v717_v50  ;;  %v1543_v50 = vshrl.u32 %v2989_v44, 16 }
  0x34   : > { %3196 = vmatprep.mubr.msk.bf16.mxu0 %vm3526_vm1, %v3525_v1  ;;  %3206 = vmatprep.subr.bf16.mxu0 %v3525_v1 }
  0x35   : > { %3213 = vmatpush3.bf16.msra.mxu1 %v3623_v28  ;;  %3214 = vmatprep.mubr.msk.bf16.mxu1 %vm3526_vm1, %v3525_v1 }
  0x36   : > { %3224 = vmatprep.subr.bf16.mxu1 %v3525_v1 }
  0x3a   : > { %3197 = vmatmul.mubr.msk.bf16.vlgmr.msra.gmra.mxu0 %vm227_vm2, %v2937_v36  ;;  %v1462_v36 = vshll.u32 %v2980_v32, 16  ;;  %v3019_v32 = vld [vmem:[%s3596_s25 + $0x70] sm:$0xf] }
  0x3b   : > { %3207 = vmatpush3.bf16.msra.mxu0 %v3640_v35  ;;  %3215 = vmatmul.mubr.msk.bf16.vlgmr.msra.gmra.mxu1 %vm227_vm2, %v817_v54  ;;  %v2996_v54 = vcombine.low %v2987_v48, %v2988_v49  ;;  %v3034_v49 = vld [vmem:[%s3596_s25 + $0x7c] sm:$0x1] }
  0x3c   : > { %3208 = vmatprep.mubr.msk.bf16.mxu0 %vm3526_vm1, %v3525_v1  ;;  %3218 = vmatprep.subr.bf16.mxu0 %v3525_v1  ;;  %v1464_v38 = vrot.slane %v1462_v36, 1  ;;  %v2195_v36 = vrot.slane %v2193_v30, 1 }
  0x3d   : > { %3225 = vmatpush3.bf16.msra.mxu1 %v3570_v2  ;;  %3226 = vmatprep.mubr.msk.bf16.mxu1 %vm3526_vm1, %v3525_v1  ;;  %v1784_v58 = vshrl.u32 %v2996_v54, 16 }
  0x3e   : > { %3236 = vmatprep.subr.bf16.mxu1 %v3525_v1  ;;  %v1465_v39 = vor.u32 %v1464_v38, %v1460_v37 }
  0x42   : > { %3209 = vmatmul.mubr.msk.bf16.vlgmr.msra.gmra.mxu0 %vm227_vm2, %v2939_v42  ;;  %v2985_v42 = vld [vmem:[%s3596_s25 + $0x48] sm:$0xf] }
  0x43   : > { %3219 = vmatpush3.bf16.msra.mxu0 %v3580_v4  ;;  %3227 = vmatmul.mubr.msk.bf16.vlgmr.msra.gmra.mxu1 %vm227_vm2, %v2951_v55  ;;  %v2993_v45 = vcombine.low %v2985_v42, %v2986_v43  ;;  %v1548_v55 = vor.u32 %v1547_v51, %v1543_v50 }
  0x44   : > { %3220 = vmatprep.mubr.msk.bf16.mxu0 %vm3526_vm1, %v3525_v1  ;;  %3230 = vmatprep.subr.bf16.mxu0 %v3525_v1 }
  0x45   : > { %3237 = vmatpush3.bf16.msra.mxu1 %v3599_v6  ;;  %3238 = vmatprep.mubr.msk.bf16.mxu1 %vm3526_vm1, %v3525_v1  ;;  %v1686_v47 = vshll.u32 %v2993_v45, 16  ;;  %v1684_v52 = vshrl.u32 %v2993_v45, 16 }
  0x46   : > { %3248 = vmatprep.subr.bf16.mxu1 %v3525_v1 }
  0x47   : > { %v1688_v53 = vrot.slane %v1686_v47, 1  ;;  %v3032_v47 = vld [vmem:[%s3596_s25 + $0x74] sm:$0x1] }
  0x48   : > { %v3037_v50 = vcombine.low %v3031_v46, %v3032_v47 }
  0x49   : > { %v1689_v56 = vor.u32 %v1688_v53, %v1684_v52 }
  0x4a   : > { %3221 = vmatmul.mubr.msk.bf16.vlgmr.msra.gmra.mxu0 %vm227_vm2, %v900_v10  ;;  %v3004_v10 = vld [vmem:[%s3596_s25 + $0x64] sm:$0x1]  ;;  %v2517_v52 = vshll.u32 %v3037_v50, 16 }
  0x4b   : > { %3231 = vmatpush3.bf16.msra.mxu0 %v3619_v26  ;;  %3239 = vmatmul.mubr.msk.bf16.vlgmr.msra.gmra.mxu1 %vm227_vm2, %v1041_v11  ;;  %v1867_v11 = vshrl.u32 %v3005_v3, 16 }
  0x4c   : > { %3232 = vmatprep.mubr.msk.bf16.mxu0 %vm3526_vm1, %v3525_v1  ;;  %3242 = vmatprep.subr.bf16.mxu0 %v3525_v1 }
  0x4d   : > { %3249 = vmatpush3.bf16.msra.mxu1 %v3623_v28  ;;  %3250 = vmatprep.mubr.msk.bf16.mxu1 %vm3526_vm1, %v3525_v1 }
  0x4e   : > { %3260 = vmatprep.subr.bf16.mxu1 %v3525_v1 }
  0x52   : > { %3233 = vmatmul.mubr.msk.bf16.vlgmr.msra.gmra.mxu0 %vm227_vm2, %v2953_v57  ;;  %v1786_v57 = vshll.u32 %v2996_v54, 16  ;;  %v3035_v54 = vld [vmem:[%s3596_s25 + $0x80] sm:$0xf] }
  0x53   : > { %3243 = vmatpush3.bf16.msra.mxu0 %v3640_v35  ;;  %3251 = vmatmul.mubr.msk.bf16.vlgmr.msra.gmra.mxu1 %vm227_vm2, %v1141_v15  ;;  %v3012_v15 = vcombine.low %v3003_v9, %v3004_v10 }
  0x54   : > { %3244 = vmatprep.mubr.msk.bf16.mxu0 %vm3526_vm1, %v3525_v1  ;;  %3254 = vmatprep.subr.bf16.mxu0 %v3525_v1  ;;  %v1788_v59 = vrot.slane %v1786_v57, 1  ;;  %v2519_v57 = vrot.slane %v2517_v52, 1 }
  0x55   : > { %3261 = vmatpush3.bf16.msra.mxu1 %v3570_v2  ;;  %3262 = vmatprep.mubr.msk.bf16.mxu1 %vm3526_vm1, %v3525_v1  ;;  %v2108_v19 = vshrl.u32 %v3012_v15, 16 }
  0x56   : > { %3272 = vmatprep.subr.bf16.mxu1 %v3525_v1  ;;  %v1789_v60 = vor.u32 %v1788_v59, %v1784_v58 }
  0x5a   : > { %3245 = vmatmul.mubr.msk.bf16.vlgmr.msra.gmra.mxu0 %vm227_vm2, %v2955_v63  ;;  %v3001_v63 = vld [vmem:[%s3596_s25 + $0x58] sm:$0xf] }
  0x5b   : > { %3255 = vmatpush3.bf16.msra.mxu0 %v3580_v4  ;;  %3263 = vmatmul.mubr.msk.bf16.vlgmr.msra.gmra.mxu1 %vm227_vm2, %v2967_v16  ;;  %v3009_v5 = vcombine.low %v3001_v63, %v3002_v0  ;;  %v1872_v16 = vor.u32 %v1871_v12, %v1867_v11 }
  0x5c   : > { %3256 = vmatprep.mubr.msk.bf16.mxu0 %vm3526_vm1, %v3525_v1  ;;  %3266 = vmatprep.subr.bf16.mxu0 %v3525_v1 }
  0x5d   : > { %3273 = vmatpush3.bf16.msra.mxu1 %v3599_v6  ;;  %3274 = vmatprep.mubr.msk.bf16.mxu1 %vm3526_vm1, %v3525_v1  ;;  %v2010_v8 = vshll.u32 %v3009_v5, 16  ;;  %v2008_v13 = vshrl.u32 %v3009_v5, 16 }
  0x5e   : > { %3284 = vmatprep.subr.bf16.mxu1 %v3525_v1 }
  0x5f   : > { %v2012_v14 = vrot.slane %v2010_v8, 1 }
  0x61   : > { %v2013_v17 = vor.u32 %v2012_v14, %v2008_v13 }
  0x62   : > { %3257 = vmatmul.mubr.msk.bf16.vlgmr.msra.gmra.mxu0 %vm227_vm2, %v1224_v33  ;;  %v3020_v33 = vld [vmem:[%s3596_s25 + $0x74] sm:$0x1] }
  0x63   : > { %3267 = vmatpush3.bf16.msra.mxu0 %v3619_v26  ;;  %3275 = vmatmul.mubr.msk.bf16.vlgmr.msra.gmra.mxu1 %vm227_vm2, %v1365_v34  ;;  %v2191_v34 = vshrl.u32 %v3021_v27, 16  ;;  %v3900_v27 = vld [vmem:[%s3943_s2] ss:$0 sm:$0xff] }
  0x64   : > { %3268 = vmatprep.mubr.msk.bf16.mxu0 %vm3526_vm1, %v3525_v1  ;;  %3278 = vmatprep.subr.bf16.mxu0 %v3525_v1 }
  0x65   : > { %3285 = vmatpush3.bf16.msra.mxu1 %v3623_v28  ;;  %3286 = vmatprep.mubr.msk.bf16.mxu1 %vm3526_vm1, %v3525_v1 }
  0x66   : > { %3296 = vmatprep.subr.bf16.mxu1 %v3525_v1 }
  0x6a   : > { %3269 = vmatmul.mubr.msk.bf16.vlgmr.msra.gmra.mxu0 %vm227_vm2, %v2969_v18  ;;  %v2110_v18 = vshll.u32 %v3012_v15, 16 }
  0x6b   : > { %3279 = vmatpush3.bf16.msra.mxu0 %v3640_v35  ;;  %3287 = vmatmul.mubr.msk.bf16.vlgmr.msra.gmra.mxu1 %vm227_vm2, %v1465_v39  ;;  %v3028_v39 = vcombine.low %v3019_v32, %v3020_v33 }
  0x6c   : > { %3280 = vmatprep.mubr.msk.bf16.mxu0 %vm3526_vm1, %v3525_v1  ;;  %3290 = vmatprep.subr.bf16.mxu0 %v3525_v1  ;;  %v2112_v20 = vrot.slane %v2110_v18, 1 }
  0x6d   : > { %3297 = vmatpush3.bf16.msra.mxu1 %v3570_v2  ;;  %3298 = vmatprep.mubr.msk.bf16.mxu1 %vm3526_vm1, %v3525_v1  ;;  %v2432_v43 = vshrl.u32 %v3028_v39, 16 }
  0x6e   : > { %3308 = vmatprep.subr.bf16.mxu1 %v3525_v1  ;;  %v2113_v21 = vor.u32 %v2112_v20, %v2108_v19 }
  0x72   : > { %3281 = vmatmul.mubr.msk.bf16.vlgmr.msra.gmra.mxu0 %vm227_vm2, %v2971_v24  ;;  %v3017_v24 = vld [vmem:[%s3596_s25 + $0x68] sm:$0xf] }
  0x73   : > { %3291 = vmatpush3.bf16.msra.mxu0 %v3580_v4  ;;  %3299 = vmatmul.mubr.msk.bf16.vlgmr.msra.gmra.mxu1 %vm227_vm2, %v2983_v40  ;;  %v3025_v29 = vcombine.low %v3017_v24, %v3018_v25  ;;  %v2196_v40 = vor.u32 %v2195_v36, %v2191_v34 }
  0x74   : > { %3292 = vmatprep.mubr.msk.bf16.mxu0 %vm3526_vm1, %v3525_v1  ;;  %3302 = vmatprep.subr.bf16.mxu0 %v3525_v1 }
  0x75   : > { %3309 = vmatpush3.bf16.msra.mxu1 %v3599_v6  ;;  %3310 = vmatprep.mubr.msk.bf16.mxu1 %vm3526_vm1, %v3525_v1  ;;  %v2334_v31 = vshll.u32 %v3025_v29, 16  ;;  %v2332_v37 = vshrl.u32 %v3025_v29, 16 }
  0x76   : > { %3320 = vmatprep.subr.bf16.mxu1 %v3525_v1 }
  0x77   : > { %v2336_v38 = vrot.slane %v2334_v31, 1 }
  0x79   : > { %v2337_v41 = vor.u32 %v2336_v38, %v2332_v37 }
  0x7a   : > { %3293 = vmatmul.mubr.msk.bf16.vlgmr.msra.gmra.mxu0 %vm227_vm2, %v1548_v55  ;;  %v3036_v55 = vld [vmem:[%s3596_s25 + $0x84] sm:$0x1] }
  0x7b   : > { %3303 = vmatpush3.bf16.msra.mxu0 %v3619_v26  ;;  %3311 = vmatmul.mubr.msk.bf16.vlgmr.msra.gmra.mxu1 %vm227_vm2, %v1689_v56  ;;  %v2515_v56 = vshrl.u32 %v3037_v50, 16 }
  0x7c   : > { %3304 = vmatprep.mubr.msk.bf16.mxu0 %vm3526_vm1, %v3525_v1  ;;  %3314 = vmatprep.subr.bf16.mxu0 %v3525_v1 }
  0x7d   : > { %3321 = vmatpush3.bf16.msra.mxu1 %v3623_v28  ;;  %3322 = vmatprep.mubr.msk.bf16.mxu1 %vm3526_vm1, %v3525_v1 }
  0x7e   : > { %3332 = vmatprep.subr.bf16.mxu1 %v3525_v1 }
  0x82   : > { %3305 = vmatmul.mubr.msk.bf16.vlgmr.msra.gmra.mxu0 %vm227_vm2, %v2985_v42  ;;  %v2434_v42 = vshll.u32 %v3028_v39, 16 }
  0x83   : > { %3315 = vmatpush3.bf16.msra.mxu0 %v3640_v35  ;;  %3323 = vmatmul.mubr.msk.bf16.vlgmr.msra.gmra.mxu1 %vm227_vm2, %v1789_v60  ;;  %v2520_v60 = vor.u32 %v2519_v57, %v2515_v56 }
  0x84   : > { %3316 = vmatprep.mubr.msk.bf16.mxu0 %vm3526_vm1, %v3525_v1  ;;  %3326 = vmatprep.subr.bf16.mxu0 %v3525_v1  ;;  %v2436_v44 = vrot.slane %v2434_v42, 1 }
  0x85   : > { %3333 = vmatpush3.bf16.msra.mxu1 %v3570_v2  ;;  %3334 = vmatprep.mubr.msk.bf16.mxu1 %vm3526_vm1, %v3525_v1 }
  0x86   : > { %3344 = vmatprep.subr.bf16.mxu1 %v3525_v1  ;;  %v2437_v45 = vor.u32 %v2436_v44, %v2432_v43 }
  0x8a   : > { %3317 = vmatmul.mubr.msk.bf16.vlgmr.msra.gmra.mxu0 %vm227_vm2, %v2987_v48  ;;  %v3033_v48 = vld [vmem:[%s3596_s25 + $0x78] sm:$0xf] }
  0x8b   : > { %3327 = vmatpush3.bf16.msra.mxu0 %v3580_v4  ;;  %3335 = vmatmul.mubr.msk.bf16.vlgmr.msra.gmra.mxu1 %vm227_vm2, %v2999_v61  ;;  %v3041_v51 = vcombine.low %v3033_v48, %v3034_v49 }
  0x8c   : > { %3328 = vmatprep.mubr.msk.bf16.mxu0 %vm3526_vm1, %v3525_v1  ;;  %3338 = vmatprep.subr.bf16.mxu0 %v3525_v1 }
  0x8d   : > { %3345 = vmatpush3.bf16.msra.mxu1 %v3599_v6  ;;  %3346 = vmatprep.mubr.msk.bf16.mxu1 %vm3526_vm1, %v3525_v1  ;;  %v2658_v53 = vshll.u32 %v3041_v51, 16  ;;  %v2656_v58 = vshrl.u32 %v3041_v51, 16 }
  0x8e   : > { %3356 = vmatprep.subr.bf16.mxu1 %v3525_v1 }
  0x8f   : > { %v2660_v59 = vrot.slane %v2658_v53, 1 }
  0x91   : > { %v2661_v61 = vor.u32 %v2660_v59, %v2656_v58 }
  0x92   : > { %3329 = vmatmul.mubr.msk.bf16.vlgmr.msra.gmra.mxu0 %vm227_vm2, %v1872_v16 }
  0x93   : > { %3339 = vmatpush3.bf16.msra.mxu0 %v3619_v26  ;;  %3347 = vmatmul.mubr.msk.bf16.vlgmr.msra.gmra.mxu1 %vm227_vm2, %v2013_v17 }
  0x94   : > { %3340 = vmatprep.mubr.msk.bf16.mxu0 %vm3526_vm1, %v3525_v1  ;;  %3350 = vmatprep.subr.bf16.mxu0 %v3525_v1 }
  0x95   : > { %3357 = vmatpush3.bf16.msra.mxu1 %v3623_v28  ;;  %3358 = vmatprep.mubr.msk.bf16.mxu1 %vm3526_vm1, %v3525_v1 }
  0x96   : > { %3368 = vmatprep.subr.bf16.mxu1 %v3525_v1 }
  0x9a   : > { %3341 = vmatmul.mubr.msk.bf16.vlgmr.msra.gmra.mxu0 %vm227_vm2, %v3001_v63 }
  0x9b   : > { %3351 = vmatpush3.bf16.msra.mxu0 %v3640_v35  ;;  %3359 = vmatmul.mubr.msk.bf16.vlgmr.msra.gmra.mxu1 %vm227_vm2, %v2113_v21 }
  0x9c   : > { %3352 = vmatprep.mubr.msk.bf16.mxu0 %vm3526_vm1, %v3525_v1  ;;  %3362 = vmatprep.subr.bf16.mxu0 %v3525_v1 }
  0x9d   : > { %3369 = vmatpush3.bf16.msra.mxu1 %v3570_v2  ;;  %3370 = vmatprep.mubr.msk.bf16.mxu1 %vm3526_vm1, %v3525_v1 }
  0x9e   : > { %3380 = vmatprep.subr.bf16.mxu1 %v3525_v1 }
  0xa2   : > { %3353 = vmatmul.mubr.msk.bf16.vlgmr.msra.gmra.mxu0 %vm227_vm2, %v3003_v9 }
  0xa3   : > { %3363 = vmatpush3.bf16.msra.mxu0 %v3580_v4  ;;  %3371 = vmatmul.mubr.msk.bf16.vlgmr.msra.gmra.mxu1 %vm227_vm2, %v3015_v22 }
  0xa4   : > { %3364 = vmatprep.mubr.msk.bf16.mxu0 %vm3526_vm1, %v3525_v1  ;;  %3374 = vmatprep.subr.bf16.mxu0 %v3525_v1 }
  0xa5   : > { %3381 = vmatpush3.bf16.msra.mxu1 %v3599_v6  ;;  %3382 = vmatprep.mubr.msk.bf16.mxu1 %vm3526_vm1, %v3525_v1 }
  0xa6   : > { %3392 = vmatprep.subr.bf16.mxu1 %v3525_v1 }
  0xaa   : > { %3365 = vmatmul.mubr.msk.bf16.vlgmr.msra.gmra.mxu0 %vm227_vm2, %v2196_v40 }
  0xab   : > { %3375 = vmatpush3.bf16.msra.mxu0 %v3619_v26  ;;  %3383 = vmatmul.mubr.msk.bf16.vlgmr.msra.gmra.mxu1 %vm227_vm2, %v2337_v41 }
  0xac   : > { %3376 = vmatprep.mubr.msk.bf16.mxu0 %vm3526_vm1, %v3525_v1  ;;  %3386 = vmatprep.subr.bf16.mxu0 %v3525_v1 }
  0xad   : > { %3393 = vmatpush3.bf16.msra.mxu1 %v3623_v28  ;;  %3394 = vmatprep.mubr.msk.bf16.mxu1 %vm3526_vm1, %v3525_v1 }
  0xae   : > { %3404 = vmatprep.subr.bf16.mxu1 %v3525_v1 }
  0xb2   : > { %3377 = vmatmul.mubr.msk.bf16.vlgmr.msra.gmra.mxu0 %vm227_vm2, %v3017_v24 }
  0xb3   : > { %3387 = vmatpush3.bf16.msra.mxu0 %v3640_v35  ;;  %3395 = vmatmul.mubr.msk.bf16.vlgmr.msra.gmra.mxu1 %vm227_vm2, %v2437_v45 }
  0xb4   : > { %3388 = vmatprep.mubr.msk.bf16.mxu0 %vm3526_vm1, %v3525_v1  ;;  %3398 = vmatprep.subr.bf16.mxu0 %v3525_v1 }
  0xb5   : > { %3405 = vmatpush3.bf16.msra.mxu1 %v3570_v2  ;;  %3406 = vmatprep.mubr.msk.bf16.mxu1 %vm3526_vm1, %v3525_v1  ;;  %v3044_v2 = vcombine.low %v3035_v54, %v3036_v55 }
  0xb6   : > { %3416 = vmatprep.subr.bf16.mxu1 %v3525_v1 }
  0xb7   : > { %v2756_v62 = vshrl.u32 %v3044_v2, 16 }
  0xba   : > { %3389 = vmatmul.mubr.msk.bf16.vlgmr.msra.gmra.mxu0 %vm227_vm2, %v3019_v32 }
  0xbb   : > { %3399 = vmatpush3.bf16.msra.mxu0 %v3580_v4  ;;  %3407 = vmatmul.mubr.msk.bf16.vlgmr.msra.gmra.mxu1 %vm227_vm2, %v3031_v46  ;;  %v2758_v4 = vshll.u32 %v3044_v2, 16 }
  0xbc   : > { %3400 = vmatprep.mubr.msk.bf16.mxu0 %vm3526_vm1, %v3525_v1  ;;  %3410 = vmatprep.subr.bf16.mxu0 %v3525_v1 }
  0xbd   : > { %3417 = vmatpush3.bf16.msra.mxu1 %v3599_v6  ;;  %3418 = vmatprep.mubr.msk.bf16.mxu1 %vm3526_vm1, %v3525_v1  ;;  %v2760_v63 = vrot.slane %v2758_v4, 1 }
  0xbe   : > { %3428 = vmatprep.subr.bf16.mxu1 %v3525_v1 }
  0xbf   : > { %v2761_v6 = vor.u32 %v2760_v63, %v2756_v62 }
  0xc2   : > { %3401 = vmatmul.mubr.msk.bf16.vlgmr.msra.gmra.mxu0 %vm227_vm2, %v2520_v60 }
  0xc3   : > { %3411 = vmatpush3.bf16.msra.mxu0 %v3619_v26  ;;  %3419 = vmatmul.mubr.msk.bf16.vlgmr.msra.gmra.mxu1 %vm227_vm2, %v2661_v61 }
  0xc4   : > { %3412 = vmatprep.mubr.msk.bf16.mxu0 %vm3526_vm1, %v3525_v1  ;;  %3422 = vmatprep.subr.bf16.mxu0 %v3525_v1 }
  0xc5   : > { %3429 = vmatpush3.bf16.msra.mxu1 %v3623_v28  ;;  %3430 = vmatprep.mubr.msk.bf16.mxu1 %vm3526_vm1, %v3525_v1 }
  0xca   : > { %3413 = vmatmul.mubr.msk.bf16.vlgmr.msra.gmra.mxu0 %vm227_vm2, %v3033_v48 }
  0xcb   : > { %3423 = vmatpush3.bf16.msra.mxu0 %v3640_v35  ;;  %3431 = vmatmul.mubr.msk.bf16.vlgmr.msra.gmra.mxu1 %vm227_vm2, %v2761_v6 }
  0xcc   : > { %3424 = vmatprep.mubr.msk.bf16.mxu0 %vm3526_vm1, %v3525_v1 }
  0xd2   : > { %3425 = vmatmul.mubr.msk.bf16.vlgmr.msra.gmra.mxu0 %vm227_vm2, %v3035_v54  ;;  %v315_v26 = vpop.f32.mrf.mxu1 }
  0xd4   : > { %v3156_v0 = vpop.f32.mrf.mxu1 }
  0xd6   : > { %v318_v3 = vpop.f32.mrf.mxu1 }
  0xd8   : > { %v3157_v5 = vpop.f32.mrf.mxu1 }
  0xda   : > { %v269_v28 = vpop.f32.mrf.mxu0 }
  0xdb   : > { %v419_v7 = vpop.f32.mrf.mxu1  ;;  %v316_v14 = vadd.f32 %v315_v26, %v269_v28 }
  0xdc   : > { %v3150_v8 = vpop.f32.mrf.mxu0 }
  0xdd   : > { %v3168_v9 = vpop.f32.mrf.mxu1 }
  0xde   : > { %v272_v10 = vpop.f32.mrf.mxu0 }
  0xdf   : > { %v422_v11 = vpop.f32.mrf.mxu1 }
  0xe0   : > { %v3151_v12 = vpop.f32.mrf.mxu0 }
  0xe1   : > { %v3169_v13 = vpop.f32.mrf.mxu1 }
  0xe2   : > { %v361_v35 = vpop.f32.mrf.mxu0 }
  0xe3   : > { %v525_v15 = vpop.f32.mrf.mxu1  ;;  %v425_v17 = vadd.f32 %v361_v35, %v316_v14 }
  0xe4   : > { %v3162_v16 = vpop.f32.mrf.mxu0 }
  0xe5   : > { %v3180_v1 = vpop.f32.mrf.mxu1  ;;  %v426_v21 = vadd.f32 %v425_v17, %v419_v7 }
  0xe6   : > { %v364_v18 = vpop.f32.mrf.mxu0 }
  0xe7   : > { %v528_v19 = vpop.f32.mrf.mxu1 }
  0xe8   : > { %v3163_v20 = vpop.f32.mrf.mxu0 }
  0xe9   : > { %v3181_v22 = vpop.f32.mrf.mxu1 }
  0xea   : > { %v467_v23 = vpop.f32.mrf.mxu0 }
  0xeb   : > { %v531_v24 = vadd.f32 %v467_v23, %v426_v21  ;;  %v657_v25 = vpop.f32.mrf.mxu1 }
  0xec   : > { %v3174_v29 = vpop.f32.mrf.mxu0 }
  0xed   : > { %v532_v30 = vadd.f32 %v531_v24, %v525_v15  ;;  %v3192_v31 = vpop.f32.mrf.mxu1 }
  0xee   : > { %v470_v32 = vpop.f32.mrf.mxu0 }
  0xef   : > { %v539_v33 = vadd.f32 %v3900_v27, %v532_v30  ;;  %v660_v34 = vpop.f32.mrf.mxu1 }
  0xf0   : > { %v3175_v36 = vpop.f32.mrf.mxu0 }
  0xf1   : > { %v541_v37 = vmul.f32 %v539_v33, %v539_v33  ;;  %v3193_v38 = vpop.f32.mrf.mxu1  ;;  %v540_v8 = vmul.f32 0.5, %v539_v33 }
  0xf2   : > { %v614_v39 = vpop.f32.mrf.mxu0 }
  0xf3   : > { %v542_v40 = vmul.f32 %v541_v37, %v539_v33  ;;  %v755_v41 = vpop.f32.mrf.mxu1  ;;  %v658_v52 = vadd.f32 %v657_v25, %v614_v39 }
  0xf4   : > { %v3186_v42 = vpop.f32.mrf.mxu0 }
  0xf5   : > { %v543_v43 = vmul.f32 0.044715, %v542_v40  ;;  %v3204_v44 = vpop.f32.mrf.mxu1 }
  0xf6   : > { %v617_v45 = vpop.f32.mrf.mxu0 }
  0xf7   : > { %v544_v46 = vadd.f32 %v543_v43, %v539_v33  ;;  %v758_v47 = vpop.f32.mrf.mxu1 }
  0xf8   : > { %v3187_v48 = vpop.f32.mrf.mxu0 }
  0xf9   : > { %v545_v49 = vmul.f32 0.7978846, %v544_v46  ;;  %v3205_v50 = vpop.f32.mrf.mxu1 }
  0xfa   : > { %v700_v51 = vpop.f32.mrf.mxu0 }
  0xfb   : > { %3485 = vtanh.f32 %v545_v49  ;;  %v855_v53 = vpop.f32.mrf.mxu1  ;;  %v761_v55 = vadd.f32 %v700_v51, %v658_v52 }
  0xfc   : > { %v3198_v54 = vpop.f32.mrf.mxu0 }
  0xfd   : > { %v3216_v56 = vpop.f32.mrf.mxu1  ;;  %v762_v2 = vadd.f32 %v761_v55, %v755_v41 }
  0xfe   : > { %v703_v57 = vpop.f32.mrf.mxu0 }
  0xff   : > { %v858_v58 = vpop.f32.mrf.mxu1 }
 0x100   : > { %v3199_v59 = vpop.f32.mrf.mxu0 }
 0x101   : > { %v3217_v60 = vpop.f32.mrf.mxu1 }
 0x102   : > { %v800_v61 = vpop.f32.mrf.mxu0 }
 0x103   : > { %v861_v4 = vadd.f32 %v800_v61, %v762_v2  ;;  %v981_v62 = vpop.f32.mrf.mxu1 }
 0x104   : > { %v3210_v63 = vpop.f32.mrf.mxu0 }
 0x105   : > { %v862_v6 = vadd.f32 %v861_v4, %v855_v53  ;;  %v3228_v26 = vpop.f32.mrf.mxu1 }
 0x106   : > { %v803_v0 = vpop.f32.mrf.mxu0 }
 0x107   : > { %v863_v3 = vadd.f32 %v3900_v27, %v862_v6  ;;  %v984_v5 = vpop.f32.mrf.mxu1 }
 0x108   : > { %v3486_v28 = vpop.eup %3485  ;;  %v3211_v7 = vpop.f32.mrf.mxu0 }
 0x109   : > { %v547_v9 = vadd.f32 1.0, %v3486_v28  ;;  %v865_v10 = vmul.f32 %v863_v3, %v863_v3  ;;  %v3229_v11 = vpop.f32.mrf.mxu1  ;;  %v864_v50 = vmul.f32 0.5, %v863_v3 }
 0x10a   : > { %v938_v12 = vpop.f32.mrf.mxu0 }
 0x10b   : > { %v548_v13 = vmul.f32 %v547_v9, %v540_v8  ;;  %v866_v35 = vmul.f32 %v865_v10, %v863_v3  ;;  %v1079_v14 = vpop.f32.mrf.mxu1  ;;  %v982_v25 = vadd.f32 %v981_v62, %v938_v12 }
 0x10c   : > { %v3222_v15 = vpop.f32.mrf.mxu0 }
 0x10d   : > { %v549_v16 = vpack.c.bf16 %v548_v13, %v548_v13  ;;  %v867_v17 = vmul.f32 0.044715, %v866_v35  ;;  %v3240_v1 = vpop.f32.mrf.mxu1 }
 0x10e   : > { %v941_v18 = vpop.f32.mrf.mxu0 }
 0x10f   : > { %551 = vst.msk [vmem:[%s3908_s10] sm:$0xf] %vm550_vm3, %v549_v16  ;;  %v868_v19 = vadd.f32 %v867_v17, %v863_v3  ;;  %v1082_v20 = vpop.f32.mrf.mxu1 }
 0x110   : > { %v3223_v21 = vpop.f32.mrf.mxu0 }
 0x111   : > { %v869_v22 = vmul.f32 0.7978846, %v868_v19  ;;  %v3241_v23 = vpop.f32.mrf.mxu1 }
 0x112   : > { %v1024_v24 = vpop.f32.mrf.mxu0 }
 0x113   : > { %3487 = vtanh.f32 %v869_v22  ;;  %v1179_v29 = vpop.f32.mrf.mxu1  ;;  %v1085_v31 = vadd.f32 %v1024_v24, %v982_v25 }
 0x114   : > { %v3234_v30 = vpop.f32.mrf.mxu0 }
 0x115   : > { %v3252_v32 = vpop.f32.mrf.mxu1  ;;  %v1086_v37 = vadd.f32 %v1085_v31, %v1079_v14 }
 0x116   : > { %v1027_v33 = vpop.f32.mrf.mxu0 }
 0x117   : > { %v1182_v34 = vpop.f32.mrf.mxu1 }
 0x118   : > { %v3235_v36 = vpop.f32.mrf.mxu0 }
 0x119   : > { %v3253_v38 = vpop.f32.mrf.mxu1 }
 0x11a   : > { %v1124_v39 = vpop.f32.mrf.mxu0 }
 0x11b   : > { %v1185_v40 = vadd.f32 %v1124_v39, %v1086_v37  ;;  %v1305_v41 = vpop.f32.mrf.mxu1 }
 0x11c   : > { %v3246_v42 = vpop.f32.mrf.mxu0 }
 0x11d   : > { %v1186_v43 = vadd.f32 %v1185_v40, %v1179_v29  ;;  %v3264_v44 = vpop.f32.mrf.mxu1 }
 0x11e   : > { %v1127_v45 = vpop.f32.mrf.mxu0 }
 0x11f   : > { %v1187_v46 = vadd.f32 %v3900_v27, %v1186_v43  ;;  %v1308_v47 = vpop.f32.mrf.mxu1 }
 0x120   : > { %v3488_v48 = vpop.eup %3487  ;;  %v3247_v49 = vpop.f32.mrf.mxu0 }
 0x121   : > { %v871_v51 = vadd.f32 1.0, %v3488_v48  ;;  %v1189_v52 = vmul.f32 %v1187_v46, %v1187_v46  ;;  %v3265_v53 = vpop.f32.mrf.mxu1  ;;  %v1188_v23 = vmul.f32 0.5, %v1187_v46 }
 0x122   : > { %v1262_v54 = vpop.f32.mrf.mxu0 }
 0x123   : > { %v872_v55 = vmul.f32 %v871_v51, %v864_v50  ;;  %v1190_v56 = vmul.f32 %v1189_v52, %v1187_v46  ;;  %v1403_v57 = vpop.f32.mrf.mxu1  ;;  %v1306_v3 = vadd.f32 %v1305_v41, %v1262_v54 }
 0x124   : > { %v3258_v58 = vpop.f32.mrf.mxu0 }
 0x125   : > { %v873_v59 = vpack.c.bf16 %v872_v55, %v872_v55  ;;  %v1191_v2 = vmul.f32 0.044715, %v1190_v56  ;;  %v3276_v60 = vpop.f32.mrf.mxu1 }
 0x126   : > { %v1265_v61 = vpop.f32.mrf.mxu0 }
 0x127   : > { %2950 = vst.msk [vmem:[%s3908_s10 + $0x4] sm:$0xf] %vm550_vm3, %v873_v59  ;;  %v1192_v4 = vadd.f32 %v1191_v2, %v1187_v46  ;;  %v1406_v62 = vpop.f32.mrf.mxu1 }
 0x128   : > { %v3259_v63 = vpop.f32.mrf.mxu0 }
 0x129   : > { %v1193_v6 = vmul.f32 0.7978846, %v1192_v4  ;;  %v3277_v26 = vpop.f32.mrf.mxu1 }
 0x12a   : > { %v1348_v0 = vpop.f32.mrf.mxu0 }
 0x12b   : > { %3489 = vtanh.f32 %v1193_v6  ;;  %v1503_v5 = vpop.f32.mrf.mxu1  ;;  %v1409_v7 = vadd.f32 %v1348_v0, %v1306_v3 }
 0x12c   : > { %v3270_v28 = vpop.f32.mrf.mxu0 }
 0x12d   : > { %v3288_v8 = vpop.f32.mrf.mxu1  ;;  %v1410_v12 = vadd.f32 %v1409_v7, %v1403_v57 }
 0x12e   : > { %v1351_v9 = vpop.f32.mrf.mxu0 }
 0x12f   : > { %v1506_v10 = vpop.f32.mrf.mxu1 }
 0x130   : > { %v3271_v11 = vpop.f32.mrf.mxu0 }
 0x131   : > { %v3289_v13 = vpop.f32.mrf.mxu1 }
 0x132   : > { %v1448_v35 = vpop.f32.mrf.mxu0 }
 0x133   : > { %v1509_v14 = vadd.f32 %v1448_v35, %v1410_v12  ;;  %v1629_v15 = vpop.f32.mrf.mxu1 }
 0x134   : > { %v3282_v16 = vpop.f32.mrf.mxu0 }
 0x135   : > { %v1510_v17 = vadd.f32 %v1509_v14, %v1503_v5  ;;  %v3300_v1 = vpop.f32.mrf.mxu1 }
 0x136   : > { %v1451_v18 = vpop.f32.mrf.mxu0 }
 0x137   : > { %v1511_v19 = vadd.f32 %v3900_v27, %v1510_v17  ;;  %v1632_v20 = vpop.f32.mrf.mxu1 }
 0x138   : > { %v3490_v21 = vpop.eup %3489  ;;  %v3283_v22 = vpop.f32.mrf.mxu0 }
 0x139   : > { %v1195_v24 = vadd.f32 1.0, %v3490_v21  ;;  %v1513_v25 = vmul.f32 %v1511_v19, %v1511_v19  ;;  %v3301_v29 = vpop.f32.mrf.mxu1  ;;  %v1512_v26 = vmul.f32 0.5, %v1511_v19 }
 0x13a   : > { %v1586_v30 = vpop.f32.mrf.mxu0 }
 0x13b   : > { %v1196_v31 = vmul.f32 %v1195_v24, %v1188_v23  ;;  %v1514_v32 = vmul.f32 %v1513_v25, %v1511_v19  ;;  %v1727_v33 = vpop.f32.mrf.mxu1  ;;  %v1630_v46 = vadd.f32 %v1629_v15, %v1586_v30 }
 0x13c   : > { %v3294_v34 = vpop.f32.mrf.mxu0 }
 0x13d   : > { %v1197_v36 = vpack.c.bf16 %v1196_v31, %v1196_v31  ;;  %v1515_v37 = vmul.f32 0.044715, %v1514_v32  ;;  %v3312_v38 = vpop.f32.mrf.mxu1 }
 0x13e   : > { %v1589_v39 = vpop.f32.mrf.mxu0 }
 0x13f   : > { %2966 = vst.msk [vmem:[%s3908_s10 + $0x8] sm:$0xf] %vm550_vm3, %v1197_v36  ;;  %v1516_v40 = vadd.f32 %v1515_v37, %v1511_v19  ;;  %v1730_v41 = vpop.f32.mrf.mxu1 }
 0x140   : > { %v3295_v42 = vpop.f32.mrf.mxu0 }
 0x141   : > { %v1517_v43 = vmul.f32 0.7978846, %v1516_v40  ;;  %v3313_v44 = vpop.f32.mrf.mxu1 }
 0x142   : > { %v1672_v45 = vpop.f32.mrf.mxu0 }
 0x143   : > { %3491 = vtanh.f32 %v1517_v43  ;;  %v1827_v47 = vpop.f32.mrf.mxu1  ;;  %v1733_v49 = vadd.f32 %v1672_v45, %v1630_v46 }
 0x144   : > { %v3306_v48 = vpop.f32.mrf.mxu0 }
 0x145   : > { %v3324_v50 = vpop.f32.mrf.mxu1  ;;  %v1734_v54 = vadd.f32 %v1733_v49, %v1727_v33 }
 0x146   : > { %v1675_v51 = vpop.f32.mrf.mxu0 }
 0x147   : > { %v1830_v52 = vpop.f32.mrf.mxu1 }
 0x148   : > { %v3307_v53 = vpop.f32.mrf.mxu0 }
 0x149   : > { %v3325_v55 = vpop.f32.mrf.mxu1 }
 0x14a   : > { %v1772_v56 = vpop.f32.mrf.mxu0 }
 0x14b   : > { %v1833_v57 = vadd.f32 %v1772_v56, %v1734_v54  ;;  %v1953_v58 = vpop.f32.mrf.mxu1 }
 0x14c   : > { %v3318_v59 = vpop.f32.mrf.mxu0 }
 0x14d   : > { %v1834_v2 = vadd.f32 %v1833_v57, %v1827_v47  ;;  %v3336_v60 = vpop.f32.mrf.mxu1 }
 0x14e   : > { %v1775_v61 = vpop.f32.mrf.mxu0 }
 0x14f   : > { %v1835_v4 = vadd.f32 %v3900_v27, %v1834_v2  ;;  %v1956_v62 = vpop.f32.mrf.mxu1 }
 0x150   : > { %v3492_v63 = vpop.eup %3491  ;;  %v3319_v6 = vpop.f32.mrf.mxu0 }
 0x151   : > { %v1519_v0 = vadd.f32 1.0, %v3492_v63  ;;  %v1837_v3 = vmul.f32 %v1835_v4, %v1835_v4  ;;  %v3337_v5 = vpop.f32.mrf.mxu1  ;;  %v1836_v44 = vmul.f32 0.5, %v1835_v4 }
 0x152   : > { %v1910_v28 = vpop.f32.mrf.mxu0 }
 0x153   : > { %v1520_v7 = vmul.f32 %v1519_v0, %v1512_v26  ;;  %v1838_v8 = vmul.f32 %v1837_v3, %v1835_v4  ;;  %v2051_v9 = vpop.f32.mrf.mxu1  ;;  %v1954_v19 = vadd.f32 %v1953_v58, %v1910_v28 }
 0x154   : > { %v3330_v10 = vpop.f32.mrf.mxu0 }
 0x155   : > { %v1521_v11 = vpack.c.bf16 %v1520_v7, %v1520_v7  ;;  %v1839_v12 = vmul.f32 0.044715, %v1838_v8  ;;  %v3348_v13 = vpop.f32.mrf.mxu1 }
 0x156   : > { %v1913_v35 = vpop.f32.mrf.mxu0 }
 0x157   : > { %2982 = vst.msk [vmem:[%s3908_s10 + $0xc] sm:$0xf] %vm550_vm3, %v1521_v11  ;;  %v1840_v14 = vadd.f32 %v1839_v12, %v1835_v4  ;;  %v2054_v15 = vpop.f32.mrf.mxu1 }
 0x158   : > { %v3331_v16 = vpop.f32.mrf.mxu0 }
 0x159   : > { %v1841_v17 = vmul.f32 0.7978846, %v1840_v14  ;;  %v3349_v1 = vpop.f32.mrf.mxu1 }
 0x15a   : > { %v1996_v18 = vpop.f32.mrf.mxu0 }
 0x15b   : > { %3493 = vtanh.f32 %v1841_v17  ;;  %v2151_v20 = vpop.f32.mrf.mxu1  ;;  %v2057_v22 = vadd.f32 %v1996_v18, %v1954_v19 }
 0x15c   : > { %v3342_v21 = vpop.f32.mrf.mxu0 }
 0x15d   : > { %v3360_v23 = vpop.f32.mrf.mxu1  ;;  %v2058_v30 = vadd.f32 %v2057_v22, %v2051_v9 }
 0x15e   : > { %v1999_v24 = vpop.f32.mrf.mxu0 }
 0x15f   : > { %v2154_v25 = vpop.f32.mrf.mxu1 }
 0x160   : > { %v3343_v29 = vpop.f32.mrf.mxu0 }
 0x161   : > { %v3361_v31 = vpop.f32.mrf.mxu1 }
 0x162   : > { %v2096_v32 = vpop.f32.mrf.mxu0 }
 0x163   : > { %v2157_v33 = vadd.f32 %v2096_v32, %v2058_v30  ;;  %v2277_v34 = vpop.f32.mrf.mxu1 }
 0x164   : > { %v3354_v36 = vpop.f32.mrf.mxu0 }
 0x165   : > { %v2158_v37 = vadd.f32 %v2157_v33, %v2151_v20  ;;  %v3372_v38 = vpop.f32.mrf.mxu1 }
 0x166   : > { %v2099_v39 = vpop.f32.mrf.mxu0 }
 0x167   : > { %v2159_v40 = vadd.f32 %v3900_v27, %v2158_v37  ;;  %v2280_v41 = vpop.f32.mrf.mxu1 }
 0x168   : > { %v3494_v42 = vpop.eup %3493  ;;  %v3355_v43 = vpop.f32.mrf.mxu0 }
 0x169   : > { %v1843_v45 = vadd.f32 1.0, %v3494_v42  ;;  %v2161_v46 = vmul.f32 %v2159_v40, %v2159_v40  ;;  %v3373_v47 = vpop.f32.mrf.mxu1  ;;  %v2160_v1 = vmul.f32 0.5, %v2159_v40 }
 0x16a   : > { %v2234_v48 = vpop.f32.mrf.mxu0 }
 0x16b   : > { %v1844_v49 = vmul.f32 %v1843_v45, %v1836_v44  ;;  %v2162_v50 = vmul.f32 %v2161_v46, %v2159_v40  ;;  %v2375_v51 = vpop.f32.mrf.mxu1  ;;  %v2278_v4 = vadd.f32 %v2277_v34, %v2234_v48 }
 0x16c   : > { %v3366_v52 = vpop.f32.mrf.mxu0 }
 0x16d   : > { %v1845_v53 = vpack.c.bf16 %v1844_v49, %v1844_v49  ;;  %v2163_v54 = vmul.f32 0.044715, %v2162_v50  ;;  %v3384_v55 = vpop.f32.mrf.mxu1 }
 0x16e   : > { %v2237_v56 = vpop.f32.mrf.mxu0 }
 0x16f   : > { %2998 = vst.msk [vmem:[%s3908_s10 + $0x10] sm:$0xf] %vm550_vm3, %v1845_v53  ;;  %v2164_v57 = vadd.f32 %v2163_v54, %v2159_v40  ;;  %v2378_v58 = vpop.f32.mrf.mxu1 }
 0x170   : > { %v3367_v59 = vpop.f32.mrf.mxu0 }
 0x171   : > { %v2165_v2 = vmul.f32 0.7978846, %v2164_v57  ;;  %v3385_v60 = vpop.f32.mrf.mxu1 }
 0x172   : > { %v2320_v61 = vpop.f32.mrf.mxu0 }
 0x173   : > { %3495 = vtanh.f32 %v2165_v2  ;;  %v2475_v62 = vpop.f32.mrf.mxu1  ;;  %v2381_v6 = vadd.f32 %v2320_v61, %v2278_v4 }
 0x174   : > { %v3378_v63 = vpop.f32.mrf.mxu0 }
 0x175   : > { %v3396_v26 = vpop.f32.mrf.mxu1  ;;  %v2382_v28 = vadd.f32 %v2381_v6, %v2375_v51 }
 0x176   : > { %v2323_v0 = vpop.f32.mrf.mxu0 }
 0x177   : > { %v2478_v3 = vpop.f32.mrf.mxu1 }
 0x178   : > { %v3379_v5 = vpop.f32.mrf.mxu0 }
 0x179   : > { %v3397_v7 = vpop.f32.mrf.mxu1 }
 0x17a   : > { %v2420_v8 = vpop.f32.mrf.mxu0 }
 0x17b   : > { %v2481_v9 = vadd.f32 %v2420_v8, %v2382_v28  ;;  %v2601_v10 = vpop.f32.mrf.mxu1 }
 0x17c   : > { %v3390_v11 = vpop.f32.mrf.mxu0 }
 0x17d   : > { %v2482_v12 = vadd.f32 %v2481_v9, %v2475_v62  ;;  %v3408_v13 = vpop.f32.mrf.mxu1 }
 0x17e   : > { %v2423_v35 = vpop.f32.mrf.mxu0 }
 0x17f   : > { %v2483_v14 = vadd.f32 %v3900_v27, %v2482_v12  ;;  %v2604_v15 = vpop.f32.mrf.mxu1 }
 0x180   : > { %v3496_v16 = vpop.eup %3495  ;;  %v3391_v17 = vpop.f32.mrf.mxu0 }
 0x181   : > { %v2167_v18 = vadd.f32 1.0, %v3496_v16  ;;  %v2485_v19 = vmul.f32 %v2483_v14, %v2483_v14  ;;  %v3409_v20 = vpop.f32.mrf.mxu1  ;;  %v2484_v58 = vmul.f32 0.5, %v2483_v14 }
 0x182   : > { %v2558_v21 = vpop.f32.mrf.mxu0 }
 0x183   : > { %v2168_v22 = vmul.f32 %v2167_v18, %v2160_v1  ;;  %v2486_v23 = vmul.f32 %v2485_v19, %v2483_v14  ;;  %v2699_v24 = vpop.f32.mrf.mxu1  ;;  %v2602_v40 = vadd.f32 %v2601_v10, %v2558_v21 }
 0x184   : > { %v3402_v25 = vpop.f32.mrf.mxu0 }
 0x185   : > { %v2169_v29 = vpack.c.bf16 %v2168_v22, %v2168_v22  ;;  %v2487_v30 = vmul.f32 0.044715, %v2486_v23  ;;  %v3420_v31 = vpop.f32.mrf.mxu1 }
 0x186   : > { %v2561_v32 = vpop.f32.mrf.mxu0 }
 0x187   : > { %3014 = vst.msk [vmem:[%s3908_s10 + $0x14] sm:$0xf] %vm550_vm3, %v2169_v29  ;;  %v2488_v33 = vadd.f32 %v2487_v30, %v2483_v14  ;;  %v2702_v34 = vpop.f32.mrf.mxu1 }
 0x188   : > { %v3403_v36 = vpop.f32.mrf.mxu0 }
 0x189   : > { %v2489_v37 = vmul.f32 0.7978846, %v2488_v33  ;;  %v3421_v38 = vpop.f32.mrf.mxu1 }
 0x18a   : > { %v2644_v39 = vpop.f32.mrf.mxu0 }
 0x18b   : > { %3497 = vtanh.f32 %v2489_v37  ;;  %v2799_v41 = vpop.f32.mrf.mxu1  ;;  %v2705_v43 = vadd.f32 %v2644_v39, %v2602_v40 }
 0x18c   : > { %v3414_v42 = vpop.f32.mrf.mxu0 }
 0x18d   : > { %v3432_v44 = vpop.f32.mrf.mxu1  ;;  %v2706_v48 = vadd.f32 %v2705_v43, %v2699_v24 }
 0x18e   : > { %v2647_v45 = vpop.f32.mrf.mxu0 }
 0x18f   : > { %v2802_v46 = vpop.f32.mrf.mxu1 }
 0x190   : > { %v3415_v47 = vpop.f32.mrf.mxu0 }
 0x191   : > { %v3433_v49 = vpop.f32.mrf.mxu1 }
 0x192   : > { %v2744_v50 = vpop.f32.mrf.mxu0 }
 0x193   : > { %v2805_v51 = vadd.f32 %v2744_v50, %v2706_v48 }
 0x194   : > { %v3426_v52 = vpop.f32.mrf.mxu0 }
 0x195   : > { %v2806_v53 = vadd.f32 %v2805_v51, %v2799_v41 }
 0x196   : > { %v2747_v54 = vpop.f32.mrf.mxu0 }
 0x197   : > { %v2807_v55 = vadd.f32 %v3900_v27, %v2806_v53 }
 0x198   : > { %v3498_v56 = vpop.eup %3497  ;;  %v3427_v57 = vpop.f32.mrf.mxu0 }
 0x199   : > { %v2491_v59 = vadd.f32 1.0, %v3498_v56  ;;  %v2809_v2 = vmul.f32 %v2807_v55, %v2807_v55  ;;  %v2808_v0 = vmul.f32 0.5, %v2807_v55 }
 0x19b   : > { %v2492_v60 = vmul.f32 %v2491_v59, %v2484_v58  ;;  %v2810_v61 = vmul.f32 %v2809_v2, %v2807_v55 }
 0x19d   : > { %v2493_v4 = vpack.c.bf16 %v2492_v60, %v2492_v60  ;;  %v2811_v62 = vmul.f32 0.044715, %v2810_v61 }
 0x19f   : > { %3030 = vst.msk [vmem:[%s3908_s10 + $0x18] sm:$0xf] %vm550_vm3, %v2493_v4  ;;  %v2812_v63 = vadd.f32 %v2811_v62, %v2807_v55 }
 0x1a1   : > { %v2813_v6 = vmul.f32 0.7978846, %v2812_v63 }
 0x1a3   : > { %3499 = vtanh.f32 %v2813_v6 }
 0x1b0   : > { %v3500_v26 = vpop.eup %3499 }
 0x1b1   : > { %v2815_v3 = vadd.f32 1.0, %v3500_v26 }
 0x1b3   : > { %v2816_v5 = vmul.f32 %v2815_v3, %v2808_v0 }
 0x1b5   : > { %v2817_v27 = vpack.c.bf16 %v2816_v5, %v2816_v5 }
 0x1b7   : > { %3046 = vst.msk [vmem:[%s3908_s10 + $0x1c] sm:$0xf] %vm550_vm3, %v2817_v27 }
 0x1b8 PF: > { %s13_s14 = sadd.s32 1, %s3523_s14   ;;  %s3945_s12 = smov %s3519_s13 }
 0x1b9   : > { %p10_p5 = scmp.ge.s32.totalorder %s13_s14, 4   ;;  %s3946_s13 = smov %s3948_s15 }
 0x1bb   :  { %12 = sbr.rel (!%p10_p5) target bundleno = 2 (0x2), region = 77 }

</bundles_post_ra>
